<compile_context>
chip_gen: v7x
topology: tpu7x:2x2x1
jax: 0.10.0
libtpu: 0.0.40
codegen_flags: <defaults>
</compile_context>

<pallas_src>
import functools

import jax
import jax.numpy as jnp
from jax import lax
from jax.experimental import pallas as pl
from jax.experimental.pallas import tpu as pltpu

# ---- model hyperparameters (small, consistent with the module) -------------
VOCAB_SIZE = 16
N_SEG_TYPE = 2
N_HEAD = 4
BATCH = 2
D_MODEL = 32
SEQ_LEN = 8
D_HEAD = D_MODEL // N_HEAD
D_FF = 4 * D_MODEL
PAD_ID = 0
LN_EPS = 1e-5


# ---------------------------------------------------------------------------
# Single-invocation fused kernel: all N_HEAD layer applications, no grid.
# ---------------------------------------------------------------------------
def _encoder_kernel(
    x0_ref, mask_ref,
    wqkv_ref, bqkv_ref, wo_ref, bo_ref, ln_g_ref, ln_b_ref,
    w1_ref, b1_ref, w2_ref, b2_ref,
    out_ref, probs_ref,
    *, B, S, D, H, Dh, n_layers,
):
    # Hoisted loads: every operand is read from VMEM exactly once.
    x = x0_ref[...]                       # (B*S, D) activation carry (in vregs)
    wqkv = wqkv_ref[...]                  # (D, 3D); Q columns pre-scaled by 1/Dh**2
    bqkv = bqkv_ref[...]                  # (1, 3D)
    wo, bo = wo_ref[...], bo_ref[...]
    ln_g, ln_b = ln_g_ref[...], ln_b_ref[...]
    w1, b1 = w1_ref[...], b1_ref[...]
    w2, b2 = w2_ref[...], b2_ref[...]

    # Additive pad mask (0 / -1e9), broadcast ONCE (JAX does not CSE
    # broadcast_in_dim, so do not re-broadcast per head / per layer).
    mask_b = jnp.broadcast_to(mask_ref[...], (B, S, S))

    probs_layers = []
    for _layer in range(n_layers):        # static unroll: weight-shared layers
        # Fused Q/K/V projection: one (B*S, D) x (D, 3D) MXU matmul.
        qkv = jnp.dot(x, wqkv, preferred_element_type=jnp.float32) + bqkv
        qkv3 = qkv.reshape(B, S, 3 * D)   # tiling-trivial reshape

        p_heads, ctx_heads = [], []
        for h in range(H):                # H is small & static
            qh = qkv3[:, :, h * Dh:(h + 1) * Dh]
            kh = qkv3[:, :, D + h * Dh:D + (h + 1) * Dh]
            vh = qkv3[:, :, 2 * D + h * Dh:2 * D + (h + 1) * Dh]
            # scale already folded into Wq/bq; masking is a plain add.
            scores = jnp.einsum('bqd,bkd->bqk', qh, kh,
                                preferred_element_type=jnp.float32) + mask_b
            m = jnp.max(scores, axis=-1, keepdims=True)
            e = jnp.exp(scores - m)
            den = jnp.sum(e, axis=-1, keepdims=True)
            p = e * pl.reciprocal(den, approx=False)   # exact: probs sum to 1
            p_heads.append(p)                          # (B, S, S)
            ctx_heads.append(jnp.einsum('bqk,bkd->bqd', p, vh,
                                        preferred_element_type=jnp.float32))

        # Heads side-by-side along lanes -> (B*S, H*S); feeds the lane-dense
        # probs slab directly (no 4-D stack / strided stores).
        probs_layers.append(
            jnp.concatenate(p_heads, axis=-1).reshape(B * S, H * S))

        ctx = jnp.concatenate(ctx_heads, axis=-1).reshape(B * S, D)
        attn_out = jnp.dot(ctx, wo, preferred_element_type=jnp.float32) + bo

        # --- add & layer-norm (residual is the layer input itself) ---
        h_add = x + attn_out
        mu = jnp.mean(h_add, axis=-1, keepdims=True)
        var = jnp.mean((h_add - mu) ** 2, axis=-1, keepdims=True)
        h_norm = (h_add - mu) * lax.rsqrt(var + LN_EPS) * ln_g + ln_b

        # --- feed-forward: D -> 4D -> GELU(tanh, EUP) -> D ---
        h1 = jnp.dot(h_norm, w1, preferred_element_type=jnp.float32) + b1
        g = jax.nn.gelu(h1, approximate=True)
        x = jnp.dot(g, w2, preferred_element_type=jnp.float32) + b2

    # Exactly two stores for the whole kernel.
    out_ref[...] = x                                          # (B*S, D)
    probs_ref[...] = jnp.concatenate(probs_layers, axis=-1)   # (B*S, L*H*S), lane-dense


def fused_encoder(x2, mask_add, params):
    """Run all N_HEAD weight-shared layer applications in one kernel invocation."""
    BS, D = x2.shape
    assert BS == BATCH * SEQ_LEN and D == D_MODEL

    # Fold the 1/d_head**2 score scale into the Q weight/bias (mirrors
    # K.size(-1) ** 2 in the reference), and fuse Q/K/V into one operand.
    scale = 1.0 / float(D_HEAD ** 2)
    wqkv = jnp.concatenate(
        [params['wq'] * scale, params['wk'], params['wv']], axis=1)   # (D, 3D)
    bqkv = jnp.concatenate(
        [params['bq'] * scale, params['bk'], params['bv']], axis=1)   # (1, 3D)

    inputs = (x2, mask_add, wqkv, bqkv,
              params['wo'], params['bo'], params['ln_g'], params['ln_b'],
              params['w1'], params['b1'], params['w2'], params['b2'])

    # No grid: every operand lives whole-array in VMEM for the whole kernel.
    vmem = pl.BlockSpec(memory_space=pltpu.MemorySpace.VMEM)
    kernel = functools.partial(_encoder_kernel, B=BATCH, S=SEQ_LEN, D=D_MODEL,
                               H=N_HEAD, Dh=D_HEAD, n_layers=N_HEAD)

    out2, probs_flat = pl.pallas_call(
        kernel,
        in_specs=[vmem] * len(inputs),
        out_specs=(vmem, vmem),
        out_shape=(
            jax.ShapeDtypeStruct((BS, D_MODEL), jnp.float32),
            # lane-dense probs slab: columns = layer*(H*S) + head*S + key
            jax.ShapeDtypeStruct((BS, N_HEAD * N_HEAD * SEQ_LEN), jnp.float32),
        ),
    )(*inputs)

    # Layout plumbing in the wrapper: (B*S, L*H*S) -> (L, B, H, S_q, S_k).
    probs_all = jnp.transpose(
        probs_flat.reshape(BATCH, SEQ_LEN, N_HEAD, N_HEAD, SEQ_LEN),
        (2, 0, 3, 1, 4))
    return out2, probs_all


# ---------------------------------------------------------------------------
# Encoder forward (embeddings + mask are plain-JAX glue)
# ---------------------------------------------------------------------------
def encoder_forward(token_ids, seg_ids, params):
    B, S = token_ids.shape

    # positions = arange(S) + 1, zeroed where token is <pad>
    positions = jnp.broadcast_to(jnp.arange(1, S + 1, dtype=jnp.int32), (B, S))
    positions = jnp.where(token_ids == PAD_ID, 0, positions)

    x = (jnp.take(params['enc_emb'], token_ids, axis=0)
         + jnp.take(params['pos_emb'], positions, axis=0)
         + jnp.take(params['seg_emb'], seg_ids, axis=0))           # (B, S, D)

    # additive pad-key mask: 0 where valid, -1e9 where <pad>; shape (B, 1, S)
    mask_add = jnp.where(token_ids == PAD_ID, -1e9, 0.0).astype(jnp.float32)
    mask_add = mask_add[:, None, :]

    out2, probs_all = fused_encoder(
        x.reshape(B * S, D_MODEL).astype(jnp.float32), mask_add, params)
    result = out2.reshape(B, S, D_MODEL)

    # reference collects soft_mat only from the (n_head - 1) loop iterations
    soft_mats = [probs_all[i] for i in range(1, N_HEAD)]
    return result, soft_mats


# ---------------------------------------------------------------------------
# Deterministic parameter init
# ---------------------------------------------------------------------------
def init_params(key):
    ks = jax.random.split(key, 16)
    n = lambda k, shape, s=0.02: (s * jax.random.normal(k, shape)).astype(jnp.float32)
    return {
        'enc_emb': n(ks[0], (VOCAB_SIZE, D_MODEL)),
        'pos_emb': n(ks[1], (SEQ_LEN + 1, D_MODEL)),
        'seg_emb': n(ks[2], (N_SEG_TYPE, D_MODEL)),
        'wq': n(ks[3], (D_MODEL, D_MODEL)), 'bq': jnp.zeros((1, D_MODEL), jnp.float32),
        'wk': n(ks[4], (D_MODEL, D_MODEL)), 'bk': jnp.zeros((1, D_MODEL), jnp.float32),
        'wv': n(ks[5], (D_MODEL, D_MODEL)), 'bv': jnp.zeros((1, D_MODEL), jnp.float32),
        'wo': n(ks[6], (D_MODEL, D_MODEL)), 'bo': jnp.zeros((1, D_MODEL), jnp.float32),
        'ln_g': jnp.ones((1, D_MODEL), jnp.float32),
        'ln_b': jnp.zeros((1, D_MODEL), jnp.float32),
        'w1': n(ks[7], (D_MODEL, D_FF)), 'b1': jnp.zeros((1, D_FF), jnp.float32),
        'w2': n(ks[8], (D_FF, D_MODEL)), 'b2': jnp.zeros((1, D_MODEL), jnp.float32),
    }


if __name__ == "__main__":
    key = jax.random.PRNGKey(0)
    k_tok, k_seg, k_par = jax.random.split(key, 3)

    token_ids = jax.random.randint(k_tok, (BATCH, SEQ_LEN), 1, VOCAB_SIZE,
                                   dtype=jnp.int32)
    # introduce some padding on the second sequence
    token_ids = token_ids.at[1, -2:].set(PAD_ID)
    seg_ids = jax.random.randint(k_seg, (BATCH, SEQ_LEN), 0, N_SEG_TYPE,
                                 dtype=jnp.int32)

    params = init_params(k_par)

    result, soft_mats = jax.jit(encoder_forward)(token_ids, seg_ids, params)
    jax.block_until_ready(result)
    for sm in soft_mats:
        jax.block_until_ready(sm)

    assert result.shape == (BATCH, SEQ_LEN, D_MODEL)
    assert len(soft_mats) == N_HEAD - 1
    assert all(sm.shape == (BATCH, N_HEAD, SEQ_LEN, SEQ_LEN) for sm in soft_mats)
    assert bool(jnp.all(jnp.isfinite(result)))
    assert all(bool(jnp.all(jnp.isfinite(sm))) for sm in soft_mats)
    # softmax rows must sum to 1 (exact reciprocal per the correctness note)
    assert bool(jnp.allclose(jnp.sum(soft_mats[0], axis=-1), 1.0, atol=1e-5))
    print("KERNEL_OK")
</pallas_src>

<mosaic_0001>
module attributes {stable_mosaic.version = 11 : i64} {
  func.func @_encoder_kernel(%arg0: memref<16x32xf32, #tpu.memory_space<vmem>>, %arg1: memref<2x1x8xf32, #tpu.memory_space<vmem>>, %arg2: memref<32x96xf32, #tpu.memory_space<vmem>>, %arg3: memref<1x96xf32, #tpu.memory_space<vmem>>, %arg4: memref<32x32xf32, #tpu.memory_space<vmem>>, %arg5: memref<1x32xf32, #tpu.memory_space<vmem>>, %arg6: memref<1x32xf32, #tpu.memory_space<vmem>>, %arg7: memref<1x32xf32, #tpu.memory_space<vmem>>, %arg8: memref<32x128xf32, #tpu.memory_space<vmem>>, %arg9: memref<1x128xf32, #tpu.memory_space<vmem>>, %arg10: memref<128x32xf32, #tpu.memory_space<vmem>>, %arg11: memref<1x32xf32, #tpu.memory_space<vmem>>, %arg12: memref<16x32xf32, #tpu.memory_space<vmem>>, %arg13: memref<16x128xf32, #tpu.memory_space<vmem>>) attributes {dimension_semantics = [], scalar_prefetch = 0 : i64, scratch_operands = 0 : i64, tpu.core_type = #tpu.core_type<tc>} {
    %c0 = arith.constant 0 : index
    %c0_0 = arith.constant 0 : index
    %0 = vector.load %arg0[%c0, %c0_0] : memref<16x32xf32, #tpu.memory_space<vmem>>, vector<16x32xf32>
    %c0_1 = arith.constant 0 : index
    %c0_2 = arith.constant 0 : index
    %1 = vector.load %arg2[%c0_1, %c0_2] : memref<32x96xf32, #tpu.memory_space<vmem>>, vector<32x96xf32>
    %c0_3 = arith.constant 0 : index
    %c0_4 = arith.constant 0 : index
    %2 = vector.load %arg3[%c0_3, %c0_4] : memref<1x96xf32, #tpu.memory_space<vmem>>, vector<1x96xf32>
    %c0_5 = arith.constant 0 : index
    %c0_6 = arith.constant 0 : index
    %3 = vector.load %arg4[%c0_5, %c0_6] : memref<32x32xf32, #tpu.memory_space<vmem>>, vector<32x32xf32>
    %c0_7 = arith.constant 0 : index
    %c0_8 = arith.constant 0 : index
    %4 = vector.load %arg5[%c0_7, %c0_8] : memref<1x32xf32, #tpu.memory_space<vmem>>, vector<1x32xf32>
    %c0_9 = arith.constant 0 : index
    %c0_10 = arith.constant 0 : index
    %5 = vector.load %arg6[%c0_9, %c0_10] : memref<1x32xf32, #tpu.memory_space<vmem>>, vector<1x32xf32>
    %c0_11 = arith.constant 0 : index
    %c0_12 = arith.constant 0 : index
    %6 = vector.load %arg7[%c0_11, %c0_12] : memref<1x32xf32, #tpu.memory_space<vmem>>, vector<1x32xf32>
    %c0_13 = arith.constant 0 : index
    %c0_14 = arith.constant 0 : index
    %7 = vector.load %arg8[%c0_13, %c0_14] : memref<32x128xf32, #tpu.memory_space<vmem>>, vector<32x128xf32>
    %c0_15 = arith.constant 0 : index
    %c0_16 = arith.constant 0 : index
    %8 = vector.load %arg9[%c0_15, %c0_16] : memref<1x128xf32, #tpu.memory_space<vmem>>, vector<1x128xf32>
    %c0_17 = arith.constant 0 : index
    %c0_18 = arith.constant 0 : index
    %9 = vector.load %arg10[%c0_17, %c0_18] : memref<128x32xf32, #tpu.memory_space<vmem>>, vector<128x32xf32>
    %c0_19 = arith.constant 0 : index
    %c0_20 = arith.constant 0 : index
    %10 = vector.load %arg11[%c0_19, %c0_20] : memref<1x32xf32, #tpu.memory_space<vmem>>, vector<1x32xf32>
    %c0_21 = arith.constant 0 : index
    %c0_22 = arith.constant 0 : index
    %c0_23 = arith.constant 0 : index
    %11 = vector.load %arg1[%c0_21, %c0_22, %c0_23] : memref<2x1x8xf32, #tpu.memory_space<vmem>>, vector<2x1x8xf32>
    %12 = vector.shape_cast %11 : vector<2x1x8xf32> to vector<2x1x8xf32>
    %13 = vector.broadcast %12 : vector<2x1x8xf32> to vector<2x8x8xf32>
    %cst = arith.constant dense<0.000000e+00> : vector<16x96xf32>
    %14 = tpu.matmul %0, %1, %cst {dimension_numbers = #tpu.dot_dimension_numbers<[1], [0], [0], [1], [0, 0, 1, 1], [], []>} : vector<16x32xf32>, vector<32x96xf32>, vector<16x96xf32> -> vector<16x96xf32>
    %15 = vector.broadcast %2 : vector<1x96xf32> to vector<16x96xf32>
    %16 = arith.addf %14, %15 : vector<16x96xf32>
    %17 = vector.shape_cast %16 : vector<16x96xf32> to vector<2x8x96xf32>
    %18 = vector.extract_strided_slice %17 {offsets = [0, 0, 0], sizes = [2, 8, 8], strides = [1, 1, 1]} : vector<2x8x96xf32> to vector<2x8x8xf32>
    %19 = vector.extract_strided_slice %17 {offsets = [0, 0, 32], sizes = [2, 8, 8], strides = [1, 1, 1]} : vector<2x8x96xf32> to vector<2x8x8xf32>
    %20 = vector.extract_strided_slice %17 {offsets = [0, 0, 64], sizes = [2, 8, 8], strides = [1, 1, 1]} : vector<2x8x96xf32> to vector<2x8x8xf32>
    "tpu.trace_start"() <{level = 10 : i32, message = "bqd,bkd->bqk"}> : () -> ()
    %cst_24 = arith.constant dense<0.000000e+00> : vector<2x8x8xf32>
    %21 = tpu.matmul %18, %19, %cst_24 {dimension_numbers = #tpu.dot_dimension_numbers<[2], [2], [1], [1], [0, 0, 0, 1, 1, 1], [0], [0]>} : vector<2x8x8xf32>, vector<2x8x8xf32>, vector<2x8x8xf32> -> vector<2x8x8xf32>
    "tpu.trace_stop"() : () -> ()
    %22 = arith.addf %21, %13 : vector<2x8x8xf32>
    %cst_25 = arith.constant dense<0xFF800000> : vector<2x8xf32>
    %23 = vector.multi_reduction <maximumf>, %22, %cst_25 [2] : vector<2x8x8xf32> to vector<2x8xf32>
    %24 = vector.shape_cast %23 : vector<2x8xf32> to vector<2x8x1xf32>
    %25 = vector.broadcast %24 : vector<2x8x1xf32> to vector<2x8x8xf32>
    %26 = arith.subf %22, %25 : vector<2x8x8xf32>
    %27 = math.exp %26 : vector<2x8x8xf32>
    %cst_26 = arith.constant dense<0.000000e+00> : vector<2x8xf32>
    %28 = vector.multi_reduction <add>, %27, %cst_26 [2] : vector<2x8x8xf32> to vector<2x8xf32>
    %29 = vector.shape_cast %28 : vector<2x8xf32> to vector<2x8x1xf32>
    %30 = tpu.reciprocal %29 : vector<2x8x1xf32> -> vector<2x8x1xf32>
    %31 = vector.broadcast %30 : vector<2x8x1xf32> to vector<2x8x8xf32>
    %32 = arith.mulf %27, %31 : vector<2x8x8xf32>
    "tpu.trace_start"() <{level = 10 : i32, message = "bqk,bkd->bqd"}> : () -> ()
    %cst_27 = arith.constant dense<0.000000e+00> : vector<2x8x8xf32>
    %33 = tpu.matmul %32, %20, %cst_27 {dimension_numbers = #tpu.dot_dimension_numbers<[2], [1], [1], [2], [0, 0, 0, 1, 1, 2], [0], [0]>} : vector<2x8x8xf32>, vector<2x8x8xf32>, vector<2x8x8xf32> -> vector<2x8x8xf32>
    "tpu.trace_stop"() : () -> ()
    %34 = vector.extract_strided_slice %17 {offsets = [0, 0, 8], sizes = [2, 8, 8], strides = [1, 1, 1]} : vector<2x8x96xf32> to vector<2x8x8xf32>
    %35 = vector.extract_strided_slice %17 {offsets = [0, 0, 40], sizes = [2, 8, 8], strides = [1, 1, 1]} : vector<2x8x96xf32> to vector<2x8x8xf32>
    %36 = vector.extract_strided_slice %17 {offsets = [0, 0, 72], sizes = [2, 8, 8], strides = [1, 1, 1]} : vector<2x8x96xf32> to vector<2x8x8xf32>
    "tpu.trace_start"() <{level = 10 : i32, message = "bqd,bkd->bqk"}> : () -> ()
    %cst_28 = arith.constant dense<0.000000e+00> : vector<2x8x8xf32>
    %37 = tpu.matmul %34, %35, %cst_28 {dimension_numbers = #tpu.dot_dimension_numbers<[2], [2], [1], [1], [0, 0, 0, 1, 1, 1], [0], [0]>} : vector<2x8x8xf32>, vector<2x8x8xf32>, vector<2x8x8xf32> -> vector<2x8x8xf32>
    "tpu.trace_stop"() : () -> ()
    %38 = arith.addf %37, %13 : vector<2x8x8xf32>
    %cst_29 = arith.constant dense<0xFF800000> : vector<2x8xf32>
    %39 = vector.multi_reduction <maximumf>, %38, %cst_29 [2] : vector<2x8x8xf32> to vector<2x8xf32>
    %40 = vector.shape_cast %39 : vector<2x8xf32> to vector<2x8x1xf32>
    %41 = vector.broadcast %40 : vector<2x8x1xf32> to vector<2x8x8xf32>
    %42 = arith.subf %38, %41 : vector<2x8x8xf32>
    %43 = math.exp %42 : vector<2x8x8xf32>
    %cst_30 = arith.constant dense<0.000000e+00> : vector<2x8xf32>
    %44 = vector.multi_reduction <add>, %43, %cst_30 [2] : vector<2x8x8xf32> to vector<2x8xf32>
    %45 = vector.shape_cast %44 : vector<2x8xf32> to vector<2x8x1xf32>
    %46 = tpu.reciprocal %45 : vector<2x8x1xf32> -> vector<2x8x1xf32>
    %47 = vector.broadcast %46 : vector<2x8x1xf32> to vector<2x8x8xf32>
    %48 = arith.mulf %43, %47 : vector<2x8x8xf32>
    "tpu.trace_start"() <{level = 10 : i32, message = "bqk,bkd->bqd"}> : () -> ()
    %cst_31 = arith.constant dense<0.000000e+00> : vector<2x8x8xf32>
    %49 = tpu.matmul %48, %36, %cst_31 {dimension_numbers = #tpu.dot_dimension_numbers<[2], [1], [1], [2], [0, 0, 0, 1, 1, 2], [0], [0]>} : vector<2x8x8xf32>, vector<2x8x8xf32>, vector<2x8x8xf32> -> vector<2x8x8xf32>
    "tpu.trace_stop"() : () -> ()
    %50 = vector.extract_strided_slice %17 {offsets = [0, 0, 16], sizes = [2, 8, 8], strides = [1, 1, 1]} : vector<2x8x96xf32> to vector<2x8x8xf32>
    %51 = vector.extract_strided_slice %17 {offsets = [0, 0, 48], sizes = [2, 8, 8], strides = [1, 1, 1]} : vector<2x8x96xf32> to vector<2x8x8xf32>
    %52 = vector.extract_strided_slice %17 {offsets = [0, 0, 80], sizes = [2, 8, 8], strides = [1, 1, 1]} : vector<2x8x96xf32> to vector<2x8x8xf32>
    "tpu.trace_start"() <{level = 10 : i32, message = "bqd,bkd->bqk"}> : () -> ()
    %cst_32 = arith.constant dense<0.000000e+00> : vector<2x8x8xf32>
    %53 = tpu.matmul %50, %51, %cst_32 {dimension_numbers = #tpu.dot_dimension_numbers<[2], [2], [1], [1], [0, 0, 0, 1, 1, 1], [0], [0]>} : vector<2x8x8xf32>, vector<2x8x8xf32>, vector<2x8x8xf32> -> vector<2x8x8xf32>
    "tpu.trace_stop"() : () -> ()
    %54 = arith.addf %53, %13 : vector<2x8x8xf32>
    %cst_33 = arith.constant dense<0xFF800000> : vector<2x8xf32>
    %55 = vector.multi_reduction <maximumf>, %54, %cst_33 [2] : vector<2x8x8xf32> to vector<2x8xf32>
    %56 = vector.shape_cast %55 : vector<2x8xf32> to vector<2x8x1xf32>
    %57 = vector.broadcast %56 : vector<2x8x1xf32> to vector<2x8x8xf32>
    %58 = arith.subf %54, %57 : vector<2x8x8xf32>
    %59 = math.exp %58 : vector<2x8x8xf32>
    %cst_34 = arith.constant dense<0.000000e+00> : vector<2x8xf32>
    %60 = vector.multi_reduction <add>, %59, %cst_34 [2] : vector<2x8x8xf32> to vector<2x8xf32>
    %61 = vector.shape_cast %60 : vector<2x8xf32> to vector<2x8x1xf32>
    %62 = tpu.reciprocal %61 : vector<2x8x1xf32> -> vector<2x8x1xf32>
    %63 = vector.broadcast %62 : vector<2x8x1xf32> to vector<2x8x8xf32>
    %64 = arith.mulf %59, %63 : vector<2x8x8xf32>
    "tpu.trace_start"() <{level = 10 : i32, message = "bqk,bkd->bqd"}> : () -> ()
    %cst_35 = arith.constant dense<0.000000e+00> : vector<2x8x8xf32>
    %65 = tpu.matmul %64, %52, %cst_35 {dimension_numbers = #tpu.dot_dimension_numbers<[2], [1], [1], [2], [0, 0, 0, 1, 1, 2], [0], [0]>} : vector<2x8x8xf32>, vector<2x8x8xf32>, vector<2x8x8xf32> -> vector<2x8x8xf32>
    "tpu.trace_stop"() : () -> ()
    %66 = vector.extract_strided_slice %17 {offsets = [0, 0, 24], sizes = [2, 8, 8], strides = [1, 1, 1]} : vector<2x8x96xf32> to vector<2x8x8xf32>
    %67 = vector.extract_strided_slice %17 {offsets = [0, 0, 56], sizes = [2, 8, 8], strides = [1, 1, 1]} : vector<2x8x96xf32> to vector<2x8x8xf32>
    %68 = vector.extract_strided_slice %17 {offsets = [0, 0, 88], sizes = [2, 8, 8], strides = [1, 1, 1]} : vector<2x8x96xf32> to vector<2x8x8xf32>
    "tpu.trace_start"() <{level = 10 : i32, message = "bqd,bkd->bqk"}> : () -> ()
    %cst_36 = arith.constant dense<0.000000e+00> : vector<2x8x8xf32>
    %69 = tpu.matmul %66, %67, %cst_36 {dimension_numbers = #tpu.dot_dimension_numbers<[2], [2], [1], [1], [0, 0, 0, 1, 1, 1], [0], [0]>} : vector<2x8x8xf32>, vector<2x8x8xf32>, vector<2x8x8xf32> -> vector<2x8x8xf32>
    "tpu.trace_stop"() : () -> ()
    %70 = arith.addf %69, %13 : vector<2x8x8xf32>
    %cst_37 = arith.constant dense<0xFF800000> : vector<2x8xf32>
    %71 = vector.multi_reduction <maximumf>, %70, %cst_37 [2] : vector<2x8x8xf32> to vector<2x8xf32>
    %72 = vector.shape_cast %71 : vector<2x8xf32> to vector<2x8x1xf32>
    %73 = vector.broadcast %72 : vector<2x8x1xf32> to vector<2x8x8xf32>
    %74 = arith.subf %70, %73 : vector<2x8x8xf32>
    %75 = math.exp %74 : vector<2x8x8xf32>
    %cst_38 = arith.constant dense<0.000000e+00> : vector<2x8xf32>
    %76 = vector.multi_reduction <add>, %75, %cst_38 [2] : vector<2x8x8xf32> to vector<2x8xf32>
    %77 = vector.shape_cast %76 : vector<2x8xf32> to vector<2x8x1xf32>
    %78 = tpu.reciprocal %77 : vector<2x8x1xf32> -> vector<2x8x1xf32>
    %79 = vector.broadcast %78 : vector<2x8x1xf32> to vector<2x8x8xf32>
    %80 = arith.mulf %75, %79 : vector<2x8x8xf32>
    "tpu.trace_start"() <{level = 10 : i32, message = "bqk,bkd->bqd"}> : () -> ()
    %cst_39 = arith.constant dense<0.000000e+00> : vector<2x8x8xf32>
    %81 = tpu.matmul %80, %68, %cst_39 {dimension_numbers = #tpu.dot_dimension_numbers<[2], [1], [1], [2], [0, 0, 0, 1, 1, 2], [0], [0]>} : vector<2x8x8xf32>, vector<2x8x8xf32>, vector<2x8x8xf32> -> vector<2x8x8xf32>
    "tpu.trace_stop"() : () -> ()
    %82 = tpu.concatenate %32, %48, %64, %80 in 2 : vector<2x8x8xf32>, vector<2x8x8xf32>, vector<2x8x8xf32>, vector<2x8x8xf32> -> vector<2x8x32xf32>
    %83 = vector.shape_cast %82 : vector<2x8x32xf32> to vector<16x32xf32>
    %84 = tpu.concatenate %33, %49, %65, %81 in 2 : vector<2x8x8xf32>, vector<2x8x8xf32>, vector<2x8x8xf32>, vector<2x8x8xf32> -> vector<2x8x32xf32>
    %85 = vector.shape_cast %84 : vector<2x8x32xf32> to vector<16x32xf32>
    %cst_40 = arith.constant dense<0.000000e+00> : vector<16x32xf32>
    %86 = tpu.matmul %85, %3, %cst_40 {dimension_numbers = #tpu.dot_dimension_numbers<[1], [0], [0], [1], [0, 0, 1, 1], [], []>} : vector<16x32xf32>, vector<32x32xf32>, vector<16x32xf32> -> vector<16x32xf32>
    %87 = vector.broadcast %4 : vector<1x32xf32> to vector<16x32xf32>
    %88 = arith.addf %86, %87 : vector<16x32xf32>
    %89 = arith.addf %0, %88 : vector<16x32xf32>
    %cst_41 = arith.constant dense<0.000000e+00> : vector<16xf32>
    %90 = vector.multi_reduction <add>, %89, %cst_41 [1] : vector<16x32xf32> to vector<16xf32>
    %91 = vector.shape_cast %90 : vector<16xf32> to vector<16x1xf32>
    %cst_42 = arith.constant 3.200000e+01 : f32
    %92 = vector.broadcast %cst_42 : f32 to vector<16x1xf32>
    %93 = arith.divf %91, %92 : vector<16x1xf32>
    %94 = vector.broadcast %93 : vector<16x1xf32> to vector<16x32xf32>
    %95 = arith.subf %89, %94 : vector<16x32xf32>
    %96 = arith.mulf %95, %95 : vector<16x32xf32>
    %cst_43 = arith.constant dense<0.000000e+00> : vector<16xf32>
    %97 = vector.multi_reduction <add>, %96, %cst_43 [1] : vector<16x32xf32> to vector<16xf32>
    %98 = vector.shape_cast %97 : vector<16xf32> to vector<16x1xf32>
    %cst_44 = arith.constant 3.200000e+01 : f32
    %99 = vector.broadcast %cst_44 : f32 to vector<16x1xf32>
    %100 = arith.divf %98, %99 : vector<16x1xf32>
    %101 = vector.broadcast %93 : vector<16x1xf32> to vector<16x32xf32>
    %102 = arith.subf %89, %101 : vector<16x32xf32>
    %cst_45 = arith.constant 9.99999974E-6 : f32
    %103 = vector.broadcast %cst_45 : f32 to vector<16x1xf32>
    %104 = arith.addf %100, %103 : vector<16x1xf32>
    %105 = math.rsqrt %104 : vector<16x1xf32>
    %106 = vector.broadcast %105 : vector<16x1xf32> to vector<16x32xf32>
    %107 = arith.mulf %102, %106 : vector<16x32xf32>
    %108 = vector.broadcast %5 : vector<1x32xf32> to vector<16x32xf32>
    %109 = arith.mulf %107, %108 : vector<16x32xf32>
    %110 = vector.broadcast %6 : vector<1x32xf32> to vector<16x32xf32>
    %111 = arith.addf %109, %110 : vector<16x32xf32>
    %cst_46 = arith.constant dense<0.000000e+00> : vector<16x128xf32>
    %112 = tpu.matmul %111, %7, %cst_46 {dimension_numbers = #tpu.dot_dimension_numbers<[1], [0], [0], [1], [0, 0, 1, 1], [], []>} : vector<16x32xf32>, vector<32x128xf32>, vector<16x128xf32> -> vector<16x128xf32>
    %113 = vector.broadcast %8 : vector<1x128xf32> to vector<16x128xf32>
    %114 = arith.addf %112, %113 : vector<16x128xf32>
    %115 = arith.mulf %114, %114 : vector<16x128xf32>
    %116 = arith.mulf %114, %115 : vector<16x128xf32>
    %cst_47 = arith.constant 4.471500e-02 : f32
    %117 = vector.broadcast %cst_47 : f32 to vector<16x128xf32>
    %118 = arith.mulf %117, %116 : vector<16x128xf32>
    %119 = arith.addf %114, %118 : vector<16x128xf32>
    %cst_48 = arith.constant 0.797884583 : f32
    %120 = vector.broadcast %cst_48 : f32 to vector<16x128xf32>
    %121 = arith.mulf %120, %119 : vector<16x128xf32>
    %122 = math.tanh %121 : vector<16x128xf32>
    %cst_49 = arith.constant 1.000000e+00 : f32
    %123 = vector.broadcast %cst_49 : f32 to vector<16x128xf32>
    %124 = arith.addf %123, %122 : vector<16x128xf32>
    %cst_50 = arith.constant 5.000000e-01 : f32
    %125 = vector.broadcast %cst_50 : f32 to vector<16x128xf32>
    %126 = arith.mulf %125, %124 : vector<16x128xf32>
    %127 = arith.mulf %114, %126 : vector<16x128xf32>
    %cst_51 = arith.constant dense<0.000000e+00> : vector<16x32xf32>
    %128 = tpu.matmul %127, %9, %cst_51 {dimension_numbers = #tpu.dot_dimension_numbers<[1], [0], [0], [1], [0, 0, 1, 1], [], []>} : vector<16x128xf32>, vector<128x32xf32>, vector<16x32xf32> -> vector<16x32xf32>
    %129 = vector.broadcast %10 : vector<1x32xf32> to vector<16x32xf32>
    %130 = arith.addf %128, %129 : vector<16x32xf32>
    %cst_52 = arith.constant dense<0.000000e+00> : vector<16x96xf32>
    %131 = tpu.matmul %130, %1, %cst_52 {dimension_numbers = #tpu.dot_dimension_numbers<[1], [0], [0], [1], [0, 0, 1, 1], [], []>} : vector<16x32xf32>, vector<32x96xf32>, vector<16x96xf32> -> vector<16x96xf32>
    %132 = vector.broadcast %2 : vector<1x96xf32> to vector<16x96xf32>
    %133 = arith.addf %131, %132 : vector<16x96xf32>
    %134 = vector.shape_cast %133 : vector<16x96xf32> to vector<2x8x96xf32>
    %135 = vector.extract_strided_slice %134 {offsets = [0, 0, 0], sizes = [2, 8, 8], strides = [1, 1, 1]} : vector<2x8x96xf32> to vector<2x8x8xf32>
    %136 = vector.extract_strided_slice %134 {offsets = [0, 0, 32], sizes = [2, 8, 8], strides = [1, 1, 1]} : vector<2x8x96xf32> to vector<2x8x8xf32>
    %137 = vector.extract_strided_slice %134 {offsets = [0, 0, 64], sizes = [2, 8, 8], strides = [1, 1, 1]} : vector<2x8x96xf32> to vector<2x8x8xf32>
    "tpu.trace_start"() <{level = 10 : i32, message = "bqd,bkd->bqk"}> : () -> ()
    %cst_53 = arith.constant dense<0.000000e+00> : vector<2x8x8xf32>
    %138 = tpu.matmul %135, %136, %cst_53 {dimension_numbers = #tpu.dot_dimension_numbers<[2], [2], [1], [1], [0, 0, 0, 1, 1, 1], [0], [0]>} : vector<2x8x8xf32>, vector<2x8x8xf32>, vector<2x8x8xf32> -> vector<2x8x8xf32>
    "tpu.trace_stop"() : () -> ()
    %139 = arith.addf %138, %13 : vector<2x8x8xf32>
    %cst_54 = arith.constant dense<0xFF800000> : vector<2x8xf32>
    %140 = vector.multi_reduction <maximumf>, %139, %cst_54 [2] : vector<2x8x8xf32> to vector<2x8xf32>
    %141 = vector.shape_cast %140 : vector<2x8xf32> to vector<2x8x1xf32>
    %142 = vector.broadcast %141 : vector<2x8x1xf32> to vector<2x8x8xf32>
    %143 = arith.subf %139, %142 : vector<2x8x8xf32>
    %144 = math.exp %143 : vector<2x8x8xf32>
    %cst_55 = arith.constant dense<0.000000e+00> : vector<2x8xf32>
    %145 = vector.multi_reduction <add>, %144, %cst_55 [2] : vector<2x8x8xf32> to vector<2x8xf32>
    %146 = vector.shape_cast %145 : vector<2x8xf32> to vector<2x8x1xf32>
    %147 = tpu.reciprocal %146 : vector<2x8x1xf32> -> vector<2x8x1xf32>
    %148 = vector.broadcast %147 : vector<2x8x1xf32> to vector<2x8x8xf32>
    %149 = arith.mulf %144, %148 : vector<2x8x8xf32>
    "tpu.trace_start"() <{level = 10 : i32, message = "bqk,bkd->bqd"}> : () -> ()
    %cst_56 = arith.constant dense<0.000000e+00> : vector<2x8x8xf32>
    %150 = tpu.matmul %149, %137, %cst_56 {dimension_numbers = #tpu.dot_dimension_numbers<[2], [1], [1], [2], [0, 0, 0, 1, 1, 2], [0], [0]>} : vector<2x8x8xf32>, vector<2x8x8xf32>, vector<2x8x8xf32> -> vector<2x8x8xf32>
    "tpu.trace_stop"() : () -> ()
    %151 = vector.extract_strided_slice %134 {offsets = [0, 0, 8], sizes = [2, 8, 8], strides = [1, 1, 1]} : vector<2x8x96xf32> to vector<2x8x8xf32>
    %152 = vector.extract_strided_slice %134 {offsets = [0, 0, 40], sizes = [2, 8, 8], strides = [1, 1, 1]} : vector<2x8x96xf32> to vector<2x8x8xf32>
    %153 = vector.extract_strided_slice %134 {offsets = [0, 0, 72], sizes = [2, 8, 8], strides = [1, 1, 1]} : vector<2x8x96xf32> to vector<2x8x8xf32>
    "tpu.trace_start"() <{level = 10 : i32, message = "bqd,bkd->bqk"}> : () -> ()
    %cst_57 = arith.constant dense<0.000000e+00> : vector<2x8x8xf32>
    %154 = tpu.matmul %151, %152, %cst_57 {dimension_numbers = #tpu.dot_dimension_numbers<[2], [2], [1], [1], [0, 0, 0, 1, 1, 1], [0], [0]>} : vector<2x8x8xf32>, vector<2x8x8xf32>, vector<2x8x8xf32> -> vector<2x8x8xf32>
    "tpu.trace_stop"() : () -> ()
    %155 = arith.addf %154, %13 : vector<2x8x8xf32>
    %cst_58 = arith.constant dense<0xFF800000> : vector<2x8xf32>
    %156 = vector.multi_reduction <maximumf>, %155, %cst_58 [2] : vector<2x8x8xf32> to vector<2x8xf32>
    %157 = vector.shape_cast %156 : vector<2x8xf32> to vector<2x8x1xf32>
    %158 = vector.broadcast %157 : vector<2x8x1xf32> to vector<2x8x8xf32>
    %159 = arith.subf %155, %158 : vector<2x8x8xf32>
    %160 = math.exp %159 : vector<2x8x8xf32>
    %cst_59 = arith.constant dense<0.000000e+00> : vector<2x8xf32>
    %161 = vector.multi_reduction <add>, %160, %cst_59 [2] : vector<2x8x8xf32> to vector<2x8xf32>
    %162 = vector.shape_cast %161 : vector<2x8xf32> to vector<2x8x1xf32>
    %163 = tpu.reciprocal %162 : vector<2x8x1xf32> -> vector<2x8x1xf32>
    %164 = vector.broadcast %163 : vector<2x8x1xf32> to vector<2x8x8xf32>
    %165 = arith.mulf %160, %164 : vector<2x8x8xf32>
    "tpu.trace_start"() <{level = 10 : i32, message = "bqk,bkd->bqd"}> : () -> ()
    %cst_60 = arith.constant dense<0.000000e+00> : vector<2x8x8xf32>
    %166 = tpu.matmul %165, %153, %cst_60 {dimension_numbers = #tpu.dot_dimension_numbers<[2], [1], [1], [2], [0, 0, 0, 1, 1, 2], [0], [0]>} : vector<2x8x8xf32>, vector<2x8x8xf32>, vector<2x8x8xf32> -> vector<2x8x8xf32>
    "tpu.trace_stop"() : () -> ()
    %167 = vector.extract_strided_slice %134 {offsets = [0, 0, 16], sizes = [2, 8, 8], strides = [1, 1, 1]} : vector<2x8x96xf32> to vector<2x8x8xf32>
    %168 = vector.extract_strided_slice %134 {offsets = [0, 0, 48], sizes = [2, 8, 8], strides = [1, 1, 1]} : vector<2x8x96xf32> to vector<2x8x8xf32>
    %169 = vector.extract_strided_slice %134 {offsets = [0, 0, 80], sizes = [2, 8, 8], strides = [1, 1, 1]} : vector<2x8x96xf32> to vector<2x8x8xf32>
    "tpu.trace_start"() <{level = 10 : i32, message = "bqd,bkd->bqk"}> : () -> ()
    %cst_61 = arith.constant dense<0.000000e+00> : vector<2x8x8xf32>
    %170 = tpu.matmul %167, %168, %cst_61 {dimension_numbers = #tpu.dot_dimension_numbers<[2], [2], [1], [1], [0, 0, 0, 1, 1, 1], [0], [0]>} : vector<2x8x8xf32>, vector<2x8x8xf32>, vector<2x8x8xf32> -> vector<2x8x8xf32>
    "tpu.trace_stop"() : () -> ()
    %171 = arith.addf %170, %13 : vector<2x8x8xf32>
    %cst_62 = arith.constant dense<0xFF800000> : vector<2x8xf32>
    %172 = vector.multi_reduction <maximumf>, %171, %cst_62 [2] : vector<2x8x8xf32> to vector<2x8xf32>
    %173 = vector.shape_cast %172 : vector<2x8xf32> to vector<2x8x1xf32>
    %174 = vector.broadcast %173 : vector<2x8x1xf32> to vector<2x8x8xf32>
    %175 = arith.subf %171, %174 : vector<2x8x8xf32>
    %176 = math.exp %175 : vector<2x8x8xf32>
    %cst_63 = arith.constant dense<0.000000e+00> : vector<2x8xf32>
    %177 = vector.multi_reduction <add>, %176, %cst_63 [2] : vector<2x8x8xf32> to vector<2x8xf32>
    %178 = vector.shape_cast %177 : vector<2x8xf32> to vector<2x8x1xf32>
    %179 = tpu.reciprocal %178 : vector<2x8x1xf32> -> vector<2x8x1xf32>
    %180 = vector.broadcast %179 : vector<2x8x1xf32> to vector<2x8x8xf32>
    %181 = arith.mulf %176, %180 : vector<2x8x8xf32>
    "tpu.trace_start"() <{level = 10 : i32, message = "bqk,bkd->bqd"}> : () -> ()
    %cst_64 = arith.constant dense<0.000000e+00> : vector<2x8x8xf32>
    %182 = tpu.matmul %181, %169, %cst_64 {dimension_numbers = #tpu.dot_dimension_numbers<[2], [1], [1], [2], [0, 0, 0, 1, 1, 2], [0], [0]>} : vector<2x8x8xf32>, vector<2x8x8xf32>, vector<2x8x8xf32> -> vector<2x8x8xf32>
    "tpu.trace_stop"() : () -> ()
    %183 = vector.extract_strided_slice %134 {offsets = [0, 0, 24], sizes = [2, 8, 8], strides = [1, 1, 1]} : vector<2x8x96xf32> to vector<2x8x8xf32>
    %184 = vector.extract_strided_slice %134 {offsets = [0, 0, 56], sizes = [2, 8, 8], strides = [1, 1, 1]} : vector<2x8x96xf32> to vector<2x8x8xf32>
    %185 = vector.extract_strided_slice %134 {offsets = [0, 0, 88], sizes = [2, 8, 8], strides = [1, 1, 1]} : vector<2x8x96xf32> to vector<2x8x8xf32>
    "tpu.trace_start"() <{level = 10 : i32, message = "bqd,bkd->bqk"}> : () -> ()
    %cst_65 = arith.constant dense<0.000000e+00> : vector<2x8x8xf32>
    %186 = tpu.matmul %183, %184, %cst_65 {dimension_numbers = #tpu.dot_dimension_numbers<[2], [2], [1], [1], [0, 0, 0, 1, 1, 1], [0], [0]>} : vector<2x8x8xf32>, vector<2x8x8xf32>, vector<2x8x8xf32> -> vector<2x8x8xf32>
    "tpu.trace_stop"() : () -> ()
    %187 = arith.addf %186, %13 : vector<2x8x8xf32>
    %cst_66 = arith.constant dense<0xFF800000> : vector<2x8xf32>
    %188 = vector.multi_reduction <maximumf>, %187, %cst_66 [2] : vector<2x8x8xf32> to vector<2x8xf32>
    %189 = vector.shape_cast %188 : vector<2x8xf32> to vector<2x8x1xf32>
    %190 = vector.broadcast %189 : vector<2x8x1xf32> to vector<2x8x8xf32>
    %191 = arith.subf %187, %190 : vector<2x8x8xf32>
    %192 = math.exp %191 : vector<2x8x8xf32>
    %cst_67 = arith.constant dense<0.000000e+00> : vector<2x8xf32>
    %193 = vector.multi_reduction <add>, %192, %cst_67 [2] : vector<2x8x8xf32> to vector<2x8xf32>
    %194 = vector.shape_cast %193 : vector<2x8xf32> to vector<2x8x1xf32>
    %195 = tpu.reciprocal %194 : vector<2x8x1xf32> -> vector<2x8x1xf32>
    %196 = vector.broadcast %195 : vector<2x8x1xf32> to vector<2x8x8xf32>
    %197 = arith.mulf %192, %196 : vector<2x8x8xf32>
    "tpu.trace_start"() <{level = 10 : i32, message = "bqk,bkd->bqd"}> : () -> ()
    %cst_68 = arith.constant dense<0.000000e+00> : vector<2x8x8xf32>
    %198 = tpu.matmul %197, %185, %cst_68 {dimension_numbers = #tpu.dot_dimension_numbers<[2], [1], [1], [2], [0, 0, 0, 1, 1, 2], [0], [0]>} : vector<2x8x8xf32>, vector<2x8x8xf32>, vector<2x8x8xf32> -> vector<2x8x8xf32>
    "tpu.trace_stop"() : () -> ()
    %199 = tpu.concatenate %149, %165, %181, %197 in 2 : vector<2x8x8xf32>, vector<2x8x8xf32>, vector<2x8x8xf32>, vector<2x8x8xf32> -> vector<2x8x32xf32>
    %200 = vector.shape_cast %199 : vector<2x8x32xf32> to vector<16x32xf32>
    %201 = tpu.concatenate %150, %166, %182, %198 in 2 : vector<2x8x8xf32>, vector<2x8x8xf32>, vector<2x8x8xf32>, vector<2x8x8xf32> -> vector<2x8x32xf32>
    %202 = vector.shape_cast %201 : vector<2x8x32xf32> to vector<16x32xf32>
    %cst_69 = arith.constant dense<0.000000e+00> : vector<16x32xf32>
    %203 = tpu.matmul %202, %3, %cst_69 {dimension_numbers = #tpu.dot_dimension_numbers<[1], [0], [0], [1], [0, 0, 1, 1], [], []>} : vector<16x32xf32>, vector<32x32xf32>, vector<16x32xf32> -> vector<16x32xf32>
    %204 = vector.broadcast %4 : vector<1x32xf32> to vector<16x32xf32>
    %205 = arith.addf %203, %204 : vector<16x32xf32>
    %206 = arith.addf %130, %205 : vector<16x32xf32>
    %cst_70 = arith.constant dense<0.000000e+00> : vector<16xf32>
    %207 = vector.multi_reduction <add>, %206, %cst_70 [1] : vector<16x32xf32> to vector<16xf32>
    %208 = vector.shape_cast %207 : vector<16xf32> to vector<16x1xf32>
    %cst_71 = arith.constant 3.200000e+01 : f32
    %209 = vector.broadcast %cst_71 : f32 to vector<16x1xf32>
    %210 = arith.divf %208, %209 : vector<16x1xf32>
    %211 = vector.broadcast %210 : vector<16x1xf32> to vector<16x32xf32>
    %212 = arith.subf %206, %211 : vector<16x32xf32>
    %213 = arith.mulf %212, %212 : vector<16x32xf32>
    %cst_72 = arith.constant dense<0.000000e+00> : vector<16xf32>
    %214 = vector.multi_reduction <add>, %213, %cst_72 [1] : vector<16x32xf32> to vector<16xf32>
    %215 = vector.shape_cast %214 : vector<16xf32> to vector<16x1xf32>
    %cst_73 = arith.constant 3.200000e+01 : f32
    %216 = vector.broadcast %cst_73 : f32 to vector<16x1xf32>
    %217 = arith.divf %215, %216 : vector<16x1xf32>
    %218 = vector.broadcast %210 : vector<16x1xf32> to vector<16x32xf32>
    %219 = arith.subf %206, %218 : vector<16x32xf32>
    %cst_74 = arith.constant 9.99999974E-6 : f32
    %220 = vector.broadcast %cst_74 : f32 to vector<16x1xf32>
    %221 = arith.addf %217, %220 : vector<16x1xf32>
    %222 = math.rsqrt %221 : vector<16x1xf32>
    %223 = vector.broadcast %222 : vector<16x1xf32> to vector<16x32xf32>
    %224 = arith.mulf %219, %223 : vector<16x32xf32>
    %225 = vector.broadcast %5 : vector<1x32xf32> to vector<16x32xf32>
    %226 = arith.mulf %224, %225 : vector<16x32xf32>
    %227 = vector.broadcast %6 : vector<1x32xf32> to vector<16x32xf32>
    %228 = arith.addf %226, %227 : vector<16x32xf32>
    %cst_75 = arith.constant dense<0.000000e+00> : vector<16x128xf32>
    %229 = tpu.matmul %228, %7, %cst_75 {dimension_numbers = #tpu.dot_dimension_numbers<[1], [0], [0], [1], [0, 0, 1, 1], [], []>} : vector<16x32xf32>, vector<32x128xf32>, vector<16x128xf32> -> vector<16x128xf32>
    %230 = vector.broadcast %8 : vector<1x128xf32> to vector<16x128xf32>
    %231 = arith.addf %229, %230 : vector<16x128xf32>
    %232 = arith.mulf %231, %231 : vector<16x128xf32>
    %233 = arith.mulf %231, %232 : vector<16x128xf32>
    %cst_76 = arith.constant 4.471500e-02 : f32
    %234 = vector.broadcast %cst_76 : f32 to vector<16x128xf32>
    %235 = arith.mulf %234, %233 : vector<16x128xf32>
    %236 = arith.addf %231, %235 : vector<16x128xf32>
    %cst_77 = arith.constant 0.797884583 : f32
    %237 = vector.broadcast %cst_77 : f32 to vector<16x128xf32>
    %238 = arith.mulf %237, %236 : vector<16x128xf32>
    %239 = math.tanh %238 : vector<16x128xf32>
    %cst_78 = arith.constant 1.000000e+00 : f32
    %240 = vector.broadcast %cst_78 : f32 to vector<16x128xf32>
    %241 = arith.addf %240, %239 : vector<16x128xf32>
    %cst_79 = arith.constant 5.000000e-01 : f32
    %242 = vector.broadcast %cst_79 : f32 to vector<16x128xf32>
    %243 = arith.mulf %242, %241 : vector<16x128xf32>
    %244 = arith.mulf %231, %243 : vector<16x128xf32>
    %cst_80 = arith.constant dense<0.000000e+00> : vector<16x32xf32>
    %245 = tpu.matmul %244, %9, %cst_80 {dimension_numbers = #tpu.dot_dimension_numbers<[1], [0], [0], [1], [0, 0, 1, 1], [], []>} : vector<16x128xf32>, vector<128x32xf32>, vector<16x32xf32> -> vector<16x32xf32>
    %246 = vector.broadcast %10 : vector<1x32xf32> to vector<16x32xf32>
    %247 = arith.addf %245, %246 : vector<16x32xf32>
    %cst_81 = arith.constant dense<0.000000e+00> : vector<16x96xf32>
    %248 = tpu.matmul %247, %1, %cst_81 {dimension_numbers = #tpu.dot_dimension_numbers<[1], [0], [0], [1], [0, 0, 1, 1], [], []>} : vector<16x32xf32>, vector<32x96xf32>, vector<16x96xf32> -> vector<16x96xf32>
    %249 = vector.broadcast %2 : vector<1x96xf32> to vector<16x96xf32>
    %250 = arith.addf %248, %249 : vector<16x96xf32>
    %251 = vector.shape_cast %250 : vector<16x96xf32> to vector<2x8x96xf32>
    %252 = vector.extract_strided_slice %251 {offsets = [0, 0, 0], sizes = [2, 8, 8], strides = [1, 1, 1]} : vector<2x8x96xf32> to vector<2x8x8xf32>
    %253 = vector.extract_strided_slice %251 {offsets = [0, 0, 32], sizes = [2, 8, 8], strides = [1, 1, 1]} : vector<2x8x96xf32> to vector<2x8x8xf32>
    %254 = vector.extract_strided_slice %251 {offsets = [0, 0, 64], sizes = [2, 8, 8], strides = [1, 1, 1]} : vector<2x8x96xf32> to vector<2x8x8xf32>
    "tpu.trace_start"() <{level = 10 : i32, message = "bqd,bkd->bqk"}> : () -> ()
    %cst_82 = arith.constant dense<0.000000e+00> : vector<2x8x8xf32>
    %255 = tpu.matmul %252, %253, %cst_82 {dimension_numbers = #tpu.dot_dimension_numbers<[2], [2], [1], [1], [0, 0, 0, 1, 1, 1], [0], [0]>} : vector<2x8x8xf32>, vector<2x8x8xf32>, vector<2x8x8xf32> -> vector<2x8x8xf32>
    "tpu.trace_stop"() : () -> ()
    %256 = arith.addf %255, %13 : vector<2x8x8xf32>
    %cst_83 = arith.constant dense<0xFF800000> : vector<2x8xf32>
    %257 = vector.multi_reduction <maximumf>, %256, %cst_83 [2] : vector<2x8x8xf32> to vector<2x8xf32>
    %258 = vector.shape_cast %257 : vector<2x8xf32> to vector<2x8x1xf32>
    %259 = vector.broadcast %258 : vector<2x8x1xf32> to vector<2x8x8xf32>
    %260 = arith.subf %256, %259 : vector<2x8x8xf32>
    %261 = math.exp %260 : vector<2x8x8xf32>
    %cst_84 = arith.constant dense<0.000000e+00> : vector<2x8xf32>
    %262 = vector.multi_reduction <add>, %261, %cst_84 [2] : vector<2x8x8xf32> to vector<2x8xf32>
    %263 = vector.shape_cast %262 : vector<2x8xf32> to vector<2x8x1xf32>
    %264 = tpu.reciprocal %263 : vector<2x8x1xf32> -> vector<2x8x1xf32>
    %265 = vector.broadcast %264 : vector<2x8x1xf32> to vector<2x8x8xf32>
    %266 = arith.mulf %261, %265 : vector<2x8x8xf32>
    "tpu.trace_start"() <{level = 10 : i32, message = "bqk,bkd->bqd"}> : () -> ()
    %cst_85 = arith.constant dense<0.000000e+00> : vector<2x8x8xf32>
    %267 = tpu.matmul %266, %254, %cst_85 {dimension_numbers = #tpu.dot_dimension_numbers<[2], [1], [1], [2], [0, 0, 0, 1, 1, 2], [0], [0]>} : vector<2x8x8xf32>, vector<2x8x8xf32>, vector<2x8x8xf32> -> vector<2x8x8xf32>
    "tpu.trace_stop"() : () -> ()
    %268 = vector.extract_strided_slice %251 {offsets = [0, 0, 8], sizes = [2, 8, 8], strides = [1, 1, 1]} : vector<2x8x96xf32> to vector<2x8x8xf32>
    %269 = vector.extract_strided_slice %251 {offsets = [0, 0, 40], sizes = [2, 8, 8], strides = [1, 1, 1]} : vector<2x8x96xf32> to vector<2x8x8xf32>
    %270 = vector.extract_strided_slice %251 {offsets = [0, 0, 72], sizes = [2, 8, 8], strides = [1, 1, 1]} : vector<2x8x96xf32> to vector<2x8x8xf32>
    "tpu.trace_start"() <{level = 10 : i32, message = "bqd,bkd->bqk"}> : () -> ()
    %cst_86 = arith.constant dense<0.000000e+00> : vector<2x8x8xf32>
    %271 = tpu.matmul %268, %269, %cst_86 {dimension_numbers = #tpu.dot_dimension_numbers<[2], [2], [1], [1], [0, 0, 0, 1, 1, 1], [0], [0]>} : vector<2x8x8xf32>, vector<2x8x8xf32>, vector<2x8x8xf32> -> vector<2x8x8xf32>
    "tpu.trace_stop"() : () -> ()
    %272 = arith.addf %271, %13 : vector<2x8x8xf32>
    %cst_87 = arith.constant dense<0xFF800000> : vector<2x8xf32>
    %273 = vector.multi_reduction <maximumf>, %272, %cst_87 [2] : vector<2x8x8xf32> to vector<2x8xf32>
    %274 = vector.shape_cast %273 : vector<2x8xf32> to vector<2x8x1xf32>
    %275 = vector.broadcast %274 : vector<2x8x1xf32> to vector<2x8x8xf32>
    %276 = arith.subf %272, %275 : vector<2x8x8xf32>
    %277 = math.exp %276 : vector<2x8x8xf32>
    %cst_88 = arith.constant dense<0.000000e+00> : vector<2x8xf32>
    %278 = vector.multi_reduction <add>, %277, %cst_88 [2] : vector<2x8x8xf32> to vector<2x8xf32>
    %279 = vector.shape_cast %278 : vector<2x8xf32> to vector<2x8x1xf32>
    %280 = tpu.reciprocal %279 : vector<2x8x1xf32> -> vector<2x8x1xf32>
    %281 = vector.broadcast %280 : vector<2x8x1xf32> to vector<2x8x8xf32>
    %282 = arith.mulf %277, %281 : vector<2x8x8xf32>
    "tpu.trace_start"() <{level = 10 : i32, message = "bqk,bkd->bqd"}> : () -> ()
    %cst_89 = arith.constant dense<0.000000e+00> : vector<2x8x8xf32>
    %283 = tpu.matmul %282, %270, %cst_89 {dimension_numbers = #tpu.dot_dimension_numbers<[2], [1], [1], [2], [0, 0, 0, 1, 1, 2], [0], [0]>} : vector<2x8x8xf32>, vector<2x8x8xf32>, vector<2x8x8xf32> -> vector<2x8x8xf32>
    "tpu.trace_stop"() : () -> ()
    %284 = vector.extract_strided_slice %251 {offsets = [0, 0, 16], sizes = [2, 8, 8], strides = [1, 1, 1]} : vector<2x8x96xf32> to vector<2x8x8xf32>
    %285 = vector.extract_strided_slice %251 {offsets = [0, 0, 48], sizes = [2, 8, 8], strides = [1, 1, 1]} : vector<2x8x96xf32> to vector<2x8x8xf32>
    %286 = vector.extract_strided_slice %251 {offsets = [0, 0, 80], sizes = [2, 8, 8], strides = [1, 1, 1]} : vector<2x8x96xf32> to vector<2x8x8xf32>
    "tpu.trace_start"() <{level = 10 : i32, message = "bqd,bkd->bqk"}> : () -> ()
    %cst_90 = arith.constant dense<0.000000e+00> : vector<2x8x8xf32>
    %287 = tpu.matmul %284, %285, %cst_90 {dimension_numbers = #tpu.dot_dimension_numbers<[2], [2], [1], [1], [0, 0, 0, 1, 1, 1], [0], [0]>} : vector<2x8x8xf32>, vector<2x8x8xf32>, vector<2x8x8xf32> -> vector<2x8x8xf32>
    "tpu.trace_stop"() : () -> ()
    %288 = arith.addf %287, %13 : vector<2x8x8xf32>
    %cst_91 = arith.constant dense<0xFF800000> : vector<2x8xf32>
    %289 = vector.multi_reduction <maximumf>, %288, %cst_91 [2] : vector<2x8x8xf32> to vector<2x8xf32>
    %290 = vector.shape_cast %289 : vector<2x8xf32> to vector<2x8x1xf32>
    %291 = vector.broadcast %290 : vector<2x8x1xf32> to vector<2x8x8xf32>
    %292 = arith.subf %288, %291 : vector<2x8x8xf32>
    %293 = math.exp %292 : vector<2x8x8xf32>
    %cst_92 = arith.constant dense<0.000000e+00> : vector<2x8xf32>
    %294 = vector.multi_reduction <add>, %293, %cst_92 [2] : vector<2x8x8xf32> to vector<2x8xf32>
    %295 = vector.shape_cast %294 : vector<2x8xf32> to vector<2x8x1xf32>
    %296 = tpu.reciprocal %295 : vector<2x8x1xf32> -> vector<2x8x1xf32>
    %297 = vector.broadcast %296 : vector<2x8x1xf32> to vector<2x8x8xf32>
    %298 = arith.mulf %293, %297 : vector<2x8x8xf32>
    "tpu.trace_start"() <{level = 10 : i32, message = "bqk,bkd->bqd"}> : () -> ()
    %cst_93 = arith.constant dense<0.000000e+00> : vector<2x8x8xf32>
    %299 = tpu.matmul %298, %286, %cst_93 {dimension_numbers = #tpu.dot_dimension_numbers<[2], [1], [1], [2], [0, 0, 0, 1, 1, 2], [0], [0]>} : vector<2x8x8xf32>, vector<2x8x8xf32>, vector<2x8x8xf32> -> vector<2x8x8xf32>
    "tpu.trace_stop"() : () -> ()
    %300 = vector.extract_strided_slice %251 {offsets = [0, 0, 24], sizes = [2, 8, 8], strides = [1, 1, 1]} : vector<2x8x96xf32> to vector<2x8x8xf32>
    %301 = vector.extract_strided_slice %251 {offsets = [0, 0, 56], sizes = [2, 8, 8], strides = [1, 1, 1]} : vector<2x8x96xf32> to vector<2x8x8xf32>
    %302 = vector.extract_strided_slice %251 {offsets = [0, 0, 88], sizes = [2, 8, 8], strides = [1, 1, 1]} : vector<2x8x96xf32> to vector<2x8x8xf32>
    "tpu.trace_start"() <{level = 10 : i32, message = "bqd,bkd->bqk"}> : () -> ()
    %cst_94 = arith.constant dense<0.000000e+00> : vector<2x8x8xf32>
    %303 = tpu.matmul %300, %301, %cst_94 {dimension_numbers = #tpu.dot_dimension_numbers<[2], [2], [1], [1], [0, 0, 0, 1, 1, 1], [0], [0]>} : vector<2x8x8xf32>, vector<2x8x8xf32>, vector<2x8x8xf32> -> vector<2x8x8xf32>
    "tpu.trace_stop"() : () -> ()
    %304 = arith.addf %303, %13 : vector<2x8x8xf32>
    %cst_95 = arith.constant dense<0xFF800000> : vector<2x8xf32>
    %305 = vector.multi_reduction <maximumf>, %304, %cst_95 [2] : vector<2x8x8xf32> to vector<2x8xf32>
    %306 = vector.shape_cast %305 : vector<2x8xf32> to vector<2x8x1xf32>
    %307 = vector.broadcast %306 : vector<2x8x1xf32> to vector<2x8x8xf32>
    %308 = arith.subf %304, %307 : vector<2x8x8xf32>
    %309 = math.exp %308 : vector<2x8x8xf32>
    %cst_96 = arith.constant dense<0.000000e+00> : vector<2x8xf32>
    %310 = vector.multi_reduction <add>, %309, %cst_96 [2] : vector<2x8x8xf32> to vector<2x8xf32>
    %311 = vector.shape_cast %310 : vector<2x8xf32> to vector<2x8x1xf32>
    %312 = tpu.reciprocal %311 : vector<2x8x1xf32> -> vector<2x8x1xf32>
    %313 = vector.broadcast %312 : vector<2x8x1xf32> to vector<2x8x8xf32>
    %314 = arith.mulf %309, %313 : vector<2x8x8xf32>
    "tpu.trace_start"() <{level = 10 : i32, message = "bqk,bkd->bqd"}> : () -> ()
    %cst_97 = arith.constant dense<0.000000e+00> : vector<2x8x8xf32>
    %315 = tpu.matmul %314, %302, %cst_97 {dimension_numbers = #tpu.dot_dimension_numbers<[2], [1], [1], [2], [0, 0, 0, 1, 1, 2], [0], [0]>} : vector<2x8x8xf32>, vector<2x8x8xf32>, vector<2x8x8xf32> -> vector<2x8x8xf32>
    "tpu.trace_stop"() : () -> ()
    %316 = tpu.concatenate %266, %282, %298, %314 in 2 : vector<2x8x8xf32>, vector<2x8x8xf32>, vector<2x8x8xf32>, vector<2x8x8xf32> -> vector<2x8x32xf32>
    %317 = vector.shape_cast %316 : vector<2x8x32xf32> to vector<16x32xf32>
    %318 = tpu.concatenate %267, %283, %299, %315 in 2 : vector<2x8x8xf32>, vector<2x8x8xf32>, vector<2x8x8xf32>, vector<2x8x8xf32> -> vector<2x8x32xf32>
    %319 = vector.shape_cast %318 : vector<2x8x32xf32> to vector<16x32xf32>
    %cst_98 = arith.constant dense<0.000000e+00> : vector<16x32xf32>
    %320 = tpu.matmul %319, %3, %cst_98 {dimension_numbers = #tpu.dot_dimension_numbers<[1], [0], [0], [1], [0, 0, 1, 1], [], []>} : vector<16x32xf32>, vector<32x32xf32>, vector<16x32xf32> -> vector<16x32xf32>
    %321 = vector.broadcast %4 : vector<1x32xf32> to vector<16x32xf32>
    %322 = arith.addf %320, %321 : vector<16x32xf32>
    %323 = arith.addf %247, %322 : vector<16x32xf32>
    %cst_99 = arith.constant dense<0.000000e+00> : vector<16xf32>
    %324 = vector.multi_reduction <add>, %323, %cst_99 [1] : vector<16x32xf32> to vector<16xf32>
    %325 = vector.shape_cast %324 : vector<16xf32> to vector<16x1xf32>
    %cst_100 = arith.constant 3.200000e+01 : f32
    %326 = vector.broadcast %cst_100 : f32 to vector<16x1xf32>
    %327 = arith.divf %325, %326 : vector<16x1xf32>
    %328 = vector.broadcast %327 : vector<16x1xf32> to vector<16x32xf32>
    %329 = arith.subf %323, %328 : vector<16x32xf32>
    %330 = arith.mulf %329, %329 : vector<16x32xf32>
    %cst_101 = arith.constant dense<0.000000e+00> : vector<16xf32>
    %331 = vector.multi_reduction <add>, %330, %cst_101 [1] : vector<16x32xf32> to vector<16xf32>
    %332 = vector.shape_cast %331 : vector<16xf32> to vector<16x1xf32>
    %cst_102 = arith.constant 3.200000e+01 : f32
    %333 = vector.broadcast %cst_102 : f32 to vector<16x1xf32>
    %334 = arith.divf %332, %333 : vector<16x1xf32>
    %335 = vector.broadcast %327 : vector<16x1xf32> to vector<16x32xf32>
    %336 = arith.subf %323, %335 : vector<16x32xf32>
    %cst_103 = arith.constant 9.99999974E-6 : f32
    %337 = vector.broadcast %cst_103 : f32 to vector<16x1xf32>
    %338 = arith.addf %334, %337 : vector<16x1xf32>
    %339 = math.rsqrt %338 : vector<16x1xf32>
    %340 = vector.broadcast %339 : vector<16x1xf32> to vector<16x32xf32>
    %341 = arith.mulf %336, %340 : vector<16x32xf32>
    %342 = vector.broadcast %5 : vector<1x32xf32> to vector<16x32xf32>
    %343 = arith.mulf %341, %342 : vector<16x32xf32>
    %344 = vector.broadcast %6 : vector<1x32xf32> to vector<16x32xf32>
    %345 = arith.addf %343, %344 : vector<16x32xf32>
    %cst_104 = arith.constant dense<0.000000e+00> : vector<16x128xf32>
    %346 = tpu.matmul %345, %7, %cst_104 {dimension_numbers = #tpu.dot_dimension_numbers<[1], [0], [0], [1], [0, 0, 1, 1], [], []>} : vector<16x32xf32>, vector<32x128xf32>, vector<16x128xf32> -> vector<16x128xf32>
    %347 = vector.broadcast %8 : vector<1x128xf32> to vector<16x128xf32>
    %348 = arith.addf %346, %347 : vector<16x128xf32>
    %349 = arith.mulf %348, %348 : vector<16x128xf32>
    %350 = arith.mulf %348, %349 : vector<16x128xf32>
    %cst_105 = arith.constant 4.471500e-02 : f32
    %351 = vector.broadcast %cst_105 : f32 to vector<16x128xf32>
    %352 = arith.mulf %351, %350 : vector<16x128xf32>
    %353 = arith.addf %348, %352 : vector<16x128xf32>
    %cst_106 = arith.constant 0.797884583 : f32
    %354 = vector.broadcast %cst_106 : f32 to vector<16x128xf32>
    %355 = arith.mulf %354, %353 : vector<16x128xf32>
    %356 = math.tanh %355 : vector<16x128xf32>
    %cst_107 = arith.constant 1.000000e+00 : f32
    %357 = vector.broadcast %cst_107 : f32 to vector<16x128xf32>
    %358 = arith.addf %357, %356 : vector<16x128xf32>
    %cst_108 = arith.constant 5.000000e-01 : f32
    %359 = vector.broadcast %cst_108 : f32 to vector<16x128xf32>
    %360 = arith.mulf %359, %358 : vector<16x128xf32>
    %361 = arith.mulf %348, %360 : vector<16x128xf32>
    %cst_109 = arith.constant dense<0.000000e+00> : vector<16x32xf32>
    %362 = tpu.matmul %361, %9, %cst_109 {dimension_numbers = #tpu.dot_dimension_numbers<[1], [0], [0], [1], [0, 0, 1, 1], [], []>} : vector<16x128xf32>, vector<128x32xf32>, vector<16x32xf32> -> vector<16x32xf32>
    %363 = vector.broadcast %10 : vector<1x32xf32> to vector<16x32xf32>
    %364 = arith.addf %362, %363 : vector<16x32xf32>
    %cst_110 = arith.constant dense<0.000000e+00> : vector<16x96xf32>
    %365 = tpu.matmul %364, %1, %cst_110 {dimension_numbers = #tpu.dot_dimension_numbers<[1], [0], [0], [1], [0, 0, 1, 1], [], []>} : vector<16x32xf32>, vector<32x96xf32>, vector<16x96xf32> -> vector<16x96xf32>
    %366 = vector.broadcast %2 : vector<1x96xf32> to vector<16x96xf32>
    %367 = arith.addf %365, %366 : vector<16x96xf32>
    %368 = vector.shape_cast %367 : vector<16x96xf32> to vector<2x8x96xf32>
    %369 = vector.extract_strided_slice %368 {offsets = [0, 0, 0], sizes = [2, 8, 8], strides = [1, 1, 1]} : vector<2x8x96xf32> to vector<2x8x8xf32>
    %370 = vector.extract_strided_slice %368 {offsets = [0, 0, 32], sizes = [2, 8, 8], strides = [1, 1, 1]} : vector<2x8x96xf32> to vector<2x8x8xf32>
    %371 = vector.extract_strided_slice %368 {offsets = [0, 0, 64], sizes = [2, 8, 8], strides = [1, 1, 1]} : vector<2x8x96xf32> to vector<2x8x8xf32>
    "tpu.trace_start"() <{level = 10 : i32, message = "bqd,bkd->bqk"}> : () -> ()
    %cst_111 = arith.constant dense<0.000000e+00> : vector<2x8x8xf32>
    %372 = tpu.matmul %369, %370, %cst_111 {dimension_numbers = #tpu.dot_dimension_numbers<[2], [2], [1], [1], [0, 0, 0, 1, 1, 1], [0], [0]>} : vector<2x8x8xf32>, vector<2x8x8xf32>, vector<2x8x8xf32> -> vector<2x8x8xf32>
    "tpu.trace_stop"() : () -> ()
    %373 = arith.addf %372, %13 : vector<2x8x8xf32>
    %cst_112 = arith.constant dense<0xFF800000> : vector<2x8xf32>
    %374 = vector.multi_reduction <maximumf>, %373, %cst_112 [2] : vector<2x8x8xf32> to vector<2x8xf32>
    %375 = vector.shape_cast %374 : vector<2x8xf32> to vector<2x8x1xf32>
    %376 = vector.broadcast %375 : vector<2x8x1xf32> to vector<2x8x8xf32>
    %377 = arith.subf %373, %376 : vector<2x8x8xf32>
    %378 = math.exp %377 : vector<2x8x8xf32>
    %cst_113 = arith.constant dense<0.000000e+00> : vector<2x8xf32>
    %379 = vector.multi_reduction <add>, %378, %cst_113 [2] : vector<2x8x8xf32> to vector<2x8xf32>
    %380 = vector.shape_cast %379 : vector<2x8xf32> to vector<2x8x1xf32>
    %381 = tpu.reciprocal %380 : vector<2x8x1xf32> -> vector<2x8x1xf32>
    %382 = vector.broadcast %381 : vector<2x8x1xf32> to vector<2x8x8xf32>
    %383 = arith.mulf %378, %382 : vector<2x8x8xf32>
    "tpu.trace_start"() <{level = 10 : i32, message = "bqk,bkd->bqd"}> : () -> ()
    %cst_114 = arith.constant dense<0.000000e+00> : vector<2x8x8xf32>
    %384 = tpu.matmul %383, %371, %cst_114 {dimension_numbers = #tpu.dot_dimension_numbers<[2], [1], [1], [2], [0, 0, 0, 1, 1, 2], [0], [0]>} : vector<2x8x8xf32>, vector<2x8x8xf32>, vector<2x8x8xf32> -> vector<2x8x8xf32>
    "tpu.trace_stop"() : () -> ()
    %385 = vector.extract_strided_slice %368 {offsets = [0, 0, 8], sizes = [2, 8, 8], strides = [1, 1, 1]} : vector<2x8x96xf32> to vector<2x8x8xf32>
    %386 = vector.extract_strided_slice %368 {offsets = [0, 0, 40], sizes = [2, 8, 8], strides = [1, 1, 1]} : vector<2x8x96xf32> to vector<2x8x8xf32>
    %387 = vector.extract_strided_slice %368 {offsets = [0, 0, 72], sizes = [2, 8, 8], strides = [1, 1, 1]} : vector<2x8x96xf32> to vector<2x8x8xf32>
    "tpu.trace_start"() <{level = 10 : i32, message = "bqd,bkd->bqk"}> : () -> ()
    %cst_115 = arith.constant dense<0.000000e+00> : vector<2x8x8xf32>
    %388 = tpu.matmul %385, %386, %cst_115 {dimension_numbers = #tpu.dot_dimension_numbers<[2], [2], [1], [1], [0, 0, 0, 1, 1, 1], [0], [0]>} : vector<2x8x8xf32>, vector<2x8x8xf32>, vector<2x8x8xf32> -> vector<2x8x8xf32>
    "tpu.trace_stop"() : () -> ()
    %389 = arith.addf %388, %13 : vector<2x8x8xf32>
    %cst_116 = arith.constant dense<0xFF800000> : vector<2x8xf32>
    %390 = vector.multi_reduction <maximumf>, %389, %cst_116 [2] : vector<2x8x8xf32> to vector<2x8xf32>
    %391 = vector.shape_cast %390 : vector<2x8xf32> to vector<2x8x1xf32>
    %392 = vector.broadcast %391 : vector<2x8x1xf32> to vector<2x8x8xf32>
    %393 = arith.subf %389, %392 : vector<2x8x8xf32>
    %394 = math.exp %393 : vector<2x8x8xf32>
    %cst_117 = arith.constant dense<0.000000e+00> : vector<2x8xf32>
    %395 = vector.multi_reduction <add>, %394, %cst_117 [2] : vector<2x8x8xf32> to vector<2x8xf32>
    %396 = vector.shape_cast %395 : vector<2x8xf32> to vector<2x8x1xf32>
    %397 = tpu.reciprocal %396 : vector<2x8x1xf32> -> vector<2x8x1xf32>
    %398 = vector.broadcast %397 : vector<2x8x1xf32> to vector<2x8x8xf32>
    %399 = arith.mulf %394, %398 : vector<2x8x8xf32>
    "tpu.trace_start"() <{level = 10 : i32, message = "bqk,bkd->bqd"}> : () -> ()
    %cst_118 = arith.constant dense<0.000000e+00> : vector<2x8x8xf32>
    %400 = tpu.matmul %399, %387, %cst_118 {dimension_numbers = #tpu.dot_dimension_numbers<[2], [1], [1], [2], [0, 0, 0, 1, 1, 2], [0], [0]>} : vector<2x8x8xf32>, vector<2x8x8xf32>, vector<2x8x8xf32> -> vector<2x8x8xf32>
    "tpu.trace_stop"() : () -> ()
    %401 = vector.extract_strided_slice %368 {offsets = [0, 0, 16], sizes = [2, 8, 8], strides = [1, 1, 1]} : vector<2x8x96xf32> to vector<2x8x8xf32>
    %402 = vector.extract_strided_slice %368 {offsets = [0, 0, 48], sizes = [2, 8, 8], strides = [1, 1, 1]} : vector<2x8x96xf32> to vector<2x8x8xf32>
    %403 = vector.extract_strided_slice %368 {offsets = [0, 0, 80], sizes = [2, 8, 8], strides = [1, 1, 1]} : vector<2x8x96xf32> to vector<2x8x8xf32>
    "tpu.trace_start"() <{level = 10 : i32, message = "bqd,bkd->bqk"}> : () -> ()
    %cst_119 = arith.constant dense<0.000000e+00> : vector<2x8x8xf32>
    %404 = tpu.matmul %401, %402, %cst_119 {dimension_numbers = #tpu.dot_dimension_numbers<[2], [2], [1], [1], [0, 0, 0, 1, 1, 1], [0], [0]>} : vector<2x8x8xf32>, vector<2x8x8xf32>, vector<2x8x8xf32> -> vector<2x8x8xf32>
    "tpu.trace_stop"() : () -> ()
    %405 = arith.addf %404, %13 : vector<2x8x8xf32>
    %cst_120 = arith.constant dense<0xFF800000> : vector<2x8xf32>
    %406 = vector.multi_reduction <maximumf>, %405, %cst_120 [2] : vector<2x8x8xf32> to vector<2x8xf32>
    %407 = vector.shape_cast %406 : vector<2x8xf32> to vector<2x8x1xf32>
    %408 = vector.broadcast %407 : vector<2x8x1xf32> to vector<2x8x8xf32>
    %409 = arith.subf %405, %408 : vector<2x8x8xf32>
    %410 = math.exp %409 : vector<2x8x8xf32>
    %cst_121 = arith.constant dense<0.000000e+00> : vector<2x8xf32>
    %411 = vector.multi_reduction <add>, %410, %cst_121 [2] : vector<2x8x8xf32> to vector<2x8xf32>
    %412 = vector.shape_cast %411 : vector<2x8xf32> to vector<2x8x1xf32>
    %413 = tpu.reciprocal %412 : vector<2x8x1xf32> -> vector<2x8x1xf32>
    %414 = vector.broadcast %413 : vector<2x8x1xf32> to vector<2x8x8xf32>
    %415 = arith.mulf %410, %414 : vector<2x8x8xf32>
    "tpu.trace_start"() <{level = 10 : i32, message = "bqk,bkd->bqd"}> : () -> ()
    %cst_122 = arith.constant dense<0.000000e+00> : vector<2x8x8xf32>
    %416 = tpu.matmul %415, %403, %cst_122 {dimension_numbers = #tpu.dot_dimension_numbers<[2], [1], [1], [2], [0, 0, 0, 1, 1, 2], [0], [0]>} : vector<2x8x8xf32>, vector<2x8x8xf32>, vector<2x8x8xf32> -> vector<2x8x8xf32>
    "tpu.trace_stop"() : () -> ()
    %417 = vector.extract_strided_slice %368 {offsets = [0, 0, 24], sizes = [2, 8, 8], strides = [1, 1, 1]} : vector<2x8x96xf32> to vector<2x8x8xf32>
    %418 = vector.extract_strided_slice %368 {offsets = [0, 0, 56], sizes = [2, 8, 8], strides = [1, 1, 1]} : vector<2x8x96xf32> to vector<2x8x8xf32>
    %419 = vector.extract_strided_slice %368 {offsets = [0, 0, 88], sizes = [2, 8, 8], strides = [1, 1, 1]} : vector<2x8x96xf32> to vector<2x8x8xf32>
    "tpu.trace_start"() <{level = 10 : i32, message = "bqd,bkd->bqk"}> : () -> ()
    %cst_123 = arith.constant dense<0.000000e+00> : vector<2x8x8xf32>
    %420 = tpu.matmul %417, %418, %cst_123 {dimension_numbers = #tpu.dot_dimension_numbers<[2], [2], [1], [1], [0, 0, 0, 1, 1, 1], [0], [0]>} : vector<2x8x8xf32>, vector<2x8x8xf32>, vector<2x8x8xf32> -> vector<2x8x8xf32>
    "tpu.trace_stop"() : () -> ()
    %421 = arith.addf %420, %13 : vector<2x8x8xf32>
    %cst_124 = arith.constant dense<0xFF800000> : vector<2x8xf32>
    %422 = vector.multi_reduction <maximumf>, %421, %cst_124 [2] : vector<2x8x8xf32> to vector<2x8xf32>
    %423 = vector.shape_cast %422 : vector<2x8xf32> to vector<2x8x1xf32>
    %424 = vector.broadcast %423 : vector<2x8x1xf32> to vector<2x8x8xf32>
    %425 = arith.subf %421, %424 : vector<2x8x8xf32>
    %426 = math.exp %425 : vector<2x8x8xf32>
    %cst_125 = arith.constant dense<0.000000e+00> : vector<2x8xf32>
    %427 = vector.multi_reduction <add>, %426, %cst_125 [2] : vector<2x8x8xf32> to vector<2x8xf32>
    %428 = vector.shape_cast %427 : vector<2x8xf32> to vector<2x8x1xf32>
    %429 = tpu.reciprocal %428 : vector<2x8x1xf32> -> vector<2x8x1xf32>
    %430 = vector.broadcast %429 : vector<2x8x1xf32> to vector<2x8x8xf32>
    %431 = arith.mulf %426, %430 : vector<2x8x8xf32>
    "tpu.trace_start"() <{level = 10 : i32, message = "bqk,bkd->bqd"}> : () -> ()
    %cst_126 = arith.constant dense<0.000000e+00> : vector<2x8x8xf32>
    %432 = tpu.matmul %431, %419, %cst_126 {dimension_numbers = #tpu.dot_dimension_numbers<[2], [1], [1], [2], [0, 0, 0, 1, 1, 2], [0], [0]>} : vector<2x8x8xf32>, vector<2x8x8xf32>, vector<2x8x8xf32> -> vector<2x8x8xf32>
    "tpu.trace_stop"() : () -> ()
    %433 = tpu.concatenate %383, %399, %415, %431 in 2 : vector<2x8x8xf32>, vector<2x8x8xf32>, vector<2x8x8xf32>, vector<2x8x8xf32> -> vector<2x8x32xf32>
    %434 = vector.shape_cast %433 : vector<2x8x32xf32> to vector<16x32xf32>
    %435 = tpu.concatenate %384, %400, %416, %432 in 2 : vector<2x8x8xf32>, vector<2x8x8xf32>, vector<2x8x8xf32>, vector<2x8x8xf32> -> vector<2x8x32xf32>
    %436 = vector.shape_cast %435 : vector<2x8x32xf32> to vector<16x32xf32>
    %cst_127 = arith.constant dense<0.000000e+00> : vector<16x32xf32>
    %437 = tpu.matmul %436, %3, %cst_127 {dimension_numbers = #tpu.dot_dimension_numbers<[1], [0], [0], [1], [0, 0, 1, 1], [], []>} : vector<16x32xf32>, vector<32x32xf32>, vector<16x32xf32> -> vector<16x32xf32>
    %438 = vector.broadcast %4 : vector<1x32xf32> to vector<16x32xf32>
    %439 = arith.addf %437, %438 : vector<16x32xf32>
    %440 = arith.addf %364, %439 : vector<16x32xf32>
    %cst_128 = arith.constant dense<0.000000e+00> : vector<16xf32>
    %441 = vector.multi_reduction <add>, %440, %cst_128 [1] : vector<16x32xf32> to vector<16xf32>
    %442 = vector.shape_cast %441 : vector<16xf32> to vector<16x1xf32>
    %cst_129 = arith.constant 3.200000e+01 : f32
    %443 = vector.broadcast %cst_129 : f32 to vector<16x1xf32>
    %444 = arith.divf %442, %443 : vector<16x1xf32>
    %445 = vector.broadcast %444 : vector<16x1xf32> to vector<16x32xf32>
    %446 = arith.subf %440, %445 : vector<16x32xf32>
    %447 = arith.mulf %446, %446 : vector<16x32xf32>
    %cst_130 = arith.constant dense<0.000000e+00> : vector<16xf32>
    %448 = vector.multi_reduction <add>, %447, %cst_130 [1] : vector<16x32xf32> to vector<16xf32>
    %449 = vector.shape_cast %448 : vector<16xf32> to vector<16x1xf32>
    %cst_131 = arith.constant 3.200000e+01 : f32
    %450 = vector.broadcast %cst_131 : f32 to vector<16x1xf32>
    %451 = arith.divf %449, %450 : vector<16x1xf32>
    %452 = vector.broadcast %444 : vector<16x1xf32> to vector<16x32xf32>
    %453 = arith.subf %440, %452 : vector<16x32xf32>
    %cst_132 = arith.constant 9.99999974E-6 : f32
    %454 = vector.broadcast %cst_132 : f32 to vector<16x1xf32>
    %455 = arith.addf %451, %454 : vector<16x1xf32>
    %456 = math.rsqrt %455 : vector<16x1xf32>
    %457 = vector.broadcast %456 : vector<16x1xf32> to vector<16x32xf32>
    %458 = arith.mulf %453, %457 : vector<16x32xf32>
    %459 = vector.broadcast %5 : vector<1x32xf32> to vector<16x32xf32>
    %460 = arith.mulf %458, %459 : vector<16x32xf32>
    %461 = vector.broadcast %6 : vector<1x32xf32> to vector<16x32xf32>
    %462 = arith.addf %460, %461 : vector<16x32xf32>
    %cst_133 = arith.constant dense<0.000000e+00> : vector<16x128xf32>
    %463 = tpu.matmul %462, %7, %cst_133 {dimension_numbers = #tpu.dot_dimension_numbers<[1], [0], [0], [1], [0, 0, 1, 1], [], []>} : vector<16x32xf32>, vector<32x128xf32>, vector<16x128xf32> -> vector<16x128xf32>
    %464 = vector.broadcast %8 : vector<1x128xf32> to vector<16x128xf32>
    %465 = arith.addf %463, %464 : vector<16x128xf32>
    %466 = arith.mulf %465, %465 : vector<16x128xf32>
    %467 = arith.mulf %465, %466 : vector<16x128xf32>
    %cst_134 = arith.constant 4.471500e-02 : f32
    %468 = vector.broadcast %cst_134 : f32 to vector<16x128xf32>
    %469 = arith.mulf %468, %467 : vector<16x128xf32>
    %470 = arith.addf %465, %469 : vector<16x128xf32>
    %cst_135 = arith.constant 0.797884583 : f32
    %471 = vector.broadcast %cst_135 : f32 to vector<16x128xf32>
    %472 = arith.mulf %471, %470 : vector<16x128xf32>
    %473 = math.tanh %472 : vector<16x128xf32>
    %cst_136 = arith.constant 1.000000e+00 : f32
    %474 = vector.broadcast %cst_136 : f32 to vector<16x128xf32>
    %475 = arith.addf %474, %473 : vector<16x128xf32>
    %cst_137 = arith.constant 5.000000e-01 : f32
    %476 = vector.broadcast %cst_137 : f32 to vector<16x128xf32>
    %477 = arith.mulf %476, %475 : vector<16x128xf32>
    %478 = arith.mulf %465, %477 : vector<16x128xf32>
    %cst_138 = arith.constant dense<0.000000e+00> : vector<16x32xf32>
    %479 = tpu.matmul %478, %9, %cst_138 {dimension_numbers = #tpu.dot_dimension_numbers<[1], [0], [0], [1], [0, 0, 1, 1], [], []>} : vector<16x128xf32>, vector<128x32xf32>, vector<16x32xf32> -> vector<16x32xf32>
    %480 = vector.broadcast %10 : vector<1x32xf32> to vector<16x32xf32>
    %481 = arith.addf %479, %480 : vector<16x32xf32>
    %c0_139 = arith.constant 0 : index
    %c0_140 = arith.constant 0 : index
    %482 = vector.load %arg12[%c0_139, %c0_140] : memref<16x32xf32, #tpu.memory_space<vmem>>, vector<16x32xf32>
    tpu.vector_store %arg12[%c0_139, %c0_140], %481 {strides = array<i32>} : memref<16x32xf32, #tpu.memory_space<vmem>>, vector<16x32xf32>,
    %483 = tpu.concatenate %83, %200, %317, %434 in 1 : vector<16x32xf32>, vector<16x32xf32>, vector<16x32xf32>, vector<16x32xf32> -> vector<16x128xf32>
    %c0_141 = arith.constant 0 : index
    %c0_142 = arith.constant 0 : index
    %484 = vector.load %arg13[%c0_141, %c0_142] : memref<16x128xf32, #tpu.memory_space<vmem>>, vector<16x128xf32>
    tpu.vector_store %arg13[%c0_141, %c0_142], %483 {strides = array<i32>} : memref<16x128xf32, #tpu.memory_space<vmem>>, vector<16x128xf32>,
    return
  }
}

</mosaic_0001>

<bundles_post_ra>
// kernel: encoder_forward.1
= control target key start
LH: loop header
LB: loop body
LE: loop exit
PB: predicated region body
PF: predicated region fallthrough
CT: control target
= control target key end

     0   :  { %vm100_vm0 = vcmask 261120   ;;  %s9992_s0 = inlined_call_operand.vmem [shape: f32[16,32], index: 0, kind: input, shape index: {}]   ;;  %s9993_s1 = inlined_call_operand.vmem [shape: f32[2,1,8], index: 1, kind: input, shape index: {}]   ;;  %s9994_s2 = inlined_call_operand.vmem [shape: f32[32,96], index: 2, kind: input, shape index: {}]   ;;  %s9995_s3 = inlined_call_operand.vmem [shape: f32[1,96], index: 3, kind: input, shape index: {}]   ;;  %s9996_s4 = inlined_call_operand.vmem [shape: f32[32,32], index: 4, kind: input, shape index: {}]   ;;  %s9997_s5 = inlined_call_operand.vmem [shape: f32[1,32], index: 5, kind: input, shape index: {}]   ;;  %s9998_s6 = inlined_call_operand.vmem [shape: f32[1,32], index: 6, kind: input, shape index: {}]   ;;  %s9999_s7 = inlined_call_operand.vmem [shape: f32[1,32], index: 7, kind: input, shape index: {}]   ;;  %s10000_s8 = inlined_call_operand.vmem [shape: f32[32,128], index: 8, kind: input, shape index: {}]   ;;  %s10001_s9 = inlined_call_operand.vmem [shape: f32[1,128], index: 9, kind: input, shape index: {}]   ;;  %s10002_s10 = inlined_call_operand.vmem [shape: f32[128,32], index: 10, kind: input, shape index: {}]   ;;  %s10003_s11 = inlined_call_operand.vmem [shape: f32[1,32], index: 11, kind: input, shape index: {}]   ;;  %s10004_s12 = inlined_call_operand.hbm [shape: f32[16,32], index: 12, kind: output, shape index: {0}]   ;;  %s10005_s13 = inlined_call_operand.vmem [shape: f32[16,128], index: 13, kind: output, shape index: {1}]  }
   0x1   :  { %v46_v0 = vld [vmem:[%s9994_s2] sm:$0xff]  ;;  %v47_v1 = vld [vmem:[%s9994_s2 + $0x8] sm:$0xff]  ;;  %v48_v2 = vld [vmem:[%s9994_s2 + $0x10] sm:$0xff] }
   0x2   :  { %v8678_v3 = vpack.c.bf16 %v47_v1, %v46_v0  ;;  %v49_v4 = vld [vmem:[%s9994_s2 + $0x18] sm:$0xff]  ;;  %v8686_v5 = vld [vmem:[%s9992_s0] sm:$0xff] }
   0x3   :  { %v8688_v6 = vpack.c.bf16 %v49_v4, %v48_v2  ;;  %7559 = vmatprep.mubr.msk.f32.mxu1 %vm100_vm0, %v8686_v5 }
   0x4   :  { %19 = vsyncpa [#allocation3], 0  ;;  %8144 = vmatprep.subr.bf16.mxu1 %v8678_v3  ;;  %v8699_v7 = vld [vmem:[%s9992_s0 + $0x8] sm:$0xff]  ;;  %v8580_v8 = vmov 0.0   ;;  %vm8581_vm1 = vmmov 0   ;;  %s8582_s0 = smov 96  }
   0x5   :  { %8146 = vmatpush3.bf16.msra.mxu1 %v8678_v3  ;;  %7572 = vmatprep.subr.mxu0 %v8580_v8  ;;  %v8712_v9 = vld [vmem:[%s9995_s3] ss:$0 sm:$0xff]  ;;  %vm185_vm2 = vcmask 64512   ;;  %v8745_v20 = vld [vmem:[%s9993_s1 + $0x1] ss:$0 sm:$0xff]  ;;  %s8583_s25 = smov 64  }
   0x6   :  { %8148 = vmatprep.subr.bf16.mxu1 %v8688_v6  ;;  %7574 = vmatprep.mubr.msk.f32.mxu0 %vm8581_vm1, %v8580_v8  ;;  %v8739_v16 = vld [vmem:[%s9993_s1] ss:$0 sm:$0xff]  ;;  %s8584_s26 = smov 88   ;;  %s8585_s27 = smov 120   ;;  %vm1524_vm3 = vcmask 195584   ;;  %vm1521_vm4 = vcmask 130048  }
   0x7   :  { %s8586_s28 = smov 56   ;;  %s8587_s29 = smov 80   ;;  %vm7123_vm5 = vcmask 523264   ;;  %vm7126_vm6 = vcmask 785408  }
   0x8   :  { %s8588_s30 = smov 112   ;;  %s8589_s14 = smov 48  }
   0x9   :  { %8150 = vmatpush3.bf16.msra.mxu1 %v8688_v6  ;;  %s8590_s15 = smov 72   ;;  %s8591_s16 = smov 104  }
   0xa   :  { %7562 = vmatprep.subr.mxu1 %v8580_v8  ;;  %s8592_s17 = smov 40   ;;  %s10008_s2 = smov 8  }
   0xb   :  { %s10006_s18 = smov 16   ;;  %s10010_s19 = smov 24  }
   0xc   :  { %7560 = vmatmul.mubr.msk.f32.vlgmr.msra.gmra.mrb[0].mxu1 %vm100_vm0, %v8699_v7  ;;  %s10022_s22 = smov 8   ;;  %s10023_s23 = smov 16  }
   0xd   :  { %7564 = vmatprep.mubr.msk.f32.mxu1 %vm8581_vm1, %v8580_v8  ;;  %s10024_s24 = smov 24  }
  0xdf   :  { %v7561_v10 = vpop.f32.mrb[0].mxu1 }
  0xe0   :  { %v173_v11 = vpop.f32.mrb[1].mxu1  ;;  %v8720_v13 = vadd.f32 %v7561_v10, %v8712_v9 }
  0xe1   :  { %v8715_v12 = vadd.f32 %v8712_v9, %v173_v11 }
  0xe3   :  { %183 = vrot.lane.b32.xlu0 %v8715_v12, %s8582_s0 }
  0xe7   :  { %261 = vrot.lane.b32.xlu0 %v8720_v13, %s8582_s0 }
 0x155   :  { %v184_v14 = vpop.permute.xlu0 %183 }
 0x156   :  { %7563 = vmatpush3.xpose.msk.msra.mxu1 %vm185_vm2, %v184_v14 }
 0x157   :  { %7567 = vmatprep.subr.mxu1 %v8580_v8 }
 0x159   :  { %7565 = vmatmul.mubr.msk.f32.vlgmr.msra.gmra.mrb[2].mxu1 %vm185_vm2, %v8715_v12  ;;  %v262_v15 = vpop.permute.xlu0 %261 }
 0x15a   :  { %7568 = vmatpush3.xpose.msk.msra.mxu1 %vm185_vm2, %v262_v15  ;;  %7569 = vmatprep.mubr.msk.f32.mxu1 %vm8581_vm1, %v8580_v8 }
 0x15b   :  { %7577 = vmatprep.subr.mxu1 %v8580_v8 }
 0x15d   :  { %7570 = vmatmul.mubr.msk.f32.vlgmr.msra.gmra.mrb[4].mxu1 %vm185_vm2, %v8720_v13 }
 0x15e   :  { %7579 = vmatprep.mubr.msk.f32.mxu1 %vm8581_vm1, %v8580_v8 }
 0x22c   :  { %v256_v17 = vpop.f32.mrb[2].mxu1 }
 0x22d   :  { %v257_v18 = vadd.f32 %v8739_v16, %v256_v17  ;;  %v7566_v19 = vpop.f32.mrb[3].mxu1 }
 0x22f   :  { %v337_v21 = vsel %vm185_vm2, %v257_v18, -inf }
 0x230   :  { %338 = vmax.xlane.f32.xlu1 %v337_v21  ;;  %v333_v22 = vpop.f32.mrb[4].mxu1 }
 0x231   :  { %v334_v23 = vadd.f32 %v8745_v20, %v333_v22  ;;  %v7571_v24 = vpop.f32.mrb[5].mxu1 }
 0x233   :  { %v340_v25 = vsel %vm185_vm2, %v334_v23, -inf }
 0x234   :  { %341 = vmax.xlane.f32.xlu1 %v340_v25 }
 0x245   :  { %359 = vrot.lane.b32.xlu1 %v8715_v12, %s8583_s25 }
 0x249   :  { %435 = vrot.lane.b32.xlu1 %v8720_v13, %s8583_s25 }
 0x24d   :  { %513 = vrot.lane.b32.xlu1 %v8715_v12, %s8584_s26 }
 0x251   :  { %591 = vrot.lane.b32.xlu1 %v8720_v13, %s8584_s26 }
 0x2bd   :  { %v339_v26 = vpop.xlane.xlu1 %338 }
 0x2be   :  { %v343_v27 = vsub.f32 %v257_v18, %v339_v26 }
 0x2c0   :  { %v345_v28 = vmul.f32 1.442695, %v343_v27 }
 0x2c1   :  { %v342_v29 = vpop.xlane.xlu1 %341 }
 0x2c2   :  { %8386 = vpow2.f32 %v345_v28  ;;  %v344_v30 = vsub.f32 %v334_v23, %v342_v29 }
 0x2c4   :  { %v347_v31 = vmul.f32 1.442695, %v344_v30 }
 0x2c5   :  { %v360_v32 = vpop.permute.xlu1 %359 }
 0x2c6   :  { %8388 = vpow2.f32 %v347_v31  ;;  %7573 = vmatpush3.msra.mxu0 %v360_v32 }
 0x2c7   :  { %7582 = vmatprep.subr.mxu0 %v8580_v8 }
 0x2c9   :  { %v436_v33 = vpop.permute.xlu1 %435 }
 0x2ca   :  { %7578 = vmatpush3.msra.mxu1 %v436_v33 }
 0x2cb   :  { %7587 = vmatprep.subr.mxu1 %v8580_v8 }
 0x2cc   :  { %v8387_v34 = vpop.eup %8386 }
 0x2cd   :  { %v349_v35 = vsel %vm185_vm2, %v8387_v34, 0.0  ;;  %v514_v38 = vpop.permute.xlu1 %513 }
 0x2ce   :  { %350 = vadd.xlane.f32.xlu0 %v349_v35 }
 0x2d0   :  { %v8389_v36 = vpop.eup %8388 }
 0x2d1   :  { %v352_v37 = vsel %vm185_vm2, %v8389_v36, 0.0  ;;  %v592_v39 = vpop.permute.xlu1 %591 }
 0x2d2   :  { %353 = vadd.xlane.f32.xlu1 %v352_v37 }
 0x2e3   :  { %589 = vrot.lane.b32.xlu1 %v8720_v13, %s8585_s27 }
 0x2e4   :  { %511 = vrot.lane.b32.xlu0 %v8715_v12, %s8585_s27 }
 0x35b   :  { %v351_v40 = vpop.xlane.xlu0 %350 }
 0x35c   :  { %8390 = vrcp.f32 %v351_v40 }
 0x35f   :  { %v354_v41 = vpop.xlane.xlu1 %353  ;;  %v512_v46 = vpop.permute.xlu0 %511 }
 0x360   :  { %8392 = vrcp.f32 %v354_v41 }
 0x363   :  { %v590_v47 = vpop.permute.xlu1 %589 }
 0x366   :  { %v8391_v42 = vpop.eup %8390 }
 0x367   :  { %v8766_v43 = vmul.f32 %v8391_v42, %v8387_v34 }
 0x369   :  { %10020 = vst [vmem:[#allocation5_spill] sm:$0xff] %v8766_v43  ;;  %7575 = vmatmul.mubr.msk.f32.vlgmr.msra.gmra.mrb[0].mxu0 %vm185_vm2, %v8766_v43 }
 0x36a   :  { %v8393_v44 = vpop.eup %8392  ;;  %7583 = vmatpush3.xpose.msk.msra.mxu0 %vm185_vm2, %v514_v38  ;;  %7584 = vmatprep.mubr.msk.f32.mxu0 %vm8581_vm1, %v8580_v8 }
 0x36b   :  { %v8773_v45 = vmul.f32 %v8393_v44, %v8389_v36  ;;  %7592 = vmatprep.subr.mxu0 %v8580_v8 }
 0x36d   :  { %10021 = vst [vmem:[#allocation6_spill] sm:$0xff] %v8773_v45  ;;  %7580 = vmatmul.mubr.msk.f32.vlgmr.msra.gmra.mrb[6].mxu1 %vm185_vm2, %v8773_v45  ;;  %7585 = vmatmul.mubr.msk.f32.vlgmr.msra.gmra.mrb[2].mxu0 %vm185_vm2, %v512_v46 }
 0x36e   :  { %7588 = vmatpush3.xpose.msk.msra.mxu1 %vm185_vm2, %v592_v39  ;;  %7589 = vmatprep.mubr.msk.f32.mxu1 %vm8581_vm1, %v8580_v8 }
 0x36f   :  { %7597 = vmatprep.subr.mxu1 %v8580_v8  ;;  %7594 = vmatprep.mubr.msk.f32.mxu0 %vm8581_vm1, %v8580_v8 }
 0x371   :  { %7590 = vmatmul.mubr.msk.f32.vlgmr.msra.gmra.mrb[8].mxu1 %vm185_vm2, %v590_v47 }
 0x372   :  { %7599 = vmatprep.mubr.msk.f32.mxu1 %vm8581_vm1, %v8580_v8 }
 0x43c   :  { %v8788_v48 = vpop.f32.mrb[0].mxu0 }
 0x43d   :  { %v7576_v49 = vpop.f32.mrb[1].mxu0 }
 0x440   :  { %v8790_v50 = vpop.f32.mrb[6].mxu1  ;;  %v585_v51 = vpop.f32.mrb[2].mxu0 }
 0x441   :  { %v586_v52 = vadd.f32 %v8739_v16, %v585_v51  ;;  %v7581_v53 = vpop.f32.mrb[7].mxu1  ;;  %v7586_v54 = vpop.f32.mrb[3].mxu0 }
 0x443   :  { %v667_v55 = vsel %vm185_vm2, %v586_v52, -inf }
 0x444   :  { %v663_v56 = vpop.f32.mrb[8].mxu1  ;;  %668 = vmax.xlane.f32.xlu1 %v667_v55 }
 0x445   :  { %v664_v57 = vadd.f32 %v8745_v20, %v663_v56  ;;  %v7591_v58 = vpop.f32.mrb[9].mxu1 }
 0x447   :  { %v670_v59 = vsel %vm185_vm2, %v664_v57, -inf }
 0x448   :  { %671 = vmax.xlane.f32.xlu0 %v670_v59 }
 0x455   :  { %689 = vrot.lane.b32.xlu1 %v8715_v12, %s8586_s28 }
 0x459   :  { %843 = vrot.lane.b32.xlu1 %v8715_v12, %s8587_s29 }
 0x45d   :  { %921 = vrot.lane.b32.xlu1 %v8720_v13, %s8587_s29 }
 0x45e   :  { %765 = vrot.lane.b32.xlu0 %v8720_v13, %s8586_s28 }
 0x462   :  { %841 = vrot.lane.b32.xlu0 %v8715_v12, %s8588_s30 }
 0x4d1   :  { %v669_v60 = vpop.xlane.xlu1 %668 }
 0x4d2   :  { %v673_v61 = vsub.f32 %v586_v52, %v669_v60 }
 0x4d4   :  { %v675_v62 = vmul.f32 1.442695, %v673_v61 }
 0x4d5   :  { %v690_v63 = vpop.permute.xlu1 %689  ;;  %v672_v0 = vpop.xlane.xlu0 %671 }
 0x4d6   :  { %8394 = vpow2.f32 %v675_v62  ;;  %v674_v1 = vsub.f32 %v664_v57, %v672_v0  ;;  %7593 = vmatpush3.msra.mxu0 %v690_v63 }
 0x4d7   :  { %7602 = vmatprep.subr.mxu0 %v8580_v8 }
 0x4d8   :  { %v677_v2 = vmul.f32 1.442695, %v674_v1 }
 0x4d9   :  { %v766_v4 = vpop.permute.xlu0 %765  ;;  %v844_v17 = vpop.permute.xlu1 %843 }
 0x4da   :  { %8396 = vpow2.f32 %v677_v2  ;;  %7598 = vmatpush3.msra.mxu1 %v766_v4 }
 0x4db   :  { %7607 = vmatprep.subr.mxu1 %v8580_v8 }
 0x4dd   :  { %v922_v18 = vpop.permute.xlu1 %921  ;;  %v842_v26 = vpop.permute.xlu0 %841 }
 0x4e0   :  { %v8395_v10 = vpop.eup %8394 }
 0x4e1   :  { %v679_v11 = vsel %vm185_vm2, %v8395_v10, 0.0 }
 0x4e2   :  { %680 = vadd.xlane.f32.xlu1 %v679_v11 }
 0x4e4   :  { %v8397_v14 = vpop.eup %8396 }
 0x4e5   :  { %v682_v15 = vsel %vm185_vm2, %v8397_v14, 0.0 }
 0x4e6   :  { %683 = vadd.xlane.f32.xlu1 %v682_v15 }
 0x4f7   :  { %919 = vrot.lane.b32.xlu1 %v8720_v13, %s8588_s30 }
 0x56f   :  { %v681_v19 = vpop.xlane.xlu1 %680 }
 0x570   :  { %8398 = vrcp.f32 %v681_v19 }
 0x573   :  { %v684_v21 = vpop.xlane.xlu1 %683 }
 0x574   :  { %8400 = vrcp.f32 %v684_v21 }
 0x577   :  { %v920_v27 = vpop.permute.xlu1 %919 }
 0x57a   :  { %v8399_v22 = vpop.eup %8398 }
 0x57b   :  { %v8812_v23 = vmul.f32 %v8399_v22, %v8395_v10 }
 0x57d   :  { %7595 = vmatmul.mubr.msk.f32.vlgmr.msra.gmra.mrb[4].mxu0 %vm185_vm2, %v8812_v23 }
 0x57e   :  { %v8401_v24 = vpop.eup %8400  ;;  %7603 = vmatpush3.xpose.msk.msra.mxu0 %vm185_vm2, %v844_v17  ;;  %7604 = vmatprep.mubr.msk.f32.mxu0 %vm8581_vm1, %v8580_v8 }
 0x57f   :  { %v8819_v25 = vmul.f32 %v8401_v24, %v8397_v14  ;;  %7612 = vmatprep.subr.mxu0 %v8580_v8 }
 0x581   :  { %7600 = vmatmul.mubr.msk.f32.vlgmr.msra.gmra.mrb[10].mxu1 %vm185_vm2, %v8819_v25  ;;  %7605 = vmatmul.mubr.msk.f32.vlgmr.msra.gmra.mrb[6].mxu0 %vm185_vm2, %v842_v26 }
 0x582   :  { %7608 = vmatpush3.xpose.msk.msra.mxu1 %vm185_vm2, %v922_v18  ;;  %7609 = vmatprep.mubr.msk.f32.mxu1 %vm8581_vm1, %v8580_v8 }
 0x583   :  { %7617 = vmatprep.subr.mxu1 %v8580_v8  ;;  %7614 = vmatprep.mubr.msk.f32.mxu0 %vm8581_vm1, %v8580_v8 }
 0x585   :  { %7610 = vmatmul.mubr.msk.f32.vlgmr.msra.gmra.mrb[12].mxu1 %vm185_vm2, %v920_v27 }
 0x586   :  { %7619 = vmatprep.mubr.msk.f32.mxu1 %vm8581_vm1, %v8580_v8 }
 0x650   :  { %v8834_v28 = vpop.f32.mrb[4].mxu0 }
 0x651   :  { %v7596_v29 = vpop.f32.mrb[5].mxu0 }
 0x654   :  { %v8836_v30 = vpop.f32.mrb[10].mxu1  ;;  %v915_v31 = vpop.f32.mrb[6].mxu0 }
 0x655   :  { %v916_v32 = vadd.f32 %v8739_v16, %v915_v31  ;;  %v7601_v33 = vpop.f32.mrb[11].mxu1  ;;  %v7606_v34 = vpop.f32.mrb[7].mxu0 }
 0x657   :  { %v997_v35 = vsel %vm185_vm2, %v916_v32, -inf }
 0x658   :  { %v993_v36 = vpop.f32.mrb[12].mxu1  ;;  %998 = vmax.xlane.f32.xlu0 %v997_v35 }
 0x659   :  { %v994_v37 = vadd.f32 %v8745_v20, %v993_v36  ;;  %v7611_v38 = vpop.f32.mrb[13].mxu1 }
 0x65b   :  { %v1000_v39 = vsel %vm185_vm2, %v994_v37, -inf }
 0x65c   :  { %1001 = vmax.xlane.f32.xlu1 %v1000_v39 }
 0x66d   :  { %1019 = vrot.lane.b32.xlu1 %v8715_v12, %s8589_s14 }
 0x66e   :  { %1095 = vrot.lane.b32.xlu0 %v8720_v13, %s8589_s14 }
 0x671   :  { %1173 = vrot.lane.b32.xlu1 %v8715_v12, %s8590_s15 }
 0x675   :  { %1251 = vrot.lane.b32.xlu1 %v8720_v13, %s8590_s15 }
 0x679   :  { %1249 = vrot.lane.b32.xlu1 %v8720_v13, %s8591_s16 }
 0x6e5   :  { %v999_v40 = vpop.xlane.xlu0 %998 }
 0x6e6   :  { %v1003_v41 = vsub.f32 %v916_v32, %v999_v40 }
 0x6e8   :  { %v1005_v42 = vmul.f32 1.442695, %v1003_v41 }
 0x6e9   :  { %v1002_v44 = vpop.xlane.xlu1 %1001  ;;  %v1096_v46 = vpop.permute.xlu0 %1095 }
 0x6ea   :  { %8402 = vpow2.f32 %v1005_v42  ;;  %v1004_v47 = vsub.f32 %v994_v37, %v1002_v44  ;;  %7618 = vmatpush3.msra.mxu1 %v1096_v46  ;;  %v52_v44 = vld [vmem:[%s9996_s4 + $0x8] sm:$0xff] }
 0x6eb   :  { %7627 = vmatprep.subr.mxu1 %v8580_v8 }
 0x6ec   :  { %v1007_v49 = vmul.f32 1.442695, %v1004_v47  ;;  %v53_v47 = vld [vmem:[%s9996_s4 + $0x10] sm:$0xff] }
 0x6ed   :  { %v1020_v51 = vpop.permute.xlu1 %1019 }
 0x6ee   :  { %8404 = vpow2.f32 %v1007_v49  ;;  %7613 = vmatpush3.msra.mxu0 %v1020_v51  ;;  %v54_v49 = vld [vmem:[%s9996_s4 + $0x18] sm:$0xff] }
 0x6ef   :  { %7622 = vmatprep.subr.mxu0 %v8580_v8  ;;  %v8920_v51 = vpack.c.bf16 %v54_v49, %v53_v47 }
 0x6f1   :  { %v1174_v58 = vpop.permute.xlu1 %1173 }
 0x6f4   :  { %v8403_v52 = vpop.eup %8402 }
 0x6f5   :  { %v1009_v53 = vsel %vm185_vm2, %v8403_v52, 0.0  ;;  %v1252_v62 = vpop.permute.xlu1 %1251 }
 0x6f6   :  { %1010 = vadd.xlane.f32.xlu0 %v1009_v53 }
 0x6f8   :  { %v8405_v54 = vpop.eup %8404 }
 0x6f9   :  { %v1012_v55 = vsel %vm185_vm2, %v8405_v54, 0.0  ;;  %v1250_v1 = vpop.permute.xlu1 %1249 }
 0x6fa   :  { %1013 = vadd.xlane.f32.xlu0 %v1012_v55 }
 0x710   :  { %1171 = vrot.lane.b32.xlu0 %v8715_v12, %s8591_s16 }
 0x783   :  { %v1011_v56 = vpop.xlane.xlu0 %1010 }
 0x784   :  { %8406 = vrcp.f32 %v1011_v56 }
 0x787   :  { %v1014_v57 = vpop.xlane.xlu0 %1013 }
 0x788   :  { %8408 = vrcp.f32 %v1014_v57 }
 0x78b   :  { %v1172_v0 = vpop.permute.xlu0 %1171 }
 0x78e   :  { %v8407_v59 = vpop.eup %8406 }
 0x78f   :  { %v8858_v60 = vmul.f32 %v8407_v59, %v8403_v52 }
 0x791   :  { %7615 = vmatmul.mubr.msk.f32.vlgmr.msra.gmra.mrb[8].mxu0 %vm185_vm2, %v8858_v60 }
 0x792   :  { %v8409_v61 = vpop.eup %8408  ;;  %7623 = vmatpush3.xpose.msk.msra.mxu0 %vm185_vm2, %v1174_v58  ;;  %7624 = vmatprep.mubr.msk.f32.mxu0 %vm8581_vm1, %v8580_v8 }
 0x793   :  { %v8865_v63 = vmul.f32 %v8409_v61, %v8405_v54  ;;  %7632 = vmatprep.subr.mxu0 %v8580_v8 }
 0x795   :  { %7620 = vmatmul.mubr.msk.f32.vlgmr.msra.gmra.mrb[14].mxu1 %vm185_vm2, %v8865_v63  ;;  %7625 = vmatmul.mubr.msk.f32.vlgmr.msra.gmra.mrb[10].mxu0 %vm185_vm2, %v1172_v0 }
 0x796   :  { %7628 = vmatpush3.xpose.msk.msra.mxu1 %vm185_vm2, %v1252_v62  ;;  %7629 = vmatprep.mubr.msk.f32.mxu1 %vm8581_vm1, %v8580_v8 }
 0x797   :  { %7637 = vmatprep.subr.mxu1 %v8580_v8  ;;  %7634 = vmatprep.mubr.msk.f32.mxu0 %vm8581_vm1, %v8580_v8 }
 0x799   :  { %7630 = vmatmul.mubr.msk.f32.vlgmr.msra.gmra.mrb[16].mxu1 %vm185_vm2, %v1250_v1 }
 0x79a   :  { %7639 = vmatprep.mubr.msk.f32.mxu1 %vm8581_vm1, %v8580_v8 }
 0x864   :  { %v1091_v2 = vpop.f32.mrb[8].mxu0 }
 0x865   :  { %v7616_v4 = vpop.f32.mrb[9].mxu0 }
 0x868   :  { %v1167_v10 = vpop.f32.mrb[14].mxu1  ;;  %v1245_v11 = vpop.f32.mrb[10].mxu0 }
 0x869   :  { %v1246_v14 = vadd.f32 %v8739_v16, %v1245_v11  ;;  %v7621_v15 = vpop.f32.mrb[15].mxu1  ;;  %v7626_v17 = vpop.f32.mrb[11].mxu0 }
 0x86b   :  { %v1327_v18 = vsel %vm185_vm2, %v1246_v14, -inf }
 0x86c   :  { %v1323_v19 = vpop.f32.mrb[16].mxu1  ;;  %1328 = vmax.xlane.f32.xlu0 %v1327_v18 }
 0x86d   :  { %v1324_v21 = vadd.f32 %v8745_v20, %v1323_v19  ;;  %v7631_v22 = vpop.f32.mrb[17].mxu1 }
 0x86f   :  { %v1330_v24 = vsel %vm185_vm2, %v1324_v21, -inf }
 0x870   :  { %1331 = vmax.xlane.f32.xlu1 %v1330_v24 }
 0x881   :  { %1349 = vrot.lane.b32.xlu1 %v8715_v12, %s8592_s17 }
 0x885   :  { %1529 = vrot.lane.b32.xlu1 %v8834_v28, %s10008_s2 }
 0x889   :  { %1531 = vrot.lane.b32.xlu1 %v8836_v30, %s10008_s2 }
 0x88d   :  { %1539 = vrot.lane.b32.xlu1 %v1167_v10, %s10006_s18 }
 0x8f9   :  { %v1329_v26 = vpop.xlane.xlu0 %1328 }
 0x8fa   :  { %v1333_v27 = vsub.f32 %v1246_v14, %v1329_v26 }
 0x8fc   :  { %v1335_v29 = vmul.f32 1.442695, %v1333_v27 }
 0x8fd   :  { %v1332_v31 = vpop.xlane.xlu1 %1331 }
 0x8fe   :  { %8410 = vpow2.f32 %v1335_v29  ;;  %v1334_v32 = vsub.f32 %v1324_v21, %v1332_v31 }
 0x900   :  { %v1337_v33 = vmul.f32 1.442695, %v1334_v32 }
 0x901   :  { %v1350_v34 = vpop.permute.xlu1 %1349 }
 0x902   :  { %8412 = vpow2.f32 %v1337_v33  ;;  %7633 = vmatpush3.msra.mxu0 %v1350_v34 }
 0x905   :  { %v1530_v56 = vpop.permute.xlu1 %1529 }
 0x906   :  { %v1551_v59 = vsel %vm185_vm2, %v8788_v48, %v1530_v56  ;;  %v8939_v48 = vld [vmem:[%s9997_s5] ss:$0 sm:$0xff] }
 0x908   :  { %v8411_v12 = vpop.eup %8410 }
 0x909   :  { %v1339_v35 = vsel %vm185_vm2, %v8411_v12, 0.0  ;;  %v1532_v57 = vpop.permute.xlu1 %1531 }
 0x90a   :  { %1340 = vadd.xlane.f32.xlu0 %v1339_v35  ;;  %v59_v35 = vld [vmem:[%s10000_s8 + $0x8] sm:$0xff] }
 0x90c   :  { %v8413_v28 = vpop.eup %8412 }
 0x90d   :  { %v1342_v30 = vsel %vm185_vm2, %v8413_v28, 0.0  ;;  %v1540_v61 = vpop.permute.xlu1 %1539 }
 0x90e   :  { %1343 = vadd.xlane.f32.xlu0 %v1342_v30  ;;  %v60_v30 = vld [vmem:[%s10000_s8 + $0x10] sm:$0xff] }
 0x924   :  { %1425 = vrot.lane.b32.xlu0 %v8720_v13, %s8592_s17  ;;  %v51_v13 = vld [vmem:[%s9996_s4] sm:$0xff] }
 0x925   :  { %v8910_v46 = vpack.c.bf16 %v52_v44, %v51_v13 }
 0x928   :  { %1537 = vrot.lane.b32.xlu0 %v1091_v2, %s10006_s18  ;;  %v1552_v2 = vsel %vm185_vm2, %v8790_v50, %v1532_v57 }
 0x929   :  { %v1554_v4 = vsel %vm1521_vm4, %v1552_v2, %v1540_v61  ;;  %v65_v2 = vld [vmem:[%s10002_s10 + $0x10] sm:$0xff] }
 0x997   :  { %v1341_v36 = vpop.xlane.xlu0 %1340 }
 0x998   :  { %8414 = vrcp.f32 %v1341_v36  ;;  %v61_v36 = vld [vmem:[%s10000_s8 + $0x18] sm:$0xff] }
 0x99b   :  { %v1344_v37 = vpop.xlane.xlu0 %1343 }
 0x99c   :  { %8416 = vrcp.f32 %v1344_v37  ;;  %v8965_v37 = vpack.c.bf16 %v61_v36, %v60_v30 }
 0x99f   :  { %v1426_v38 = vpop.permute.xlu0 %1425 }
 0x9a0   :  { %7638 = vmatpush3.msra.mxu1 %v1426_v38 }
 0x9a1   :  { %8152 = vmatprep.subr.bf16.mxu1 %v8910_v46 }
 0x9a2   :  { %v8415_v39 = vpop.eup %8414 }
 0x9a3   :  { %v8896_v40 = vmul.f32 %v8415_v39, %v8411_v12  ;;  %v1538_v58 = vpop.permute.xlu0 %1537 }
 0x9a4   :  { %v1553_v62 = vsel %vm1521_vm4, %v1551_v59, %v1538_v58 }
 0x9a5   :  { %7635 = vmatmul.mubr.msk.f32.vlgmr.msra.gmra.mrb[12].mxu0 %vm185_vm2, %v8896_v40 }
 0x9a6   :  { %v8417_v41 = vpop.eup %8416 }
 0x9a7   :  { %v8900_v42 = vmul.f32 %v8417_v41, %v8413_v28 }
 0x9a9   :  { %7640 = vmatmul.mubr.msk.f32.vlgmr.msra.gmra.mrb[18].mxu1 %vm185_vm2, %v8900_v42 }
 0x9aa   :  { %8154 = vmatpush3.bf16.msra.mxu1 %v8910_v46 }
 0x9ab   :  { %8156 = vmatprep.subr.bf16.mxu1 %v8920_v51 }
 0x9ae   :  { %8158 = vmatpush3.bf16.msra.mxu1 %v8920_v51 }
 0xa78   :  { %v1421_v52 = vpop.f32.mrb[12].mxu0 }
 0xa79   :  { %1545 = vrot.lane.b32.xlu0 %v1421_v52, %s10010_s19  ;;  %v7636_v53 = vpop.f32.mrb[13].mxu0  ;;  %v8973_v52 = vld [vmem:[%s9998_s6] ss:$0 sm:$0xff] }
 0xa7c   :  { %v1497_v54 = vpop.f32.mrb[18].mxu1 }
 0xa7d   :  { %1547 = vrot.lane.b32.xlu1 %v1497_v54, %s10010_s19  ;;  %v7641_v55 = vpop.f32.mrb[19].mxu1  ;;  %v8978_v54 = vld [vmem:[%s9999_s7] ss:$0 sm:$0xff] }
 0xaeb   :  { %v1546_v0 = vpop.permute.xlu0 %1545 }
 0xaec   :  { %v1555_v1 = vsel %vm1524_vm3, %v1553_v62, %v1546_v0  ;;  %v63_v62 = vld [vmem:[%s10002_s10] sm:$0xff]  ;;  %v64_v0 = vld [vmem:[%s10002_s10 + $0x8] sm:$0xff] }
 0xaed   :  { %7650 = vmatprep.mubr.msk.f32.mxu1 %vm100_vm0, %v1555_v1  ;;  %v8996_v1 = vpack.c.bf16 %v64_v0, %v63_v62 }
 0xaef   :  { %v1548_v10 = vpop.permute.xlu1 %1547  ;;  %8168 = vmatprep.subr.bf16.mxu0 %v8996_v1 }
 0xaf0   :  { %v1556_v11 = vsel %vm1524_vm3, %v1554_v4, %v1548_v10  ;;  %8170 = vmatpush3.bf16.msra.mxu0 %v8996_v1  ;;  %v66_v4 = vld [vmem:[%s10002_s10 + $0x18] sm:$0xff] }
 0xaf1   :  { %7651 = vmatmul.mubr.msk.f32.vlgmr.msra.gmra.mrb[20].mxu1 %vm100_vm0, %v1556_v11  ;;  %v9006_v10 = vpack.c.bf16 %v66_v4, %v65_v2  ;;  %v67_v11 = vld [vmem:[%s10002_s10 + $0x20] sm:$0xff] }
 0xaf3   :  { %8172 = vmatprep.subr.bf16.mxu0 %v9006_v10 }
 0xaf4   :  { %8174 = vmatpush3.bf16.msra.mxu0 %v9006_v10 }
 0xbc4   :  { %v7652_v14 = vpop.f32.mrb[20].mxu1 }
 0xbc5   :  { %v1641_v15 = vadd.f32 %v7652_v14, %v8939_v48  ;;  %v1635_v17 = vpop.f32.mrb[21].mxu1  ;;  %v68_v14 = vld [vmem:[%s10002_s10 + $0x28] sm:$0xff] }
 0xbc6   :  { %v1636_v18 = vadd.f32 %v8939_v48, %v1635_v17  ;;  %v69_v17 = vld [vmem:[%s10002_s10 + $0x30] sm:$0xff] }
 0xbc7   :  { %v1645_v50 = vadd.f32 %v1641_v15, %v8699_v7  ;;  %v9016_v15 = vpack.c.bf16 %v68_v14, %v67_v11  ;;  %v9083_v11 = vld [vmem:[%s10003_s11] ss:$0 sm:$0xff] }
 0xbc8   :  { %v1644_v19 = vadd.f32 %v1636_v18, %v8686_v5  ;;  %v58_v5 = vld [vmem:[%s10000_s8] sm:$0xff]  ;;  %v70_v18 = vld [vmem:[%s10002_s10 + $0x38] sm:$0xff] }
 0xbc9   :  { %v1649_v21 = vsel %vm100_vm0, %v1645_v50, 0.0  ;;  %v8955_v28 = vpack.c.bf16 %v59_v35, %v58_v5  ;;  %8176 = vmatprep.subr.bf16.mxu0 %v9016_v15 }
 0xbca   :  { %1650 = vadd.xlane.f32.xlu1 %v1649_v21  ;;  %v1646_v22 = vsel %vm100_vm0, %v1644_v19, 0.0  ;;  %8178 = vmatpush3.bf16.msra.mxu0 %v9016_v15  ;;  %v72_v21 = vld [vmem:[%s10002_s10 + $0x48] sm:$0xff] }
 0xbcb   :  { %1647 = vadd.xlane.f32.xlu0 %v1646_v22  ;;  %8160 = vmatprep.subr.bf16.mxu1 %v8955_v28  ;;  %v73_v22 = vld [vmem:[%s10002_s10 + $0x50] sm:$0xff] }
 0xbcc   :  { %8162 = vmatpush3.bf16.msra.mxu1 %v8955_v28 }
 0xbcd   :  { %8164 = vmatprep.subr.bf16.mxu1 %v8965_v37 }
 0xbd0   :  { %8166 = vmatpush3.bf16.msra.mxu1 %v8965_v37 }
 0xbd1   :  { %8200 = vmatprep.subr.bf16.mxu1 %v8678_v3 }
 0xc57   :  { %v1651_v24 = vpop.xlane.xlu1 %1650 }
 0xc58   :  { %v1654_v26 = vmul.f32 0.03125, %v1651_v24  ;;  %v1648_v27 = vpop.xlane.xlu0 %1647 }
 0xc59   :  { %v1653_v29 = vmul.f32 0.03125, %v1648_v27 }
 0xc5a   :  { %v1656_v31 = vsub.f32 %v1645_v50, %v1654_v26  ;;  %v9026_v50 = vpack.c.bf16 %v70_v18, %v69_v17  ;;  %v74_v26 = vld [vmem:[%s10002_s10 + $0x58] sm:$0xff] }
 0xc5b   :  { %v1655_v32 = vsub.f32 %v1644_v19, %v1653_v29  ;;  %v71_v19 = vld [vmem:[%s10002_s10 + $0x40] sm:$0xff]  ;;  %v9044_v27 = vpack.c.bf16 %v74_v26, %v73_v22 }
 0xc5c   :  { %v1658_v12 = vmul.f32 %v1656_v31, %v1656_v31  ;;  %8180 = vmatprep.subr.bf16.mxu0 %v9026_v50  ;;  %v9039_v24 = vpack.c.bf16 %v72_v21, %v71_v19  ;;  %v75_v29 = vld [vmem:[%s10002_s10 + $0x60] sm:$0xff] }
 0xc5d   :  { %v1657_v33 = vmul.f32 %v1655_v32, %v1655_v32  ;;  %8182 = vmatpush3.bf16.msra.mxu0 %v9026_v50 }
 0xc5e   :  { %v1662_v7 = vsel %vm100_vm0, %v1658_v12, 0.0  ;;  %8184 = vmatprep.subr.bf16.mxu0 %v9039_v24 }
 0xc5f   :  { %v1659_v34 = vsel %vm100_vm0, %v1657_v33, 0.0  ;;  %v77_v33 = vld [vmem:[%s10002_s10 + $0x70] sm:$0xff] }
 0xc60   :  { %1660 = vadd.xlane.f32.xlu0 %v1659_v34  ;;  %v78_v34 = vld [vmem:[%s10002_s10 + $0x78] sm:$0xff] }
 0xc61   :  { %8186 = vmatpush3.bf16.msra.mxu0 %v9039_v24  ;;  %v9065_v12 = vpack.c.bf16 %v78_v34, %v77_v33 }
 0xc62   :  { %8188 = vmatprep.subr.bf16.mxu0 %v9044_v27 }
 0xc64   :  { %1663 = vadd.xlane.f32.xlu0 %v1662_v7  ;;  %v9074_v7 = vld [vmem:[%s10001_s9] ss:$0 sm:$0xff] }
 0xc65   :  { %8190 = vmatpush3.bf16.msra.mxu0 %v9044_v27 }
 0xced   :  { %v1661_v38 = vpop.xlane.xlu0 %1660 }
 0xcee   :  { %v1665_v39 = vmul.f32 0.03125, %v1661_v38 }
 0xcf0   :  { %v1667_v41 = vadd.f32 1e-05, %v1665_v39 }
 0xcf1   :  { %v1664_v13 = vpop.xlane.xlu0 %1663 }
 0xcf2   :  { %8418 = vrsqrt.f32 %v1667_v41  ;;  %v1666_v44 = vmul.f32 0.03125, %v1664_v13 }
 0xcf4   :  { %v1668_v47 = vadd.f32 1e-05, %v1666_v44 }
 0xcf6   :  { %8420 = vrsqrt.f32 %v1668_v47 }
 0xcfc   :  { %v8419_v49 = vpop.eup %8418 }
 0xcfd   :  { %v1671_v53 = vmul.f32 %v8419_v49, %v1655_v32 }
 0xcff   :  { %v1679_v55 = vmul.f32 %v8973_v52, %v1671_v53 }
 0xd00   :  { %v8421_v56 = vpop.eup %8420 }
 0xd01   :  { %v1672_v57 = vmul.f32 %v8421_v56, %v1656_v31  ;;  %v1687_v58 = vadd.f32 %v8978_v54, %v1679_v55  ;;  %v76_v31 = vld [vmem:[%s10002_s10 + $0x68] sm:$0xff] }
 0xd02   :  { %v9055_v32 = vpack.c.bf16 %v76_v31, %v75_v29 }
 0xd03   :  { %7661 = vmatprep.mubr.msk.f32.mxu1 %vm100_vm0, %v1687_v58  ;;  %v1680_v59 = vmul.f32 %v8973_v52, %v1672_v57 }
 0xd04   :  { %8192 = vmatprep.subr.bf16.mxu0 %v9055_v32 }
 0xd05   :  { %v1688_v61 = vadd.f32 %v8978_v54, %v1680_v59  ;;  %8194 = vmatpush3.bf16.msra.mxu0 %v9055_v32 }
 0xd06   :  { %8196 = vmatprep.subr.bf16.mxu0 %v9065_v12 }
 0xd07   :  { %7662 = vmatmul.mubr.msk.f32.vlgmr.msra.gmra.mrb[22].mxu1 %vm100_vm0, %v1688_v61 }
 0xd08   :  { %8202 = vmatpush3.bf16.msra.mxu1 %v8678_v3 }
 0xd09   :  { %8204 = vmatprep.subr.bf16.mxu1 %v8688_v6  ;;  %8198 = vmatpush3.bf16.msra.mxu0 %v9065_v12 }
 0xd0a   :  { %7740 = vmatprep.subr.mxu0 %v8580_v8 }
 0xd0c   :  { %8206 = vmatpush3.bf16.msra.mxu1 %v8688_v6 }
 0xd0d   :  { %7710 = vmatprep.subr.mxu1 %v8580_v8 }
 0xdda   :  { %v7663_v5 = vpop.f32.mrb[22].mxu1 }
 0xddb   :  { %v1773_v35 = vadd.f32 %v7663_v5, %v9074_v7  ;;  %v1767_v30 = vpop.f32.mrb[23].mxu1 }
 0xddc   :  { %v1768_v36 = vadd.f32 %v9074_v7, %v1767_v30 }
 0xddd   :  { %v1777_v38 = vmul.f32 %v1773_v35, %v1773_v35 }
 0xdde   :  { %v1776_v39 = vmul.f32 %v1768_v36, %v1768_v36 }
 0xddf   :  { %v1779_v41 = vmul.f32 %v1777_v38, %v1773_v35 }
 0xde0   :  { %v1778_v13 = vmul.f32 %v1776_v39, %v1768_v36 }
 0xde1   :  { %v1781_v44 = vmul.f32 0.044715, %v1779_v41 }
 0xde2   :  { %v1780_v47 = vmul.f32 0.044715, %v1778_v13 }
 0xde3   :  { %v1783_v49 = vadd.f32 %v1781_v44, %v1773_v35 }
 0xde4   :  { %v1782_v53 = vadd.f32 %v1780_v47, %v1768_v36 }
 0xde5   :  { %v1785_v55 = vmul.f32 0.7978846, %v1783_v49 }
 0xde6   :  { %v1784_v56 = vmul.f32 0.7978846, %v1782_v53 }
 0xde7   :  { %8422 = vtanh.f32 %v1785_v55 }
 0xde8   :  { %8424 = vtanh.f32 %v1784_v56 }
 0xdf1   :  { %v8423_v57 = vpop.eup %8422 }
 0xdf2   :  { %v8425_v58 = vpop.eup %8424  ;;  %v1789_v59 = vadd.f32 1.0, %v8423_v57 }
 0xdf3   :  { %v1788_v61 = vadd.f32 1.0, %v8425_v58 }
 0xdf4   :  { %v1791_v62 = vmul.f32 0.5, %v1789_v59 }
 0xdf5   :  { %v1790_v0 = vmul.f32 0.5, %v1788_v61 }
 0xdf6   :  { %v1793_v4 = vmul.f32 %v1791_v62, %v1773_v35 }
 0xdf7   :  { %v1792_v2 = vmul.f32 %v1790_v0, %v1768_v36 }
 0xdf9   :  { %7696 = vmatprep.mubr.f32.mxu0 %v1792_v2 }
 0xdfa   :  { %7697 = vmatmul.mubr.f32.vlgmr.msra.gmra.mrb[14].mxu0 %v1793_v4 }
 0xdfb   :  { %7742 = vmatprep.mubr.msk.f32.mxu0 %vm8581_vm1, %v8580_v8 }
 0xecd   :  { %v7698_v14 = vpop.f32.mrb[14].mxu0 }
 0xece   :  { %v1866_v17 = vpop.f32.mrb[15].mxu0  ;;  %v9089_v19 = vadd.f32 %v7698_v14, %v9083_v11 }
 0xecf   :  { %v9086_v18 = vadd.f32 %v9083_v11, %v1866_v17 }
 0xed1   :  { %7707 = vmatprep.mubr.msk.f32.mxu1 %vm100_vm0, %v9086_v18 }
 0xed2   :  { %7708 = vmatmul.mubr.msk.f32.vlgmr.msra.gmra.mrb[24].mxu1 %vm100_vm0, %v9089_v19 }
 0xed3   :  { %7712 = vmatprep.mubr.msk.f32.mxu1 %vm8581_vm1, %v8580_v8 }
 0xfa5   :  { %v7709_v21 = vpop.f32.mrb[24].mxu1 }
 0xfa6   :  { %v9098_v22 = vadd.f32 %v7709_v21, %v8712_v9  ;;  %v1947_v26 = vpop.f32.mrb[25].mxu1 }
 0xfa7   :  { %v9101_v29 = vadd.f32 %v8712_v9, %v1947_v26 }
 0xfa8   :  { %2034 = vrot.lane.b32.xlu0 %v9098_v22, %s8582_s0 }
 0xfa9   :  { %1957 = vrot.lane.b32.xlu1 %v9101_v29, %s8582_s0 }
0x101a   :  { %v2035_v33 = vpop.permute.xlu0 %2034 }
0x101b   :  { %v1958_v31 = vpop.permute.xlu1 %1957 }
0x101c   :  { %7711 = vmatpush3.xpose.msk.msra.mxu1 %vm185_vm2, %v1958_v31 }
0x101d   :  { %7715 = vmatprep.subr.mxu1 %v8580_v8 }
0x101f   :  { %7713 = vmatmul.mubr.msk.f32.vlgmr.msra.gmra.mrb[26].mxu1 %vm185_vm2, %v9101_v29 }
0x1020   :  { %7716 = vmatpush3.xpose.msk.msra.mxu1 %vm185_vm2, %v2035_v33  ;;  %7717 = vmatprep.mubr.msk.f32.mxu1 %vm8581_vm1, %v8580_v8 }
0x1021   :  { %7720 = vmatprep.subr.mxu1 %v8580_v8 }
0x1023   :  { %7718 = vmatmul.mubr.msk.f32.vlgmr.msra.gmra.mrb[28].mxu1 %vm185_vm2, %v9098_v22 }
0x1024   :  { %7722 = vmatprep.mubr.msk.f32.mxu1 %vm8581_vm1, %v8580_v8 }
0x10f2   :  { %v2029_v9 = vpop.f32.mrb[26].mxu1 }
0x10f3   :  { %v2030_v34 = vadd.f32 %v8739_v16, %v2029_v9  ;;  %v7714_v5 = vpop.f32.mrb[27].mxu1 }
0x10f5   :  { %v2110_v35 = vsel %vm185_vm2, %v2030_v34, -inf }
0x10f6   :  { %2111 = vmax.xlane.f32.xlu1 %v2110_v35  ;;  %v2106_v30 = vpop.f32.mrb[28].mxu1 }
0x10f7   :  { %v2107_v36 = vadd.f32 %v8745_v20, %v2106_v30  ;;  %v7719_v38 = vpop.f32.mrb[29].mxu1 }
0x10f9   :  { %v2113_v39 = vsel %vm185_vm2, %v2107_v36, -inf }
0x10fa   :  { %2114 = vmax.xlane.f32.xlu0 %v2113_v39 }
0x1107   :  { %2132 = vrot.lane.b32.xlu1 %v9101_v29, %s8583_s25 }
0x1183   :  { %v2112_v41 = vpop.xlane.xlu1 %2111 }
0x1184   :  { %v2116_v13 = vsub.f32 %v2030_v34, %v2112_v41 }
0x1186   :  { %v2118_v44 = vmul.f32 1.442695, %v2116_v13 }
0x1187   :  { %v2133_v47 = vpop.permute.xlu1 %2132  ;;  %v2115_v49 = vpop.xlane.xlu0 %2114 }
0x1188   :  { %8426 = vpow2.f32 %v2118_v44  ;;  %v2117_v53 = vsub.f32 %v2107_v36, %v2115_v49  ;;  %7721 = vmatpush3.msra.mxu1 %v2133_v47 }
0x1189   :  { %7725 = vmatprep.subr.mxu1 %v8580_v8 }
0x118a   :  { %v2120_v55 = vmul.f32 1.442695, %v2117_v53 }
0x118c   :  { %8428 = vpow2.f32 %v2120_v55 }
0x1192   :  { %v8427_v56 = vpop.eup %8426 }
0x1193   :  { %v2122_v57 = vsel %vm185_vm2, %v8427_v56, 0.0 }
0x1194   :  { %2123 = vadd.xlane.f32.xlu1 %v2122_v57 }
0x1196   :  { %v8429_v58 = vpop.eup %8428 }
0x1197   :  { %v2125_v59 = vsel %vm185_vm2, %v8429_v58, 0.0 }
0x1198   :  { %2126 = vadd.xlane.f32.xlu0 %v2125_v59 }
0x11a5   :  { %2286 = vrot.lane.b32.xlu1 %v9101_v29, %s8584_s26 }
0x11a9   :  { %2284 = vrot.lane.b32.xlu1 %v9101_v29, %s8585_s27 }
0x11ad   :  { %2362 = vrot.lane.b32.xlu1 %v9098_v22, %s8585_s27 }
0x11ae   :  { %2208 = vrot.lane.b32.xlu0 %v9098_v22, %s8583_s25 }
0x11b2   :  { %2364 = vrot.lane.b32.xlu0 %v9098_v22, %s8584_s26 }
0x1221   :  { %v2124_v61 = vpop.xlane.xlu1 %2123 }
0x1222   :  { %8430 = vrcp.f32 %v2124_v61 }
0x1225   :  { %v2127_v62 = vpop.xlane.xlu0 %2126  ;;  %v2287_v17 = vpop.permute.xlu1 %2286 }
0x1226   :  { %8432 = vrcp.f32 %v2127_v62 }
0x1229   :  { %v2209_v4 = vpop.permute.xlu0 %2208  ;;  %v2285_v26 = vpop.permute.xlu1 %2284 }
0x122c   :  { %v8431_v0 = vpop.eup %8430 }
0x122d   :  { %v9138_v2 = vmul.f32 %v8431_v0, %v8427_v56  ;;  %v2365_v31 = vpop.permute.xlu0 %2364  ;;  %v2363_v33 = vpop.permute.xlu1 %2362 }
0x122f   :  { %7723 = vmatmul.mubr.msk.f32.vlgmr.msra.gmra.mrb[30].mxu1 %vm185_vm2, %v9138_v2 }
0x1230   :  { %v8433_v14 = vpop.eup %8432  ;;  %7726 = vmatpush3.msra.mxu1 %v2209_v4  ;;  %7727 = vmatprep.mubr.msk.f32.mxu1 %vm8581_vm1, %v8580_v8 }
0x1231   :  { %v9144_v21 = vmul.f32 %v8433_v14, %v8429_v58  ;;  %7730 = vmatprep.subr.mxu1 %v8580_v8 }
0x1233   :  { %7728 = vmatmul.mubr.msk.f32.vlgmr.msra.gmra.mrb[32].mxu1 %vm185_vm2, %v9144_v21 }
0x1234   :  { %7732 = vmatprep.mubr.msk.f32.mxu1 %vm8581_vm1, %v8580_v8 }
0x1237   :  { %7731 = vmatpush3.xpose.msk.msra.mxu1 %vm185_vm2, %v2287_v17 }
0x1238   :  { %7735 = vmatprep.subr.mxu1 %v8580_v8 }
0x123a   :  { %7733 = vmatmul.mubr.msk.f32.vlgmr.msra.gmra.mrb[34].mxu1 %vm185_vm2, %v2285_v26 }
0x123b   :  { %7736 = vmatpush3.xpose.msk.msra.mxu1 %vm185_vm2, %v2365_v31  ;;  %7737 = vmatprep.mubr.msk.f32.mxu1 %vm8581_vm1, %v8580_v8 }
0x123c   :  { %7745 = vmatprep.subr.mxu1 %v8580_v8 }
0x123e   :  { %7738 = vmatmul.mubr.msk.f32.vlgmr.msra.gmra.mrb[36].mxu1 %vm185_vm2, %v2363_v33 }
0x123f   :  { %7747 = vmatprep.mubr.msk.f32.mxu1 %vm8581_vm1, %v8580_v8 }
0x1302   :  { %v9161_v9 = vpop.f32.mrb[30].mxu1 }
0x1303   :  { %v7724_v34 = vpop.f32.mrb[31].mxu1 }
0x1306   :  { %v9163_v5 = vpop.f32.mrb[32].mxu1 }
0x1307   :  { %v7729_v35 = vpop.f32.mrb[33].mxu1 }
0x130d   :  { %v2358_v30 = vpop.f32.mrb[34].mxu1 }
0x130e   :  { %v2359_v36 = vadd.f32 %v8739_v16, %v2358_v30  ;;  %v7734_v38 = vpop.f32.mrb[35].mxu1 }
0x1310   :  { %v2440_v39 = vsel %vm185_vm2, %v2359_v36, -inf }
0x1311   :  { %2441 = vmax.xlane.f32.xlu0 %v2440_v39  ;;  %v2436_v41 = vpop.f32.mrb[36].mxu1 }
0x1312   :  { %v2437_v13 = vadd.f32 %v8745_v20, %v2436_v41  ;;  %v7739_v44 = vpop.f32.mrb[37].mxu1 }
0x1313   :  { %v9214_v44 = vld [vmem:[%s9993_s1] ss:$0 sm:$0xff] }
0x1314   :  { %v2443_v47 = vsel %vm185_vm2, %v2437_v13, -inf }
0x1315   :  { %2444 = vmax.xlane.f32.xlu1 %v2443_v47 }
0x1326   :  { %2462 = vrot.lane.b32.xlu1 %v9101_v29, %s8586_s28 }
0x1327   :  { %2538 = vrot.lane.b32.xlu0 %v9098_v22, %s8586_s28 }
0x132a   :  { %2616 = vrot.lane.b32.xlu1 %v9101_v29, %s8587_s29 }
0x132e   :  { %2694 = vrot.lane.b32.xlu1 %v9098_v22, %s8587_s29 }
0x1332   :  { %2692 = vrot.lane.b32.xlu1 %v9098_v22, %s8588_s30 }
0x139e   :  { %v2442_v16 = vpop.xlane.xlu0 %2441 }
0x139f   :  { %v2446_v20 = vsub.f32 %v2359_v36, %v2442_v16 }
0x13a1   :  { %v2448_v49 = vmul.f32 1.442695, %v2446_v20 }
0x13a2   :  { %v2539_v53 = vpop.permute.xlu0 %2538  ;;  %v2445_v55 = vpop.xlane.xlu1 %2444 }
0x13a3   :  { %8434 = vpow2.f32 %v2448_v49  ;;  %v2447_v56 = vsub.f32 %v2437_v13, %v2445_v55  ;;  %7746 = vmatpush3.msra.mxu1 %v2539_v53  ;;  %v9221_v55 = vld [vmem:[%s9993_s1 + $0x1] ss:$0 sm:$0xff] }
0x13a4   :  { %7755 = vmatprep.subr.mxu1 %v8580_v8 }
0x13a5   :  { %v2450_v57 = vmul.f32 1.442695, %v2447_v56 }
0x13a6   :  { %v2463_v58 = vpop.permute.xlu1 %2462 }
0x13a7   :  { %8436 = vpow2.f32 %v2450_v57  ;;  %7741 = vmatpush3.msra.mxu0 %v2463_v58 }
0x13a8   :  { %7750 = vmatprep.subr.mxu0 %v8580_v8 }
0x13aa   :  { %v2617_v17 = vpop.permute.xlu1 %2616 }
0x13ad   :  { %v8435_v59 = vpop.eup %8434 }
0x13ae   :  { %v2452_v61 = vsel %vm185_vm2, %v8435_v59, 0.0  ;;  %v2695_v34 = vpop.permute.xlu1 %2694 }
0x13af   :  { %2453 = vadd.xlane.f32.xlu0 %v2452_v61 }
0x13b1   :  { %v8437_v62 = vpop.eup %8436 }
0x13b2   :  { %v2455_v0 = vsel %vm185_vm2, %v8437_v62, 0.0  ;;  %v2693_v36 = vpop.permute.xlu1 %2692 }
0x13b3   :  { %2456 = vadd.xlane.f32.xlu0 %v2455_v0 }
0x13c9   :  { %2614 = vrot.lane.b32.xlu0 %v9101_v29, %s8588_s30 }
0x143c   :  { %v2454_v4 = vpop.xlane.xlu0 %2453 }
0x143d   :  { %8438 = vrcp.f32 %v2454_v4 }
0x1440   :  { %v2457_v14 = vpop.xlane.xlu0 %2456 }
0x1441   :  { %8440 = vrcp.f32 %v2457_v14 }
0x1444   :  { %v2615_v30 = vpop.permute.xlu0 %2614 }
0x1447   :  { %v8439_v26 = vpop.eup %8438 }
0x1448   :  { %v9185_v31 = vmul.f32 %v8439_v26, %v8435_v59 }
0x144a   :  { %7743 = vmatmul.mubr.msk.f32.vlgmr.msra.gmra.mrb[16].mxu0 %vm185_vm2, %v9185_v31 }
0x144b   :  { %v8441_v33 = vpop.eup %8440  ;;  %7751 = vmatpush3.xpose.msk.msra.mxu0 %vm185_vm2, %v2617_v17  ;;  %7752 = vmatprep.mubr.msk.f32.mxu0 %vm8581_vm1, %v8580_v8 }
0x144c   :  { %v9192_v35 = vmul.f32 %v8441_v33, %v8437_v62  ;;  %7760 = vmatprep.subr.mxu0 %v8580_v8 }
0x144e   :  { %7748 = vmatmul.mubr.msk.f32.vlgmr.msra.gmra.mrb[38].mxu1 %vm185_vm2, %v9192_v35  ;;  %7753 = vmatmul.mubr.msk.f32.vlgmr.msra.gmra.mrb[18].mxu0 %vm185_vm2, %v2615_v30 }
0x144f   :  { %7756 = vmatpush3.xpose.msk.msra.mxu1 %vm185_vm2, %v2695_v34  ;;  %7757 = vmatprep.mubr.msk.f32.mxu1 %vm8581_vm1, %v8580_v8 }
0x1450   :  { %7765 = vmatprep.subr.mxu1 %v8580_v8  ;;  %7762 = vmatprep.mubr.msk.f32.mxu0 %vm8581_vm1, %v8580_v8 }
0x1452   :  { %7758 = vmatmul.mubr.msk.f32.vlgmr.msra.gmra.mrb[40].mxu1 %vm185_vm2, %v2693_v36 }
0x1453   :  { %7767 = vmatprep.mubr.msk.f32.mxu1 %vm8581_vm1, %v8580_v8 }
0x151d   :  { %v9207_v38 = vpop.f32.mrb[16].mxu0 }
0x151e   :  { %v7744_v39 = vpop.f32.mrb[17].mxu0 }
0x1521   :  { %v9209_v41 = vpop.f32.mrb[38].mxu1  ;;  %v2688_v13 = vpop.f32.mrb[18].mxu0 }
0x1522   :  { %v2689_v47 = vadd.f32 %v9214_v44, %v2688_v13  ;;  %v7749_v16 = vpop.f32.mrb[39].mxu1  ;;  %v7754_v20 = vpop.f32.mrb[19].mxu0 }
0x1524   :  { %v2770_v49 = vsel %vm185_vm2, %v2689_v47, -inf }
0x1525   :  { %2771 = vmax.xlane.f32.xlu0 %v2770_v49  ;;  %v2766_v53 = vpop.f32.mrb[40].mxu1 }
0x1526   :  { %v2767_v56 = vadd.f32 %v9221_v55, %v2766_v53  ;;  %v7759_v57 = vpop.f32.mrb[41].mxu1 }
0x1528   :  { %v2773_v58 = vsel %vm185_vm2, %v2767_v56, -inf }
0x1529   :  { %2774 = vmax.xlane.f32.xlu1 %v2773_v58 }
0x153a   :  { %2792 = vrot.lane.b32.xlu1 %v9101_v29, %s8589_s14 }
0x153b   :  { %2868 = vrot.lane.b32.xlu0 %v9098_v22, %s8589_s14 }
0x153e   :  { %2946 = vrot.lane.b32.xlu1 %v9101_v29, %s8590_s15 }
0x1542   :  { %3024 = vrot.lane.b32.xlu1 %v9098_v22, %s8590_s15 }
0x1546   :  { %3022 = vrot.lane.b32.xlu1 %v9098_v22, %s8591_s16 }
0x15b2   :  { %v2772_v59 = vpop.xlane.xlu0 %2771 }
0x15b3   :  { %v2776_v61 = vsub.f32 %v2689_v47, %v2772_v59 }
0x15b5   :  { %v2778_v62 = vmul.f32 1.442695, %v2776_v61 }
0x15b6   :  { %v2869_v0 = vpop.permute.xlu0 %2868  ;;  %v2775_v4 = vpop.xlane.xlu1 %2774 }
0x15b7   :  { %8442 = vpow2.f32 %v2778_v62  ;;  %v2777_v14 = vsub.f32 %v2767_v56, %v2775_v4  ;;  %7766 = vmatpush3.msra.mxu1 %v2869_v0 }
0x15b8   :  { %7775 = vmatprep.subr.mxu1 %v8580_v8 }
0x15b9   :  { %v2780_v17 = vmul.f32 1.442695, %v2777_v14 }
0x15ba   :  { %v2793_v26 = vpop.permute.xlu1 %2792 }
0x15bb   :  { %8444 = vpow2.f32 %v2780_v17  ;;  %7761 = vmatpush3.msra.mxu0 %v2793_v26 }
0x15bc   :  { %7770 = vmatprep.subr.mxu0 %v8580_v8 }
0x15be   :  { %v2947_v47 = vpop.permute.xlu1 %2946 }
0x15c1   :  { %v8443_v33 = vpop.eup %8442 }
0x15c2   :  { %v2782_v34 = vsel %vm185_vm2, %v8443_v33, 0.0  ;;  %v3025_v53 = vpop.permute.xlu1 %3024 }
0x15c3   :  { %2783 = vadd.xlane.f32.xlu0 %v2782_v34 }
0x15c5   :  { %v8445_v30 = vpop.eup %8444 }
0x15c6   :  { %v2785_v36 = vsel %vm185_vm2, %v8445_v30, 0.0  ;;  %v3023_v58 = vpop.permute.xlu1 %3022 }
0x15c7   :  { %2786 = vadd.xlane.f32.xlu0 %v2785_v36 }
0x15dd   :  { %2944 = vrot.lane.b32.xlu0 %v9101_v29, %s8591_s16 }
0x1650   :  { %v2784_v39 = vpop.xlane.xlu0 %2783 }
0x1651   :  { %8446 = vrcp.f32 %v2784_v39 }
0x1654   :  { %v2787_v13 = vpop.xlane.xlu0 %2786 }
0x1655   :  { %8448 = vrcp.f32 %v2787_v13 }
0x1658   :  { %v2945_v57 = vpop.permute.xlu0 %2944 }
0x165b   :  { %v8447_v16 = vpop.eup %8446 }
0x165c   :  { %v9241_v20 = vmul.f32 %v8447_v16, %v8443_v33 }
0x165e   :  { %7763 = vmatmul.mubr.msk.f32.vlgmr.msra.gmra.mrb[20].mxu0 %vm185_vm2, %v9241_v20 }
0x165f   :  { %v8449_v49 = vpop.eup %8448  ;;  %7771 = vmatpush3.xpose.msk.msra.mxu0 %vm185_vm2, %v2947_v47  ;;  %7772 = vmatprep.mubr.msk.f32.mxu0 %vm8581_vm1, %v8580_v8 }
0x1660   :  { %v9248_v56 = vmul.f32 %v8449_v49, %v8445_v30  ;;  %7780 = vmatprep.subr.mxu0 %v8580_v8 }
0x1662   :  { %7768 = vmatmul.mubr.msk.f32.vlgmr.msra.gmra.mrb[42].mxu1 %vm185_vm2, %v9248_v56  ;;  %7773 = vmatmul.mubr.msk.f32.vlgmr.msra.gmra.mrb[22].mxu0 %vm185_vm2, %v2945_v57 }
0x1663   :  { %7776 = vmatpush3.xpose.msk.msra.mxu1 %vm185_vm2, %v3025_v53  ;;  %7777 = vmatprep.mubr.msk.f32.mxu1 %vm8581_vm1, %v8580_v8 }
0x1664   :  { %7785 = vmatprep.subr.mxu1 %v8580_v8  ;;  %7782 = vmatprep.mubr.msk.f32.mxu0 %vm8581_vm1, %v8580_v8 }
0x1666   :  { %7778 = vmatmul.mubr.msk.f32.vlgmr.msra.gmra.mrb[44].mxu1 %vm185_vm2, %v3023_v58 }
0x1667   :  { %7787 = vmatprep.mubr.msk.f32.mxu1 %vm8581_vm1, %v8580_v8 }
0x1731   :  { %v2864_v59 = vpop.f32.mrb[20].mxu0 }
0x1732   :  { %v7764_v61 = vpop.f32.mrb[21].mxu0 }
0x1735   :  { %v2940_v62 = vpop.f32.mrb[42].mxu1  ;;  %v3018_v0 = vpop.f32.mrb[22].mxu0 }
0x1736   :  { %v3019_v4 = vadd.f32 %v9214_v44, %v3018_v0  ;;  %v7769_v14 = vpop.f32.mrb[43].mxu1  ;;  %v7774_v17 = vpop.f32.mrb[23].mxu0 }
0x1738   :  { %v3100_v26 = vsel %vm185_vm2, %v3019_v4, -inf }
0x1739   :  { %3101 = vmax.xlane.f32.xlu0 %v3100_v26  ;;  %v3096_v33 = vpop.f32.mrb[44].mxu1 }
0x173a   :  { %v3097_v34 = vadd.f32 %v9221_v55, %v3096_v33  ;;  %v7779_v30 = vpop.f32.mrb[45].mxu1 }
0x173c   :  { %v3103_v36 = vsel %vm185_vm2, %v3097_v34, -inf }
0x173d   :  { %3104 = vmax.xlane.f32.xlu1 %v3103_v36 }
0x174e   :  { %3122 = vrot.lane.b32.xlu1 %v9101_v29, %s8592_s17 }
0x1752   :  { %3300 = vrot.lane.b32.xlu1 %v9207_v38, %s10022_s22 }
0x1756   :  { %3302 = vrot.lane.b32.xlu1 %v9209_v41, %s10022_s22 }
0x175a   :  { %3310 = vrot.lane.b32.xlu1 %v2940_v62, %s10023_s23 }
0x17c6   :  { %v3102_v39 = vpop.xlane.xlu0 %3101 }
0x17c7   :  { %v3106_v13 = vsub.f32 %v3019_v4, %v3102_v39 }
0x17c9   :  { %v3108_v47 = vmul.f32 1.442695, %v3106_v13 }
0x17ca   :  { %v3105_v16 = vpop.xlane.xlu1 %3104 }
0x17cb   :  { %8450 = vpow2.f32 %v3108_v47  ;;  %v3107_v49 = vsub.f32 %v3097_v34, %v3105_v16 }
0x17cd   :  { %v3110_v53 = vmul.f32 1.442695, %v3107_v49 }
0x17ce   :  { %v3123_v57 = vpop.permute.xlu1 %3122 }
0x17cf   :  { %8452 = vpow2.f32 %v3110_v53  ;;  %7781 = vmatpush3.msra.mxu0 %v3123_v57 }
0x17d0   :  { %8208 = vmatprep.subr.bf16.mxu0 %v8910_v46 }
0x17d2   :  { %v3301_v30 = vpop.permute.xlu1 %3300 }
0x17d3   :  { %v3322_v13 = vsel %vm185_vm2, %v9161_v9, %v3301_v30 }
0x17d5   :  { %v8451_v29 = vpop.eup %8450 }
0x17d6   :  { %v3112_v38 = vsel %vm185_vm2, %v8451_v29, 0.0  ;;  %v3303_v36 = vpop.permute.xlu1 %3302 }
0x17d7   :  { %3113 = vadd.xlane.f32.xlu0 %v3112_v38  ;;  %v3323_v57 = vsel %vm185_vm2, %v9163_v5, %v3303_v36 }
0x17d9   :  { %v8453_v58 = vpop.eup %8452 }
0x17da   :  { %v3115_v41 = vsel %vm185_vm2, %v8453_v58, 0.0  ;;  %v3311_v47 = vpop.permute.xlu1 %3310 }
0x17db   :  { %3116 = vadd.xlane.f32.xlu0 %v3115_v41 }
0x17f1   :  { %3198 = vrot.lane.b32.xlu0 %v9098_v22, %s8592_s17 }
0x17f5   :  { %3308 = vrot.lane.b32.xlu0 %v2864_v59, %s10023_s23 }
0x1864   :  { %v3114_v61 = vpop.xlane.xlu0 %3113 }
0x1865   :  { %8454 = vrcp.f32 %v3114_v61 }
0x1868   :  { %v3117_v62 = vpop.xlane.xlu0 %3116 }
0x1869   :  { %8456 = vrcp.f32 %v3117_v62 }
0x186c   :  { %v3199_v0 = vpop.permute.xlu0 %3198 }
0x186d   :  { %7786 = vmatpush3.msra.mxu1 %v3199_v0 }
0x186e   :  { %8216 = vmatprep.subr.bf16.mxu1 %v8955_v28 }
0x186f   :  { %v8455_v4 = vpop.eup %8454 }
0x1870   :  { %v9281_v14 = vmul.f32 %v8455_v4, %v8451_v29  ;;  %v3309_v39 = vpop.permute.xlu0 %3308  ;;  %v3325_v29 = vsel %vm1521_vm4, %v3323_v57, %v3311_v47 }
0x1871   :  { %v3324_v16 = vsel %vm1521_vm4, %v3322_v13, %v3309_v39 }
0x1872   :  { %7783 = vmatmul.mubr.msk.f32.vlgmr.msra.gmra.mrb[24].mxu0 %vm185_vm2, %v9281_v14 }
0x1873   :  { %v8457_v17 = vpop.eup %8456  ;;  %8210 = vmatpush3.bf16.msra.mxu0 %v8910_v46 }
0x1874   :  { %v9286_v22 = vmul.f32 %v8457_v17, %v8453_v58  ;;  %8212 = vmatprep.subr.bf16.mxu0 %v8920_v51 }
0x1876   :  { %7788 = vmatmul.mubr.msk.f32.vlgmr.msra.gmra.mrb[46].mxu1 %vm185_vm2, %v9286_v22 }
0x1877   :  { %8214 = vmatpush3.bf16.msra.mxu0 %v8920_v51  ;;  %8218 = vmatpush3.bf16.msra.mxu1 %v8955_v28 }
0x1878   :  { %8220 = vmatprep.subr.bf16.mxu1 %v8965_v37  ;;  %8224 = vmatprep.subr.bf16.mxu0 %v8996_v1 }
0x187b   :  { %8222 = vmatpush3.bf16.msra.mxu1 %v8965_v37 }
0x187c   :  { %8256 = vmatprep.subr.bf16.mxu1 %v8678_v3 }
0x1945   :  { %v3194_v59 = vpop.f32.mrb[24].mxu0 }
0x1946   :  { %3316 = vrot.lane.b32.xlu0 %v3194_v59, %s10024_s24  ;;  %v7784_v26 = vpop.f32.mrb[25].mxu0 }
0x1949   :  { %v3270_v33 = vpop.f32.mrb[46].mxu1 }
0x194a   :  { %3318 = vrot.lane.b32.xlu1 %v3270_v33, %s10024_s24  ;;  %v7789_v34 = vpop.f32.mrb[47].mxu1 }
0x19b8   :  { %v3317_v49 = vpop.permute.xlu0 %3316 }
0x19b9   :  { %v3326_v53 = vsel %vm1524_vm3, %v3324_v16, %v3317_v49 }
0x19ba   :  { %7798 = vmatprep.mubr.msk.f32.mxu0 %vm100_vm0, %v3326_v53 }
0x19bc   :  { %v3319_v38 = vpop.permute.xlu1 %3318 }
0x19bd   :  { %v3327_v58 = vsel %vm1524_vm3, %v3325_v29, %v3319_v38 }
0x19be   :  { %7799 = vmatmul.mubr.msk.f32.vlgmr.msra.gmra.mrb[26].mxu0 %vm100_vm0, %v3327_v58 }
0x19bf   :  { %8226 = vmatpush3.bf16.msra.mxu0 %v8996_v1 }
0x19c0   :  { %8228 = vmatprep.subr.bf16.mxu0 %v9006_v10 }
0x19c3   :  { %8230 = vmatpush3.bf16.msra.mxu0 %v9006_v10 }
0x19c4   :  { %8232 = vmatprep.subr.bf16.mxu0 %v9016_v15 }
0x19c7   :  { %8234 = vmatpush3.bf16.msra.mxu0 %v9016_v15 }
0x19c8   :  { %8236 = vmatprep.subr.bf16.mxu0 %v9026_v50 }
0x19cb   :  { %8238 = vmatpush3.bf16.msra.mxu0 %v9026_v50 }
0x19cc   :  { %8240 = vmatprep.subr.bf16.mxu0 %v9039_v24 }
0x19cf   :  { %8242 = vmatpush3.bf16.msra.mxu0 %v9039_v24 }
0x19d0   :  { %8244 = vmatprep.subr.bf16.mxu0 %v9044_v27 }
0x19d3   :  { %8246 = vmatpush3.bf16.msra.mxu0 %v9044_v27 }
0x19d4   :  { %8248 = vmatprep.subr.bf16.mxu0 %v9055_v32 }
0x19d7   :  { %8250 = vmatpush3.bf16.msra.mxu0 %v9055_v32 }
0x19d8   :  { %8252 = vmatprep.subr.bf16.mxu0 %v9065_v12 }
0x19db   :  { %8254 = vmatpush3.bf16.msra.mxu0 %v9065_v12 }
0x19dc   :  { %7888 = vmatprep.subr.mxu0 %v8580_v8 }
0x1a91   :  { %v7800_v9 = vpop.f32.mrb[26].mxu0 }
0x1a92   :  { %v3406_v5 = vadd.f32 %v7800_v9, %v8939_v48  ;;  %v3400_v41 = vpop.f32.mrb[27].mxu0 }
0x1a93   :  { %v3401_v61 = vadd.f32 %v8939_v48, %v3400_v41 }
0x1a94   :  { %v3410_v62 = vadd.f32 %v3406_v5, %v9089_v19 }
0x1a95   :  { %v3409_v0 = vadd.f32 %v3401_v61, %v9086_v18 }
0x1a96   :  { %v3414_v4 = vsel %vm100_vm0, %v3410_v62, 0.0 }
0x1a97   :  { %3415 = vadd.xlane.f32.xlu1 %v3414_v4  ;;  %v3411_v17 = vsel %vm100_vm0, %v3409_v0, 0.0 }
0x1a98   :  { %3412 = vadd.xlane.f32.xlu0 %v3411_v17 }
0x1b24   :  { %v3416_v59 = vpop.xlane.xlu1 %3415 }
0x1b25   :  { %v3418_v26 = vmul.f32 0.03125, %v3416_v59  ;;  %v3413_v33 = vpop.xlane.xlu0 %3412 }
0x1b26   :  { %v3417_v34 = vmul.f32 0.03125, %v3413_v33 }
0x1b27   :  { %v3420_v30 = vsub.f32 %v3410_v62, %v3418_v26 }
0x1b28   :  { %v3419_v36 = vsub.f32 %v3409_v0, %v3417_v34 }
0x1b29   :  { %v3422_v48 = vmul.f32 %v3420_v30, %v3420_v30 }
0x1b2a   :  { %v3421_v39 = vmul.f32 %v3419_v36, %v3419_v36 }
0x1b2b   :  { %v3426_v19 = vsel %vm100_vm0, %v3422_v48, 0.0 }
0x1b2c   :  { %v3423_v13 = vsel %vm100_vm0, %v3421_v39, 0.0 }
0x1b2d   :  { %3424 = vadd.xlane.f32.xlu0 %v3423_v13 }
0x1b31   :  { %3427 = vadd.xlane.f32.xlu0 %v3426_v19 }
0x1bba   :  { %v3425_v18 = vpop.xlane.xlu0 %3424 }
0x1bbb   :  { %v3429_v47 = vmul.f32 0.03125, %v3425_v18 }
0x1bbd   :  { %v3431_v16 = vadd.f32 1e-05, %v3429_v47 }
0x1bbe   :  { %v3428_v49 = vpop.xlane.xlu0 %3427 }
0x1bbf   :  { %8458 = vrsqrt.f32 %v3431_v16  ;;  %v3430_v53 = vmul.f32 0.03125, %v3428_v49 }
0x1bc1   :  { %v3432_v57 = vadd.f32 1e-05, %v3430_v53 }
0x1bc3   :  { %8460 = vrsqrt.f32 %v3432_v57 }
0x1bc9   :  { %v8459_v29 = vpop.eup %8458 }
0x1bca   :  { %v3435_v38 = vmul.f32 %v8459_v29, %v3419_v36 }
0x1bcc   :  { %v3437_v58 = vmul.f32 %v8973_v52, %v3435_v38 }
0x1bcd   :  { %v8461_v9 = vpop.eup %8460 }
0x1bce   :  { %v3436_v5 = vmul.f32 %v8461_v9, %v3420_v30  ;;  %v3439_v41 = vadd.f32 %v8978_v54, %v3437_v58 }
0x1bd0   :  { %7809 = vmatprep.mubr.msk.f32.mxu1 %vm100_vm0, %v3439_v41  ;;  %v3438_v61 = vmul.f32 %v8973_v52, %v3436_v5  ;;  %v9362_v41 = vld [vmem:[%s9995_s3] ss:$0 sm:$0xff] }
0x1bd2   :  { %v3440_v62 = vadd.f32 %v8978_v54, %v3438_v61 }
0x1bd4   :  { %7810 = vmatmul.mubr.msk.f32.vlgmr.msra.gmra.mrb[48].mxu1 %vm100_vm0, %v3440_v62 }
0x1bd5   :  { %8258 = vmatpush3.bf16.msra.mxu1 %v8678_v3 }
0x1bd6   :  { %8260 = vmatprep.subr.bf16.mxu1 %v8688_v6 }
0x1bd9   :  { %8262 = vmatpush3.bf16.msra.mxu1 %v8688_v6 }
0x1bda   :  { %7858 = vmatprep.subr.mxu1 %v8580_v8 }
0x1ca7   :  { %v7811_v0 = vpop.f32.mrb[48].mxu1 }
0x1ca8   :  { %v3519_v4 = vadd.f32 %v7811_v0, %v9074_v7  ;;  %v3513_v17 = vpop.f32.mrb[49].mxu1 }
0x1ca9   :  { %v3514_v59 = vadd.f32 %v9074_v7, %v3513_v17 }
0x1caa   :  { %v3523_v26 = vmul.f32 %v3519_v4, %v3519_v4 }
0x1cab   :  { %v3522_v52 = vmul.f32 %v3514_v59, %v3514_v59 }
0x1cac   :  { %v3525_v33 = vmul.f32 %v3523_v26, %v3519_v4 }
0x1cad   :  { %v3524_v54 = vmul.f32 %v3522_v52, %v3514_v59 }
0x1cae   :  { %v3527_v34 = vmul.f32 0.044715, %v3525_v33 }
0x1caf   :  { %v3526_v30 = vmul.f32 0.044715, %v3524_v54 }
0x1cb0   :  { %v3529_v36 = vadd.f32 %v3527_v34, %v3519_v4 }
0x1cb1   :  { %v3528_v39 = vadd.f32 %v3526_v30, %v3514_v59 }
0x1cb2   :  { %v3531_v13 = vmul.f32 0.7978846, %v3529_v36 }
0x1cb3   :  { %v3530_v48 = vmul.f32 0.7978846, %v3528_v39 }
0x1cb4   :  { %8462 = vtanh.f32 %v3531_v13 }
0x1cb5   :  { %8464 = vtanh.f32 %v3530_v48 }
0x1cbe   :  { %v8463_v19 = vpop.eup %8462 }
0x1cbf   :  { %v8465_v18 = vpop.eup %8464  ;;  %v3535_v47 = vadd.f32 1.0, %v8463_v19 }
0x1cc0   :  { %v3534_v16 = vadd.f32 1.0, %v8465_v18 }
0x1cc1   :  { %v3537_v49 = vmul.f32 0.5, %v3535_v47 }
0x1cc2   :  { %v3536_v53 = vmul.f32 0.5, %v3534_v16 }
0x1cc3   :  { %v3539_v7 = vmul.f32 %v3537_v49, %v3519_v4 }
0x1cc4   :  { %v3538_v57 = vmul.f32 %v3536_v53, %v3514_v59 }
0x1cc6   :  { %7844 = vmatprep.mubr.f32.mxu0 %v3538_v57 }
0x1cc7   :  { %7845 = vmatmul.mubr.f32.vlgmr.msra.gmra.mrb[28].mxu0 %v3539_v7 }
0x1cc8   :  { %7890 = vmatprep.mubr.msk.f32.mxu0 %vm8581_vm1, %v8580_v8 }
0x1d9a   :  { %v7846_v29 = vpop.f32.mrb[28].mxu0 }
0x1d9b   :  { %v3606_v38 = vpop.f32.mrb[29].mxu0  ;;  %v9351_v9 = vadd.f32 %v7846_v29, %v9083_v11 }
0x1d9c   :  { %v9348_v58 = vadd.f32 %v9083_v11, %v3606_v38 }
0x1d9e   :  { %7855 = vmatprep.mubr.msk.f32.mxu1 %vm100_vm0, %v9348_v58 }
0x1d9f   :  { %7856 = vmatmul.mubr.msk.f32.vlgmr.msra.gmra.mrb[50].mxu1 %vm100_vm0, %v9351_v9 }
0x1da0   :  { %7860 = vmatprep.mubr.msk.f32.mxu1 %vm8581_vm1, %v8580_v8 }
0x1e72   :  { %v7857_v5 = vpop.f32.mrb[50].mxu1 }
0x1e73   :  { %v9365_v61 = vadd.f32 %v9362_v41, %v7857_v5  ;;  %v3687_v11 = vpop.f32.mrb[51].mxu1 }
0x1e74   :  { %v9368_v62 = vadd.f32 %v9362_v41, %v3687_v11 }
0x1e75   :  { %3774 = vrot.lane.b32.xlu0 %v9365_v61, %s8582_s0 }
0x1e76   :  { %3697 = vrot.lane.b32.xlu1 %v9368_v62, %s8582_s0 }
0x1ee7   :  { %v3775_v4 = vpop.permute.xlu0 %3774 }
0x1ee8   :  { %v3698_v0 = vpop.permute.xlu1 %3697 }
0x1ee9   :  { %7859 = vmatpush3.xpose.msk.msra.mxu1 %vm185_vm2, %v3698_v0 }
0x1eea   :  { %7863 = vmatprep.subr.mxu1 %v8580_v8 }
0x1eec   :  { %7861 = vmatmul.mubr.msk.f32.vlgmr.msra.gmra.mrb[52].mxu1 %vm185_vm2, %v9368_v62 }
0x1eed   :  { %7864 = vmatpush3.xpose.msk.msra.mxu1 %vm185_vm2, %v3775_v4  ;;  %7865 = vmatprep.mubr.msk.f32.mxu1 %vm8581_vm1, %v8580_v8 }
0x1eee   :  { %7868 = vmatprep.subr.mxu1 %v8580_v8 }
0x1ef0   :  { %7866 = vmatmul.mubr.msk.f32.vlgmr.msra.gmra.mrb[54].mxu1 %vm185_vm2, %v9365_v61 }
0x1ef1   :  { %7870 = vmatprep.mubr.msk.f32.mxu1 %vm8581_vm1, %v8580_v8 }
0x1fbf   :  { %v3769_v17 = vpop.f32.mrb[52].mxu1 }
0x1fc0   :  { %v3770_v59 = vadd.f32 %v9214_v44, %v3769_v17  ;;  %v7862_v26 = vpop.f32.mrb[53].mxu1 }
0x1fc2   :  { %v3850_v52 = vsel %vm185_vm2, %v3770_v59, -inf }
0x1fc3   :  { %3851 = vmax.xlane.f32.xlu1 %v3850_v52  ;;  %v3846_v33 = vpop.f32.mrb[54].mxu1 }
0x1fc4   :  { %v3847_v54 = vadd.f32 %v9221_v55, %v3846_v33  ;;  %v7867_v34 = vpop.f32.mrb[55].mxu1 }
0x1fc6   :  { %v3853_v30 = vsel %vm185_vm2, %v3847_v54, -inf }
0x1fc7   :  { %3854 = vmax.xlane.f32.xlu0 %v3853_v30 }
0x1fd4   :  { %3872 = vrot.lane.b32.xlu1 %v9368_v62, %s8583_s25 }
0x2050   :  { %v3852_v36 = vpop.xlane.xlu1 %3851 }
0x2051   :  { %v3856_v39 = vsub.f32 %v3770_v59, %v3852_v36 }
0x2053   :  { %v3858_v13 = vmul.f32 1.442695, %v3856_v39 }
0x2054   :  { %v3873_v48 = vpop.permute.xlu1 %3872  ;;  %v3855_v19 = vpop.xlane.xlu0 %3854 }
0x2055   :  { %8466 = vpow2.f32 %v3858_v13  ;;  %v3857_v18 = vsub.f32 %v3847_v54, %v3855_v19  ;;  %7869 = vmatpush3.msra.mxu1 %v3873_v48 }
0x2056   :  { %7873 = vmatprep.subr.mxu1 %v8580_v8 }
0x2057   :  { %v3860_v47 = vmul.f32 1.442695, %v3857_v18 }
0x2059   :  { %8468 = vpow2.f32 %v3860_v47 }
0x205f   :  { %v8467_v16 = vpop.eup %8466 }
0x2060   :  { %v3862_v49 = vsel %vm185_vm2, %v8467_v16, 0.0 }
0x2061   :  { %3863 = vadd.xlane.f32.xlu1 %v3862_v49 }
0x2063   :  { %v8469_v53 = vpop.eup %8468 }
0x2064   :  { %v3865_v57 = vsel %vm185_vm2, %v8469_v53, 0.0 }
0x2065   :  { %3866 = vadd.xlane.f32.xlu0 %v3865_v57 }
0x2072   :  { %4026 = vrot.lane.b32.xlu1 %v9368_v62, %s8584_s26 }
0x2076   :  { %4024 = vrot.lane.b32.xlu1 %v9368_v62, %s8585_s27 }
0x207a   :  { %4102 = vrot.lane.b32.xlu1 %v9365_v61, %s8585_s27 }
0x207b   :  { %3948 = vrot.lane.b32.xlu0 %v9365_v61, %s8583_s25 }
0x207f   :  { %4104 = vrot.lane.b32.xlu0 %v9365_v61, %s8584_s26 }
0x20ee   :  { %v3864_v7 = vpop.xlane.xlu1 %3863 }
0x20ef   :  { %8470 = vrcp.f32 %v3864_v7 }
0x20f2   :  { %v3867_v29 = vpop.xlane.xlu0 %3866  ;;  %v4027_v4 = vpop.permute.xlu1 %4026 }
0x20f3   :  { %8472 = vrcp.f32 %v3867_v29 }
0x20f6   :  { %v3949_v11 = vpop.permute.xlu0 %3948  ;;  %v4025_v59 = vpop.permute.xlu1 %4024 }
0x20f9   :  { %v8471_v38 = vpop.eup %8470 }
0x20fa   :  { %v9405_v5 = vmul.f32 %v8471_v38, %v8467_v16  ;;  %v4105_v26 = vpop.permute.xlu0 %4104  ;;  %v4103_v52 = vpop.permute.xlu1 %4102 }
0x20fc   :  { %10025 = vst [vmem:[#allocation7_spill] sm:$0xff] %v9405_v5  ;;  %7871 = vmatmul.mubr.msk.f32.vlgmr.msra.gmra.mrb[56].mxu1 %vm185_vm2, %v9405_v5 }
0x20fd   :  { %v8473_v0 = vpop.eup %8472  ;;  %7874 = vmatpush3.msra.mxu1 %v3949_v11  ;;  %7875 = vmatprep.mubr.msk.f32.mxu1 %vm8581_vm1, %v8580_v8 }
0x20fe   :  { %v9411_v17 = vmul.f32 %v8473_v0, %v8469_v53  ;;  %7878 = vmatprep.subr.mxu1 %v8580_v8 }
0x2100   :  { %7876 = vmatmul.mubr.msk.f32.vlgmr.msra.gmra.mrb[58].mxu1 %vm185_vm2, %v9411_v17 }
0x2101   :  { %7880 = vmatprep.mubr.msk.f32.mxu1 %vm8581_vm1, %v8580_v8 }
0x2104   :  { %7879 = vmatpush3.xpose.msk.msra.mxu1 %vm185_vm2, %v4027_v4 }
0x2105   :  { %7883 = vmatprep.subr.mxu1 %v8580_v8 }
0x2107   :  { %7881 = vmatmul.mubr.msk.f32.vlgmr.msra.gmra.mrb[60].mxu1 %vm185_vm2, %v4025_v59 }
0x2108   :  { %7884 = vmatpush3.xpose.msk.msra.mxu1 %vm185_vm2, %v4105_v26  ;;  %7885 = vmatprep.mubr.msk.f32.mxu1 %vm8581_vm1, %v8580_v8 }
0x2109   :  { %7893 = vmatprep.subr.mxu1 %v8580_v8 }
0x210b   :  { %7886 = vmatmul.mubr.msk.f32.vlgmr.msra.gmra.mrb[62].mxu1 %vm185_vm2, %v4103_v52 }
0x210c   :  { %7895 = vmatprep.mubr.msk.f32.mxu1 %vm8581_vm1, %v8580_v8 }
0x21cf   :  { %v9428_v33 = vpop.f32.mrb[56].mxu1 }
0x21d0   :  { %v7872_v54 = vpop.f32.mrb[57].mxu1 }
0x21d3   :  { %v9430_v34 = vpop.f32.mrb[58].mxu1 }
0x21d4   :  { %v7877_v30 = vpop.f32.mrb[59].mxu1 }
0x21da   :  { %v4098_v36 = vpop.f32.mrb[60].mxu1 }
0x21db   :  { %v4099_v39 = vadd.f32 %v9214_v44, %v4098_v36  ;;  %v7882_v13 = vpop.f32.mrb[61].mxu1 }
0x21dd   :  { %v4180_v48 = vsel %vm185_vm2, %v4099_v39, -inf }
0x21de   :  { %4181 = vmax.xlane.f32.xlu0 %v4180_v48  ;;  %v4176_v19 = vpop.f32.mrb[62].mxu1 }
0x21df   :  { %v4177_v18 = vadd.f32 %v9221_v55, %v4176_v19  ;;  %v7887_v47 = vpop.f32.mrb[63].mxu1 }
0x21e1   :  { %v4183_v16 = vsel %vm185_vm2, %v4177_v18, -inf }
0x21e2   :  { %4184 = vmax.xlane.f32.xlu1 %v4183_v16 }
0x21f3   :  { %4202 = vrot.lane.b32.xlu1 %v9368_v62, %s8586_s28 }
0x21f4   :  { %4278 = vrot.lane.b32.xlu0 %v9365_v61, %s8586_s28 }
0x21f7   :  { %4356 = vrot.lane.b32.xlu1 %v9368_v62, %s8587_s29 }
0x21fb   :  { %4434 = vrot.lane.b32.xlu1 %v9365_v61, %s8587_s29 }
0x21ff   :  { %4432 = vrot.lane.b32.xlu1 %v9365_v61, %s8588_s30 }
0x226b   :  { %v4182_v49 = vpop.xlane.xlu0 %4181 }
0x226c   :  { %v4186_v53 = vsub.f32 %v4099_v39, %v4182_v49 }
0x226e   :  { %v4188_v57 = vmul.f32 1.442695, %v4186_v53 }
0x226f   :  { %v4279_v7 = vpop.permute.xlu0 %4278  ;;  %v4185_v29 = vpop.xlane.xlu1 %4184 }
0x2270   :  { %8474 = vpow2.f32 %v4188_v57  ;;  %v4187_v38 = vsub.f32 %v4177_v18, %v4185_v29  ;;  %7894 = vmatpush3.msra.mxu1 %v4279_v7 }
0x2271   :  { %7903 = vmatprep.subr.mxu1 %v8580_v8 }
0x2272   :  { %v4190_v11 = vmul.f32 1.442695, %v4187_v38 }
0x2273   :  { %v4203_v0 = vpop.permute.xlu1 %4202 }
0x2274   :  { %8476 = vpow2.f32 %v4190_v11  ;;  %7889 = vmatpush3.msra.mxu0 %v4203_v0 }
0x2275   :  { %7898 = vmatprep.subr.mxu0 %v8580_v8 }
0x2277   :  { %v4357_v36 = vpop.permute.xlu1 %4356 }
0x227a   :  { %v8475_v4 = vpop.eup %8474 }
0x227b   :  { %v4192_v59 = vsel %vm185_vm2, %v8475_v4, 0.0  ;;  %v4435_v19 = vpop.permute.xlu1 %4434 }
0x227c   :  { %4193 = vadd.xlane.f32.xlu0 %v4192_v59 }
0x227e   :  { %v8477_v26 = vpop.eup %8476 }
0x227f   :  { %v4195_v52 = vsel %vm185_vm2, %v8477_v26, 0.0  ;;  %v4433_v16 = vpop.permute.xlu1 %4432 }
0x2280   :  { %4196 = vadd.xlane.f32.xlu0 %v4195_v52 }
0x2296   :  { %4354 = vrot.lane.b32.xlu0 %v9368_v62, %s8588_s30 }
0x2309   :  { %v4194_v54 = vpop.xlane.xlu0 %4193 }
0x230a   :  { %8478 = vrcp.f32 %v4194_v54 }
0x230d   :  { %v4197_v30 = vpop.xlane.xlu0 %4196 }
0x230e   :  { %8480 = vrcp.f32 %v4197_v30 }
0x2311   :  { %v4355_v47 = vpop.permute.xlu0 %4354 }
0x2314   :  { %v8479_v39 = vpop.eup %8478 }
0x2315   :  { %v9452_v13 = vmul.f32 %v8479_v39, %v8475_v4 }
0x2317   :  { %7891 = vmatmul.mubr.msk.f32.vlgmr.msra.gmra.mrb[30].mxu0 %vm185_vm2, %v9452_v13 }
0x2318   :  { %v8481_v48 = vpop.eup %8480  ;;  %7899 = vmatpush3.xpose.msk.msra.mxu0 %vm185_vm2, %v4357_v36  ;;  %7900 = vmatprep.mubr.msk.f32.mxu0 %vm8581_vm1, %v8580_v8 }
0x2319   :  { %v9459_v18 = vmul.f32 %v8481_v48, %v8477_v26  ;;  %7908 = vmatprep.subr.mxu0 %v8580_v8 }
0x231b   :  { %7896 = vmatmul.mubr.msk.f32.vlgmr.msra.gmra.mrb[64].mxu1 %vm185_vm2, %v9459_v18  ;;  %7901 = vmatmul.mubr.msk.f32.vlgmr.msra.gmra.mrb[32].mxu0 %vm185_vm2, %v4355_v47 }
0x231c   :  { %7904 = vmatpush3.xpose.msk.msra.mxu1 %vm185_vm2, %v4435_v19  ;;  %7905 = vmatprep.mubr.msk.f32.mxu1 %vm8581_vm1, %v8580_v8 }
0x231d   :  { %7913 = vmatprep.subr.mxu1 %v8580_v8  ;;  %7910 = vmatprep.mubr.msk.f32.mxu0 %vm8581_vm1, %v8580_v8 }
0x231f   :  { %7906 = vmatmul.mubr.msk.f32.vlgmr.msra.gmra.mrb[66].mxu1 %vm185_vm2, %v4433_v16 }
0x2320   :  { %7915 = vmatprep.mubr.msk.f32.mxu1 %vm8581_vm1, %v8580_v8 }
0x23ea   :  { %v9474_v49 = vpop.f32.mrb[30].mxu0 }
0x23eb   :  { %v7892_v53 = vpop.f32.mrb[31].mxu0 }
0x23ee   :  { %v9476_v57 = vpop.f32.mrb[64].mxu1  ;;  %v4428_v7 = vpop.f32.mrb[32].mxu0 }
0x23ef   :  { %v4429_v29 = vadd.f32 %v9214_v44, %v4428_v7  ;;  %v7897_v38 = vpop.f32.mrb[65].mxu1  ;;  %v7902_v11 = vpop.f32.mrb[33].mxu0 }
0x23f1   :  { %v4510_v0 = vsel %vm185_vm2, %v4429_v29, -inf }
0x23f2   :  { %4511 = vmax.xlane.f32.xlu0 %v4510_v0  ;;  %v4506_v4 = vpop.f32.mrb[66].mxu1 }
0x23f3   :  { %v4507_v59 = vadd.f32 %v9221_v55, %v4506_v4  ;;  %v7907_v26 = vpop.f32.mrb[67].mxu1 }
0x23f5   :  { %v4513_v52 = vsel %vm185_vm2, %v4507_v59, -inf }
0x23f6   :  { %4514 = vmax.xlane.f32.xlu1 %v4513_v52 }
0x2407   :  { %4532 = vrot.lane.b32.xlu1 %v9368_v62, %s8589_s14 }
0x2408   :  { %4608 = vrot.lane.b32.xlu0 %v9365_v61, %s8589_s14 }
0x240b   :  { %4686 = vrot.lane.b32.xlu1 %v9368_v62, %s8590_s15 }
0x240f   :  { %4764 = vrot.lane.b32.xlu1 %v9365_v61, %s8590_s15 }
0x2413   :  { %4762 = vrot.lane.b32.xlu1 %v9365_v61, %s8591_s16 }
0x247f   :  { %v4512_v54 = vpop.xlane.xlu0 %4511 }
0x2480   :  { %v4516_v30 = vsub.f32 %v4429_v29, %v4512_v54 }
0x2482   :  { %v4518_v36 = vmul.f32 1.442695, %v4516_v30 }
0x2483   :  { %v4609_v39 = vpop.permute.xlu0 %4608  ;;  %v4515_v48 = vpop.xlane.xlu1 %4514 }
0x2484   :  { %8482 = vpow2.f32 %v4518_v36  ;;  %v4517_v19 = vsub.f32 %v4507_v59, %v4515_v48  ;;  %7914 = vmatpush3.msra.mxu1 %v4609_v39 }
0x2485   :  { %7923 = vmatprep.subr.mxu1 %v8580_v8 }
0x2486   :  { %v4520_v47 = vmul.f32 1.442695, %v4517_v19 }
0x2487   :  { %v4533_v16 = vpop.permute.xlu1 %4532 }
0x2488   :  { %8484 = vpow2.f32 %v4520_v47  ;;  %7909 = vmatpush3.msra.mxu0 %v4533_v16 }
0x2489   :  { %7918 = vmatprep.subr.mxu0 %v8580_v8 }
0x248b   :  { %v4687_v4 = vpop.permute.xlu1 %4686 }
0x248e   :  { %v8483_v53 = vpop.eup %8482 }
0x248f   :  { %v4522_v7 = vsel %vm185_vm2, %v8483_v53, 0.0  ;;  %v4765_v54 = vpop.permute.xlu1 %4764 }
0x2490   :  { %4523 = vadd.xlane.f32.xlu0 %v4522_v7 }
0x2492   :  { %v8485_v38 = vpop.eup %8484 }
0x2493   :  { %v4525_v29 = vsel %vm185_vm2, %v8485_v38, 0.0  ;;  %v4763_v39 = vpop.permute.xlu1 %4762 }
0x2494   :  { %4526 = vadd.xlane.f32.xlu0 %v4525_v29 }
0x24aa   :  { %4684 = vrot.lane.b32.xlu0 %v9368_v62, %s8591_s16 }
0x251d   :  { %v4524_v11 = vpop.xlane.xlu0 %4523 }
0x251e   :  { %8486 = vrcp.f32 %v4524_v11 }
0x2521   :  { %v4527_v0 = vpop.xlane.xlu0 %4526 }
0x2522   :  { %8488 = vrcp.f32 %v4527_v0 }
0x2525   :  { %v4685_v36 = vpop.permute.xlu0 %4684 }
0x2528   :  { %v8487_v59 = vpop.eup %8486 }
0x2529   :  { %v9498_v26 = vmul.f32 %v8487_v59, %v8483_v53 }
0x252b   :  { %7911 = vmatmul.mubr.msk.f32.vlgmr.msra.gmra.mrb[34].mxu0 %vm185_vm2, %v9498_v26 }
0x252c   :  { %v8489_v52 = vpop.eup %8488  ;;  %7919 = vmatpush3.xpose.msk.msra.mxu0 %vm185_vm2, %v4687_v4  ;;  %7920 = vmatprep.mubr.msk.f32.mxu0 %vm8581_vm1, %v8580_v8 }
0x252d   :  { %v9505_v30 = vmul.f32 %v8489_v52, %v8485_v38  ;;  %7928 = vmatprep.subr.mxu0 %v8580_v8 }
0x252f   :  { %7916 = vmatmul.mubr.msk.f32.vlgmr.msra.gmra.mrb[68].mxu1 %vm185_vm2, %v9505_v30  ;;  %7921 = vmatmul.mubr.msk.f32.vlgmr.msra.gmra.mrb[36].mxu0 %vm185_vm2, %v4685_v36 }
0x2530   :  { %7924 = vmatpush3.xpose.msk.msra.mxu1 %vm185_vm2, %v4765_v54  ;;  %7925 = vmatprep.mubr.msk.f32.mxu1 %vm8581_vm1, %v8580_v8 }
0x2531   :  { %7933 = vmatprep.subr.mxu1 %v8580_v8  ;;  %7930 = vmatprep.mubr.msk.f32.mxu0 %vm8581_vm1, %v8580_v8 }
0x2533   :  { %7926 = vmatmul.mubr.msk.f32.vlgmr.msra.gmra.mrb[70].mxu1 %vm185_vm2, %v4763_v39 }
0x2534   :  { %7935 = vmatprep.mubr.msk.f32.mxu1 %vm8581_vm1, %v8580_v8 }
0x25fe   :  { %v4604_v48 = vpop.f32.mrb[34].mxu0 }
0x25ff   :  { %v7912_v19 = vpop.f32.mrb[35].mxu0 }
0x2602   :  { %v4680_v47 = vpop.f32.mrb[68].mxu1  ;;  %v4758_v16 = vpop.f32.mrb[36].mxu0 }
0x2603   :  { %v4759_v53 = vadd.f32 %v9214_v44, %v4758_v16  ;;  %v7917_v7 = vpop.f32.mrb[69].mxu1  ;;  %v7922_v38 = vpop.f32.mrb[37].mxu0 }
0x2605   :  { %v4840_v29 = vsel %vm185_vm2, %v4759_v53, -inf }
0x2606   :  { %4841 = vmax.xlane.f32.xlu0 %v4840_v29  ;;  %v4836_v11 = vpop.f32.mrb[70].mxu1 }
0x2607   :  { %v4837_v0 = vadd.f32 %v9221_v55, %v4836_v11  ;;  %v7927_v4 = vpop.f32.mrb[71].mxu1 }
0x2609   :  { %v4843_v59 = vsel %vm185_vm2, %v4837_v0, -inf }
0x260a   :  { %4844 = vmax.xlane.f32.xlu1 %v4843_v59 }
0x261b   :  { %4862 = vrot.lane.b32.xlu1 %v9368_v62, %s8592_s17 }
0x261f   :  { %5040 = vrot.lane.b32.xlu1 %v9474_v49, %s10022_s22 }
0x2623   :  { %5042 = vrot.lane.b32.xlu1 %v9476_v57, %s10022_s22 }
0x2627   :  { %5050 = vrot.lane.b32.xlu1 %v4680_v47, %s10023_s23 }
0x2693   :  { %v4842_v44 = vpop.xlane.xlu0 %4841 }
0x2694   :  { %v4846_v52 = vsub.f32 %v4759_v53, %v4842_v44 }
0x2696   :  { %v4848_v54 = vmul.f32 1.442695, %v4846_v52 }
0x2697   :  { %v4845_v36 = vpop.xlane.xlu1 %4844 }
0x2698   :  { %8490 = vpow2.f32 %v4848_v54  ;;  %v4847_v55 = vsub.f32 %v4837_v0, %v4845_v36 }
0x269a   :  { %v4850_v39 = vmul.f32 1.442695, %v4847_v55 }
0x269b   :  { %v4863_v19 = vpop.permute.xlu1 %4862 }
0x269c   :  { %8492 = vpow2.f32 %v4850_v39  ;;  %7929 = vmatpush3.msra.mxu0 %v4863_v19 }
0x269d   :  { %8264 = vmatprep.subr.bf16.mxu0 %v8910_v46 }
0x269f   :  { %v5041_v44 = vpop.permute.xlu1 %5040 }
0x26a0   :  { %v5062_v36 = vsel %vm185_vm2, %v9428_v33, %v5041_v44 }
0x26a2   :  { %v8491_v62 = vpop.eup %8490 }
0x26a3   :  { %v4852_v49 = vsel %vm185_vm2, %v8491_v62, 0.0  ;;  %v5043_v52 = vpop.permute.xlu1 %5042 }
0x26a4   :  { %4853 = vadd.xlane.f32.xlu0 %v4852_v49  ;;  %v5063_v49 = vsel %vm185_vm2, %v9430_v34, %v5043_v52  ;;  %v9585_v34 = vld [vmem:[%s9997_s5] ss:$0 sm:$0xff] }
0x26a6   :  { %v8493_v16 = vpop.eup %8492 }
0x26a7   :  { %v4855_v57 = vsel %vm185_vm2, %v8493_v16, 0.0  ;;  %v5051_v55 = vpop.permute.xlu1 %5050 }
0x26a8   :  { %4856 = vadd.xlane.f32.xlu0 %v4855_v57 }
0x26be   :  { %4938 = vrot.lane.b32.xlu0 %v9365_v61, %s8592_s17 }
0x26c2   :  { %5048 = vrot.lane.b32.xlu0 %v4604_v48, %s10023_s23 }
0x2731   :  { %v4854_v47 = vpop.xlane.xlu0 %4853 }
0x2732   :  { %8494 = vrcp.f32 %v4854_v47 }
0x2735   :  { %v4857_v53 = vpop.xlane.xlu0 %4856 }
0x2736   :  { %8496 = vrcp.f32 %v4857_v53 }
0x2739   :  { %v4939_v7 = vpop.permute.xlu0 %4938 }
0x273a   :  { %7934 = vmatpush3.msra.mxu1 %v4939_v7 }
0x273b   :  { %8272 = vmatprep.subr.bf16.mxu1 %v8955_v28 }
0x273c   :  { %v8495_v38 = vpop.eup %8494 }
0x273d   :  { %v9538_v29 = vmul.f32 %v8495_v38, %v8491_v62  ;;  %v5049_v54 = vpop.permute.xlu0 %5048 }
0x273e   :  { %v5064_v39 = vsel %vm1521_vm4, %v5062_v36, %v5049_v54 }
0x273f   :  { %7931 = vmatmul.mubr.msk.f32.vlgmr.msra.gmra.mrb[38].mxu0 %vm185_vm2, %v9538_v29 }
0x2740   :  { %v8497_v11 = vpop.eup %8496  ;;  %8266 = vmatpush3.bf16.msra.mxu0 %v8910_v46 }
0x2741   :  { %v9543_v61 = vmul.f32 %v8497_v11, %v8493_v16  ;;  %8268 = vmatprep.subr.bf16.mxu0 %v8920_v51  ;;  %v5065_v16 = vsel %vm1521_vm4, %v5063_v49, %v5051_v55 }
0x2743   :  { %7936 = vmatmul.mubr.msk.f32.vlgmr.msra.gmra.mrb[72].mxu1 %vm185_vm2, %v9543_v61 }
0x2744   :  { %8270 = vmatpush3.bf16.msra.mxu0 %v8920_v51  ;;  %8274 = vmatpush3.bf16.msra.mxu1 %v8955_v28 }
0x2745   :  { %8276 = vmatprep.subr.bf16.mxu1 %v8965_v37  ;;  %8280 = vmatprep.subr.bf16.mxu0 %v8996_v1 }
0x2748   :  { %8278 = vmatpush3.bf16.msra.mxu1 %v8965_v37 }
0x2749   :  { %8312 = vmatprep.subr.bf16.mxu1 %v8678_v3 }
0x2812   :  { %v4934_v48 = vpop.f32.mrb[38].mxu0 }
0x2813   :  { %5056 = vrot.lane.b32.xlu0 %v4934_v48, %s10024_s24  ;;  %v7932_v0 = vpop.f32.mrb[39].mxu0 }
0x2816   :  { %v5010_v4 = vpop.f32.mrb[72].mxu1 }
0x2817   :  { %5058 = vrot.lane.b32.xlu1 %v5010_v4, %s10024_s24  ;;  %v7937_v59 = vpop.f32.mrb[73].mxu1 }
0x2885   :  { %v5057_v19 = vpop.permute.xlu0 %5056 }
0x2886   :  { %v5066_v62 = vsel %vm1524_vm3, %v5064_v39, %v5057_v19 }
0x2887   :  { %7946 = vmatprep.mubr.msk.f32.mxu0 %vm100_vm0, %v5066_v62 }
0x2889   :  { %v5059_v57 = vpop.permute.xlu1 %5058 }
0x288a   :  { %v5067_v47 = vsel %vm1524_vm3, %v5065_v16, %v5059_v57 }
0x288b   :  { %7947 = vmatmul.mubr.msk.f32.vlgmr.msra.gmra.mrb[40].mxu0 %vm100_vm0, %v5067_v47 }
0x288c   :  { %8282 = vmatpush3.bf16.msra.mxu0 %v8996_v1 }
0x288d   :  { %8284 = vmatprep.subr.bf16.mxu0 %v9006_v10 }
0x2890   :  { %8286 = vmatpush3.bf16.msra.mxu0 %v9006_v10 }
0x2891   :  { %8288 = vmatprep.subr.bf16.mxu0 %v9016_v15 }
0x2894   :  { %8290 = vmatpush3.bf16.msra.mxu0 %v9016_v15 }
0x2895   :  { %8292 = vmatprep.subr.bf16.mxu0 %v9026_v50 }
0x2898   :  { %8294 = vmatpush3.bf16.msra.mxu0 %v9026_v50 }
0x2899   :  { %8296 = vmatprep.subr.bf16.mxu0 %v9039_v24 }
0x289c   :  { %8298 = vmatpush3.bf16.msra.mxu0 %v9039_v24 }
0x289d   :  { %8300 = vmatprep.subr.bf16.mxu0 %v9044_v27 }
0x28a0   :  { %8302 = vmatpush3.bf16.msra.mxu0 %v9044_v27 }
0x28a1   :  { %8304 = vmatprep.subr.bf16.mxu0 %v9055_v32 }
0x28a4   :  { %8306 = vmatpush3.bf16.msra.mxu0 %v9055_v32 }
0x28a5   :  { %8308 = vmatprep.subr.bf16.mxu0 %v9065_v12 }
0x28a8   :  { %8310 = vmatpush3.bf16.msra.mxu0 %v9065_v12 }
0x28a9   :  { %8036 = vmatprep.subr.mxu0 %v8580_v8 }
0x295e   :  { %v7948_v33 = vpop.f32.mrb[40].mxu0 }
0x295f   :  { %v5146_v53 = vadd.f32 %v9585_v34, %v7948_v33  ;;  %v5140_v7 = vpop.f32.mrb[41].mxu0 }
0x2960   :  { %v5141_v38 = vadd.f32 %v9585_v34, %v5140_v7 }
0x2961   :  { %v5150_v11 = vadd.f32 %v5146_v53, %v9351_v9 }
0x2962   :  { %v5149_v48 = vadd.f32 %v5141_v38, %v9348_v58  ;;  %v9598_v38 = vld [vmem:[%s9998_s6] ss:$0 sm:$0xff] }
0x2963   :  { %v5154_v0 = vsel %vm100_vm0, %v5150_v11, 0.0 }
0x2964   :  { %5155 = vadd.xlane.f32.xlu1 %v5154_v0  ;;  %v5151_v4 = vsel %vm100_vm0, %v5149_v48, 0.0 }
0x2965   :  { %5152 = vadd.xlane.f32.xlu0 %v5151_v4  ;;  %v9604_v4 = vld [vmem:[%s9999_s7] ss:$0 sm:$0xff] }
0x29f1   :  { %v5156_v59 = vpop.xlane.xlu1 %5155 }
0x29f2   :  { %v5158_v44 = vmul.f32 0.03125, %v5156_v59  ;;  %v5153_v52 = vpop.xlane.xlu0 %5152 }
0x29f3   :  { %v5157_v54 = vmul.f32 0.03125, %v5153_v52 }
0x29f4   :  { %v5160_v36 = vsub.f32 %v5150_v11, %v5158_v44 }
0x29f5   :  { %v5159_v55 = vsub.f32 %v5149_v48, %v5157_v54 }
0x29f6   :  { %v5162_v62 = vmul.f32 %v5160_v36, %v5160_v36 }
0x29f7   :  { %v5161_v39 = vmul.f32 %v5159_v55, %v5159_v55 }
0x29f8   :  { %v5166_v9 = vsel %vm100_vm0, %v5162_v62, 0.0 }
0x29f9   :  { %v5163_v19 = vsel %vm100_vm0, %v5161_v39, 0.0 }
0x29fa   :  { %5164 = vadd.xlane.f32.xlu0 %v5163_v19 }
0x29fe   :  { %5167 = vadd.xlane.f32.xlu0 %v5166_v9 }
0x2a87   :  { %v5165_v58 = vpop.xlane.xlu0 %5164 }
0x2a88   :  { %v5169_v49 = vmul.f32 0.03125, %v5165_v58 }
0x2a8a   :  { %v5171_v16 = vadd.f32 1e-05, %v5169_v49 }
0x2a8b   :  { %v5168_v57 = vpop.xlane.xlu0 %5167 }
0x2a8c   :  { %8498 = vrsqrt.f32 %v5171_v16  ;;  %v5170_v47 = vmul.f32 0.03125, %v5168_v57 }
0x2a8e   :  { %v5172_v33 = vadd.f32 1e-05, %v5170_v47 }
0x2a90   :  { %8500 = vrsqrt.f32 %v5172_v33 }
0x2a96   :  { %v8499_v53 = vpop.eup %8498 }
0x2a97   :  { %v5175_v7 = vmul.f32 %v8499_v53, %v5159_v55 }
0x2a99   :  { %v5177_v11 = vmul.f32 %v9598_v38, %v5175_v7 }
0x2a9a   :  { %v8501_v48 = vpop.eup %8500 }
0x2a9b   :  { %v5176_v0 = vmul.f32 %v8501_v48, %v5160_v36  ;;  %v5179_v59 = vadd.f32 %v9604_v4, %v5177_v11  ;;  %v9618_v36 = vld [vmem:[%s10001_s9] ss:$0 sm:$0xff] }
0x2a9c   :  { %10026 = vst [vmem:[#allocation8_spill] sm:$0xff] %v9618_v36 }
0x2a9d   :  { %7957 = vmatprep.mubr.msk.f32.mxu1 %vm100_vm0, %v5179_v59  ;;  %v5178_v44 = vmul.f32 %v9598_v38, %v5176_v0 }
0x2a9f   :  { %v5180_v52 = vadd.f32 %v9604_v4, %v5178_v44 }
0x2aa1   :  { %7958 = vmatmul.mubr.msk.f32.vlgmr.msra.gmra.mrb[74].mxu1 %vm100_vm0, %v5180_v52 }
0x2aa2   :  { %8314 = vmatpush3.bf16.msra.mxu1 %v8678_v3 }
0x2aa3   :  { %8316 = vmatprep.subr.bf16.mxu1 %v8688_v6 }
0x2aa6   :  { %8318 = vmatpush3.bf16.msra.mxu1 %v8688_v6 }
0x2aa7   :  { %8006 = vmatprep.subr.mxu1 %v8580_v8 }
0x2b74   :  { %v7959_v54 = vpop.f32.mrb[74].mxu1 }
0x2b75   :  { %v5259_v55 = vadd.f32 %v9618_v36, %v7959_v54  ;;  %v5253_v39 = vpop.f32.mrb[75].mxu1 }
0x2b76   :  { %v5254_v19 = vadd.f32 %v9618_v36, %v5253_v39 }
0x2b77   :  { %v5263_v62 = vmul.f32 %v5259_v55, %v5259_v55 }
0x2b78   :  { %v5262_v9 = vmul.f32 %v5254_v19, %v5254_v19 }
0x2b79   :  { %v5265_v3 = vmul.f32 %v5263_v62, %v5259_v55  ;;  %v9627_v62 = vld [vmem:[%s10003_s11] ss:$0 sm:$0xff] }
0x2b7a   :  { %v5264_v58 = vmul.f32 %v5262_v9, %v5254_v19  ;;  %10027 = vst [vmem:[#allocation9_spill] sm:$0xff] %v9627_v62 }
0x2b7b   :  { %v5267_v49 = vmul.f32 0.044715, %v5265_v3 }
0x2b7c   :  { %v5266_v16 = vmul.f32 0.044715, %v5264_v58 }
0x2b7d   :  { %v5269_v6 = vadd.f32 %v5267_v49, %v5259_v55 }
0x2b7e   :  { %v5268_v57 = vadd.f32 %v5266_v16, %v5254_v19 }
0x2b7f   :  { %v5271_v47 = vmul.f32 0.7978846, %v5269_v6 }
0x2b80   :  { %v5270_v33 = vmul.f32 0.7978846, %v5268_v57  ;;  %v9666_v57 = vld [vmem:[%s9993_s1] ss:$0 sm:$0xff] }
0x2b81   :  { %8502 = vtanh.f32 %v5271_v47 }
0x2b82   :  { %8504 = vtanh.f32 %v5270_v33 }
0x2b8b   :  { %v8503_v53 = vpop.eup %8502 }
0x2b8c   :  { %v8505_v7 = vpop.eup %8504  ;;  %v5275_v11 = vadd.f32 1.0, %v8503_v53 }
0x2b8d   :  { %v5274_v48 = vadd.f32 1.0, %v8505_v7 }
0x2b8e   :  { %v5277_v0 = vmul.f32 0.5, %v5275_v11  ;;  %v9673_v11 = vld [vmem:[%s9993_s1 + $0x1] ss:$0 sm:$0xff]  ;;  %s8596_s1 = smov 32  }
0x2b8f   :  { %v5276_v59 = vmul.f32 0.5, %v5274_v48 }
0x2b90   :  { %v5279_v52 = vmul.f32 %v5277_v0, %v5259_v55 }
0x2b91   :  { %v5278_v44 = vmul.f32 %v5276_v59, %v5254_v19 }
0x2b93   :  { %7992 = vmatprep.mubr.f32.mxu0 %v5278_v44 }
0x2b94   :  { %7993 = vmatmul.mubr.f32.vlgmr.msra.gmra.mrb[42].mxu0 %v5279_v52 }
0x2b95   :  { %8038 = vmatprep.mubr.msk.f32.mxu0 %vm8581_vm1, %v8580_v8 }
0x2c67   :  { %v7994_v54 = vpop.f32.mrb[42].mxu0 }
0x2c68   :  { %v5346_v39 = vpop.f32.mrb[43].mxu0  ;;  %v9633_v3 = vadd.f32 %v9627_v62, %v7994_v54 }
0x2c69   :  { %v9630_v9 = vadd.f32 %v9627_v62, %v5346_v39 }
0x2c6b   :  { %8003 = vmatprep.mubr.msk.f32.mxu1 %vm100_vm0, %v9630_v9 }
0x2c6c   :  { %8004 = vmatmul.mubr.msk.f32.vlgmr.msra.gmra.mrb[76].mxu1 %vm100_vm0, %v9633_v3 }
0x2c6d   :  { %8008 = vmatprep.mubr.msk.f32.mxu1 %vm8581_vm1, %v8580_v8 }
0x2d3f   :  { %v8005_v55 = vpop.f32.mrb[76].mxu1 }
0x2d40   :  { %v9642_v19 = vadd.f32 %v9362_v41, %v8005_v55  ;;  %v5427_v58 = vpop.f32.mrb[77].mxu1 }
0x2d41   :  { %v9645_v49 = vadd.f32 %v9362_v41, %v5427_v58 }
0x2d42   :  { %5514 = vrot.lane.b32.xlu0 %v9642_v19, %s8582_s0 }
0x2d43   :  { %5437 = vrot.lane.b32.xlu1 %v9645_v49, %s8582_s0 }
0x2db4   :  { %v5515_v6 = vpop.permute.xlu0 %5514 }
0x2db5   :  { %v5438_v16 = vpop.permute.xlu1 %5437 }
0x2db6   :  { %8007 = vmatpush3.xpose.msk.msra.mxu1 %vm185_vm2, %v5438_v16 }
0x2db7   :  { %8011 = vmatprep.subr.mxu1 %v8580_v8 }
0x2db9   :  { %8009 = vmatmul.mubr.msk.f32.vlgmr.msra.gmra.mrb[78].mxu1 %vm185_vm2, %v9645_v49 }
0x2dba   :  { %8012 = vmatpush3.xpose.msk.msra.mxu1 %vm185_vm2, %v5515_v6  ;;  %8013 = vmatprep.mubr.msk.f32.mxu1 %vm8581_vm1, %v8580_v8 }
0x2dbb   :  { %8016 = vmatprep.subr.mxu1 %v8580_v8 }
0x2dbd   :  { %8014 = vmatmul.mubr.msk.f32.vlgmr.msra.gmra.mrb[80].mxu1 %vm185_vm2, %v9642_v19 }
0x2dbe   :  { %8018 = vmatprep.mubr.msk.f32.mxu1 %vm8581_vm1, %v8580_v8 }
0x2e8c   :  { %v5509_v41 = vpop.f32.mrb[78].mxu1 }
0x2e8d   :  { %v5510_v47 = vadd.f32 %v9666_v57, %v5509_v41  ;;  %v8010_v33 = vpop.f32.mrb[79].mxu1 }
0x2e8f   :  { %v5590_v53 = vsel %vm185_vm2, %v5510_v47, -inf }
0x2e90   :  { %5591 = vmax.xlane.f32.xlu1 %v5590_v53  ;;  %v5586_v7 = vpop.f32.mrb[80].mxu1 }
0x2e91   :  { %v5587_v48 = vadd.f32 %v9673_v11, %v5586_v7  ;;  %v8015_v0 = vpop.f32.mrb[81].mxu1 }
0x2e93   :  { %v5593_v59 = vsel %vm185_vm2, %v5587_v48, -inf }
0x2e94   :  { %5594 = vmax.xlane.f32.xlu0 %v5593_v59 }
0x2ea1   :  { %5612 = vrot.lane.b32.xlu1 %v9645_v49, %s8583_s25 }
0x2f1d   :  { %v5592_v44 = vpop.xlane.xlu1 %5591 }
0x2f1e   :  { %v5596_v52 = vsub.f32 %v5510_v47, %v5592_v44 }
0x2f20   :  { %v5598_v54 = vmul.f32 1.442695, %v5596_v52 }
0x2f21   :  { %v5613_v39 = vpop.permute.xlu1 %5612  ;;  %v5595_v55 = vpop.xlane.xlu0 %5594 }
0x2f22   :  { %8506 = vpow2.f32 %v5598_v54  ;;  %v5597_v58 = vsub.f32 %v5587_v48, %v5595_v55  ;;  %8017 = vmatpush3.msra.mxu1 %v5613_v39 }
0x2f23   :  { %8021 = vmatprep.subr.mxu1 %v8580_v8 }
0x2f24   :  { %v5600_v16 = vmul.f32 1.442695, %v5597_v58 }
0x2f26   :  { %8508 = vpow2.f32 %v5600_v16 }
0x2f2c   :  { %v8507_v6 = vpop.eup %8506 }
0x2f2d   :  { %v5602_v41 = vsel %vm185_vm2, %v8507_v6, 0.0 }
0x2f2e   :  { %5603 = vadd.xlane.f32.xlu1 %v5602_v41 }
0x2f30   :  { %v8509_v33 = vpop.eup %8508 }
0x2f31   :  { %v5605_v53 = vsel %vm185_vm2, %v8509_v33, 0.0 }
0x2f32   :  { %5606 = vadd.xlane.f32.xlu0 %v5605_v53 }
0x2f3f   :  { %5766 = vrot.lane.b32.xlu1 %v9645_v49, %s8584_s26 }
0x2f43   :  { %5764 = vrot.lane.b32.xlu1 %v9645_v49, %s8585_s27 }
0x2f47   :  { %5842 = vrot.lane.b32.xlu1 %v9642_v19, %s8585_s27 }
0x2f48   :  { %5688 = vrot.lane.b32.xlu0 %v9642_v19, %s8583_s25 }
0x2f4c   :  { %5844 = vrot.lane.b32.xlu0 %v9642_v19, %s8584_s26 }
0x2fbb   :  { %v5604_v47 = vpop.xlane.xlu1 %5603 }
0x2fbc   :  { %8510 = vrcp.f32 %v5604_v47 }
0x2fbf   :  { %v5607_v7 = vpop.xlane.xlu0 %5606  ;;  %v5767_v52 = vpop.permute.xlu1 %5766 }
0x2fc0   :  { %8512 = vrcp.f32 %v5607_v7 }
0x2fc3   :  { %v5689_v59 = vpop.permute.xlu0 %5688  ;;  %v5765_v39 = vpop.permute.xlu1 %5764 }
0x2fc6   :  { %v8511_v48 = vpop.eup %8510 }
0x2fc7   :  { %v9692_v0 = vmul.f32 %v8511_v48, %v8507_v6  ;;  %v5845_v55 = vpop.permute.xlu0 %5844  ;;  %v5843_v58 = vpop.permute.xlu1 %5842 }
0x2fc9   :  { %10028 = vst [vmem:[#allocation10_spill] sm:$0xff] %v9692_v0  ;;  %8019 = vmatmul.mubr.msk.f32.vlgmr.msra.gmra.mrb[82].mxu1 %vm185_vm2, %v9692_v0 }
0x2fca   :  { %v8513_v44 = vpop.eup %8512  ;;  %8022 = vmatpush3.msra.mxu1 %v5689_v59  ;;  %8023 = vmatprep.mubr.msk.f32.mxu1 %vm8581_vm1, %v8580_v8 }
0x2fcb   :  { %v9698_v54 = vmul.f32 %v8513_v44, %v8509_v33  ;;  %8026 = vmatprep.subr.mxu1 %v8580_v8 }
0x2fcd   :  { %8024 = vmatmul.mubr.msk.f32.vlgmr.msra.gmra.mrb[84].mxu1 %vm185_vm2, %v9698_v54 }
0x2fce   :  { %8028 = vmatprep.mubr.msk.f32.mxu1 %vm8581_vm1, %v8580_v8 }
0x2fd1   :  { %8027 = vmatpush3.xpose.msk.msra.mxu1 %vm185_vm2, %v5767_v52 }
0x2fd2   :  { %8031 = vmatprep.subr.mxu1 %v8580_v8 }
0x2fd4   :  { %8029 = vmatmul.mubr.msk.f32.vlgmr.msra.gmra.mrb[86].mxu1 %vm185_vm2, %v5765_v39 }
0x2fd5   :  { %8032 = vmatpush3.xpose.msk.msra.mxu1 %vm185_vm2, %v5845_v55  ;;  %8033 = vmatprep.mubr.msk.f32.mxu1 %vm8581_vm1, %v8580_v8 }
0x2fd6   :  { %8041 = vmatprep.subr.mxu1 %v8580_v8 }
0x2fd8   :  { %8034 = vmatmul.mubr.msk.f32.vlgmr.msra.gmra.mrb[88].mxu1 %vm185_vm2, %v5843_v58 }
0x2fd9   :  { %8043 = vmatprep.mubr.msk.f32.mxu1 %vm8581_vm1, %v8580_v8 }
0x309c   :  { %v9715_v16 = vpop.f32.mrb[82].mxu1 }
0x309d   :  { %v8020_v6 = vpop.f32.mrb[83].mxu1 }
0x30a0   :  { %v9717_v41 = vpop.f32.mrb[84].mxu1 }
0x30a1   :  { %v8025_v33 = vpop.f32.mrb[85].mxu1 }
0x30a7   :  { %v5838_v53 = vpop.f32.mrb[86].mxu1 }
0x30a8   :  { %v5839_v47 = vadd.f32 %v9666_v57, %v5838_v53  ;;  %v8030_v7 = vpop.f32.mrb[87].mxu1 }
0x30aa   :  { %v5920_v48 = vsel %vm185_vm2, %v5839_v47, -inf }
0x30ab   :  { %5921 = vmax.xlane.f32.xlu0 %v5920_v48  ;;  %v5916_v59 = vpop.f32.mrb[88].mxu1 }
0x30ac   :  { %v5917_v44 = vadd.f32 %v9673_v11, %v5916_v59  ;;  %v8035_v52 = vpop.f32.mrb[89].mxu1 }
0x30ae   :  { %v5923_v39 = vsel %vm185_vm2, %v5917_v44, -inf }
0x30af   :  { %5924 = vmax.xlane.f32.xlu1 %v5923_v39 }
0x30c0   :  { %5942 = vrot.lane.b32.xlu1 %v9645_v49, %s8586_s28 }
0x30c1   :  { %6018 = vrot.lane.b32.xlu0 %v9642_v19, %s8586_s28 }
0x30c4   :  { %6096 = vrot.lane.b32.xlu1 %v9645_v49, %s8587_s29 }
0x30c8   :  { %6174 = vrot.lane.b32.xlu1 %v9642_v19, %s8587_s29 }
0x30cc   :  { %6172 = vrot.lane.b32.xlu1 %v9642_v19, %s8588_s30 }
0x3138   :  { %v5922_v55 = vpop.xlane.xlu0 %5921 }
0x3139   :  { %v5926_v58 = vsub.f32 %v5839_v47, %v5922_v55 }
0x313b   :  { %v5928_v6 = vmul.f32 1.442695, %v5926_v58 }
0x313c   :  { %v6019_v33 = vpop.permute.xlu0 %6018  ;;  %v5925_v53 = vpop.xlane.xlu1 %5924 }
0x313d   :  { %8514 = vpow2.f32 %v5928_v6  ;;  %v5927_v7 = vsub.f32 %v5917_v44, %v5925_v53  ;;  %8042 = vmatpush3.msra.mxu1 %v6019_v33 }
0x313e   :  { %8051 = vmatprep.subr.mxu1 %v8580_v8 }
0x313f   :  { %v5930_v48 = vmul.f32 1.442695, %v5927_v7 }
0x3140   :  { %v5943_v59 = vpop.permute.xlu1 %5942 }
0x3141   :  { %8516 = vpow2.f32 %v5930_v48  ;;  %8037 = vmatpush3.msra.mxu0 %v5943_v59 }
0x3142   :  { %8046 = vmatprep.subr.mxu0 %v8580_v8 }
0x3144   :  { %v6097_v58 = vpop.permute.xlu1 %6096 }
0x3147   :  { %v8515_v52 = vpop.eup %8514 }
0x3148   :  { %v5932_v39 = vsel %vm185_vm2, %v8515_v52, 0.0  ;;  %v6175_v7 = vpop.permute.xlu1 %6174 }
0x3149   :  { %5933 = vadd.xlane.f32.xlu0 %v5932_v39 }
0x314b   :  { %v8517_v62 = vpop.eup %8516 }
0x314c   :  { %v5935_v47 = vsel %vm185_vm2, %v8517_v62, 0.0 }
0x314d   :  { %5936 = vadd.xlane.f32.xlu0 %v5935_v47 }
0x3163   :  { %6094 = vrot.lane.b32.xlu0 %v9645_v49, %s8588_s30 }
0x31d6   :  { %v5934_v44 = vpop.xlane.xlu0 %5933 }
0x31d7   :  { %8518 = vrcp.f32 %v5934_v44 }
0x31da   :  { %v5937_v55 = vpop.xlane.xlu0 %5936 }
0x31db   :  { %8520 = vrcp.f32 %v5937_v55 }
0x31de   :  { %v6095_v59 = vpop.permute.xlu0 %6094 }
0x31e1   :  { %v8519_v6 = vpop.eup %8518 }
0x31e2   :  { %v9739_v33 = vmul.f32 %v8519_v6, %v8515_v52 }
0x31e4   :  { %8039 = vmatmul.mubr.msk.f32.vlgmr.msra.gmra.mrb[44].mxu0 %vm185_vm2, %v9739_v33 }
0x31e5   :  { %v8521_v53 = vpop.eup %8520  ;;  %8047 = vmatpush3.xpose.msk.msra.mxu0 %vm185_vm2, %v6097_v58  ;;  %8048 = vmatprep.mubr.msk.f32.mxu0 %vm8581_vm1, %v8580_v8 }
0x31e6   :  { %v9746_v48 = vmul.f32 %v8521_v53, %v8517_v62  ;;  %8056 = vmatprep.subr.mxu0 %v8580_v8  ;;  %v6173_v62 = vpop.permute.xlu1 %6172 }
0x31e8   :  { %8044 = vmatmul.mubr.msk.f32.vlgmr.msra.gmra.mrb[90].mxu1 %vm185_vm2, %v9746_v48  ;;  %8049 = vmatmul.mubr.msk.f32.vlgmr.msra.gmra.mrb[46].mxu0 %vm185_vm2, %v6095_v59 }
0x31e9   :  { %8052 = vmatpush3.xpose.msk.msra.mxu1 %vm185_vm2, %v6175_v7  ;;  %8053 = vmatprep.mubr.msk.f32.mxu1 %vm8581_vm1, %v8580_v8 }
0x31ea   :  { %8061 = vmatprep.subr.mxu1 %v8580_v8  ;;  %8058 = vmatprep.mubr.msk.f32.mxu0 %vm8581_vm1, %v8580_v8 }
0x31ec   :  { %8054 = vmatmul.mubr.msk.f32.vlgmr.msra.gmra.mrb[92].mxu1 %vm185_vm2, %v6173_v62 }
0x31ed   :  { %8063 = vmatprep.mubr.msk.f32.mxu1 %vm8581_vm1, %v8580_v8 }
0x32b7   :  { %v9761_v52 = vpop.f32.mrb[44].mxu0 }
0x32b8   :  { %v8040_v39 = vpop.f32.mrb[45].mxu0 }
0x32bb   :  { %v9763_v47 = vpop.f32.mrb[90].mxu1  ;;  %v6168_v44 = vpop.f32.mrb[46].mxu0 }
0x32bc   :  { %v6169_v55 = vadd.f32 %v9666_v57, %v6168_v44  ;;  %v8045_v58 = vpop.f32.mrb[91].mxu1  ;;  %v8050_v6 = vpop.f32.mrb[47].mxu0 }
0x32be   :  { %v6250_v53 = vsel %vm185_vm2, %v6169_v55, -inf }
0x32bf   :  { %6251 = vmax.xlane.f32.xlu0 %v6250_v53  ;;  %v6246_v7 = vpop.f32.mrb[92].mxu1 }
0x32c0   :  { %v6247_v59 = vadd.f32 %v9673_v11, %v6246_v7  ;;  %v8055_v62 = vpop.f32.mrb[93].mxu1 }
0x32c2   :  { %v6253_v36 = vsel %vm185_vm2, %v6247_v59, -inf }
0x32c3   :  { %6254 = vmax.xlane.f32.xlu1 %v6253_v36 }
0x32d4   :  { %6272 = vrot.lane.b32.xlu1 %v9645_v49, %s8589_s14 }
0x32d5   :  { %6348 = vrot.lane.b32.xlu0 %v9642_v19, %s8589_s14 }
0x32d8   :  { %6426 = vrot.lane.b32.xlu1 %v9645_v49, %s8590_s15 }
0x32dc   :  { %6504 = vrot.lane.b32.xlu1 %v9642_v19, %s8590_s15 }
0x32e0   :  { %6502 = vrot.lane.b32.xlu1 %v9642_v19, %s8591_s16 }
0x334c   :  { %v6252_v39 = vpop.xlane.xlu0 %6251 }
0x334d   :  { %v6256_v44 = vsub.f32 %v6169_v55, %v6252_v39 }
0x334f   :  { %v6258_v58 = vmul.f32 1.442695, %v6256_v44 }
0x3350   :  { %v6349_v6 = vpop.permute.xlu0 %6348  ;;  %v6255_v36 = vpop.xlane.xlu1 %6254 }
0x3351   :  { %8522 = vpow2.f32 %v6258_v58  ;;  %v6257_v53 = vsub.f32 %v6247_v59, %v6255_v36  ;;  %8062 = vmatpush3.msra.mxu1 %v6349_v6 }
0x3352   :  { %8071 = vmatprep.subr.mxu1 %v8580_v8 }
0x3353   :  { %v6260_v7 = vmul.f32 1.442695, %v6257_v53 }
0x3354   :  { %v6273_v62 = vpop.permute.xlu1 %6272 }
0x3355   :  { %8524 = vpow2.f32 %v6260_v7  ;;  %8057 = vmatpush3.msra.mxu0 %v6273_v62 }
0x3356   :  { %8066 = vmatprep.subr.mxu0 %v8580_v8 }
0x3358   :  { %v6427_v44 = vpop.permute.xlu1 %6426 }
0x335b   :  { %v8523_v43 = vpop.eup %8522 }
0x335c   :  { %v6262_v45 = vsel %vm185_vm2, %v8523_v43, 0.0 }
0x335d   :  { %6263 = vadd.xlane.f32.xlu0 %v6262_v45  ;;  %v6505_v45 = vpop.permute.xlu1 %6504 }
0x335f   :  { %v8525_v0 = vpop.eup %8524 }
0x3360   :  { %v6265_v55 = vsel %vm185_vm2, %v8525_v0, 0.0 }
0x3361   :  { %6266 = vadd.xlane.f32.xlu0 %v6265_v55 }
0x3377   :  { %6424 = vrot.lane.b32.xlu0 %v9645_v49, %s8591_s16 }
0x33ea   :  { %v6264_v59 = vpop.xlane.xlu0 %6263 }
0x33eb   :  { %8526 = vrcp.f32 %v6264_v59 }
0x33ee   :  { %v6267_v39 = vpop.xlane.xlu0 %6266 }
0x33ef   :  { %8528 = vrcp.f32 %v6267_v39 }
0x33f2   :  { %v6425_v7 = vpop.permute.xlu0 %6424 }
0x33f5   :  { %v8527_v58 = vpop.eup %8526 }
0x33f6   :  { %v9785_v6 = vmul.f32 %v8527_v58, %v8523_v43  ;;  %v6503_v43 = vpop.permute.xlu1 %6502 }
0x33f8   :  { %8059 = vmatmul.mubr.msk.f32.vlgmr.msra.gmra.mrb[48].mxu0 %vm185_vm2, %v9785_v6 }
0x33f9   :  { %v8529_v36 = vpop.eup %8528  ;;  %8067 = vmatpush3.xpose.msk.msra.mxu0 %vm185_vm2, %v6427_v44  ;;  %8068 = vmatprep.mubr.msk.f32.mxu0 %vm8581_vm1, %v8580_v8 }
0x33fa   :  { %v9792_v53 = vmul.f32 %v8529_v36, %v8525_v0  ;;  %8076 = vmatprep.subr.mxu0 %v8580_v8 }
0x33fc   :  { %8064 = vmatmul.mubr.msk.f32.vlgmr.msra.gmra.mrb[94].mxu1 %vm185_vm2, %v9792_v53  ;;  %8069 = vmatmul.mubr.msk.f32.vlgmr.msra.gmra.mrb[50].mxu0 %vm185_vm2, %v6425_v7 }
0x33fd   :  { %8072 = vmatpush3.xpose.msk.msra.mxu1 %vm185_vm2, %v6505_v45  ;;  %8073 = vmatprep.mubr.msk.f32.mxu1 %vm8581_vm1, %v8580_v8 }
0x33fe   :  { %8081 = vmatprep.subr.mxu1 %v8580_v8  ;;  %8078 = vmatprep.mubr.msk.f32.mxu0 %vm8581_vm1, %v8580_v8 }
0x3400   :  { %8074 = vmatmul.mubr.msk.f32.vlgmr.msra.gmra.mrb[96].mxu1 %vm185_vm2, %v6503_v43 }
0x3401   :  { %8083 = vmatprep.mubr.msk.f32.mxu1 %vm8581_vm1, %v8580_v8 }
0x34cb   :  { %v6344_v0 = vpop.f32.mrb[48].mxu0 }
0x34cc   :  { %v8060_v62 = vpop.f32.mrb[49].mxu0 }
0x34cf   :  { %v6420_v55 = vpop.f32.mrb[94].mxu1  ;;  %v6498_v59 = vpop.f32.mrb[50].mxu0 }
0x34d0   :  { %v6499_v39 = vadd.f32 %v9666_v57, %v6498_v59  ;;  %v8065_v44 = vpop.f32.mrb[95].mxu1  ;;  %v8070_v58 = vpop.f32.mrb[51].mxu0 }
0x34d2   :  { %v6580_v36 = vsel %vm185_vm2, %v6499_v39, -inf }
0x34d3   :  { %6581 = vmax.xlane.f32.xlu0 %v6580_v36  ;;  %v6576_v45 = vpop.f32.mrb[96].mxu1 }
0x34d4   :  { %v6577_v7 = vadd.f32 %v9673_v11, %v6576_v45  ;;  %v8075_v5 = vpop.f32.mrb[97].mxu1 }
0x34d6   :  { %v6583_v43 = vsel %vm185_vm2, %v6577_v7, -inf }
0x34d7   :  { %6584 = vmax.xlane.f32.xlu1 %v6583_v43 }
0x34e8   :  { %6602 = vrot.lane.b32.xlu1 %v9645_v49, %s8592_s17 }
0x34ec   :  { %6780 = vrot.lane.b32.xlu1 %v9761_v52, %s10022_s22 }
0x34f0   :  { %6782 = vrot.lane.b32.xlu1 %v9763_v47, %s10022_s22 }
0x34f4   :  { %6790 = vrot.lane.b32.xlu1 %v6420_v55, %s10023_s23 }
0x3560   :  { %v6582_v8 = vpop.xlane.xlu0 %6581 }
0x3561   :  { %v6586_v57 = vsub.f32 %v6499_v39, %v6582_v8 }
0x3563   :  { %v6588_v62 = vmul.f32 1.442695, %v6586_v57 }
0x3564   :  { %v6585_v59 = vpop.xlane.xlu1 %6584 }
0x3565   :  { %8530 = vpow2.f32 %v6588_v62  ;;  %v6587_v5 = vsub.f32 %v6577_v7, %v6585_v59 }
0x3567   :  { %v6590_v11 = vmul.f32 1.442695, %v6587_v5 }
0x3568   :  { %v6603_v44 = vpop.permute.xlu1 %6602 }
0x3569   :  { %8532 = vpow2.f32 %v6590_v11  ;;  %8077 = vmatpush3.msra.mxu0 %v6603_v44 }
0x356a   :  { %8320 = vmatprep.subr.bf16.mxu0 %v8910_v46 }
0x356c   :  { %v6781_v62 = vpop.permute.xlu1 %6780 }
0x356f   :  { %v8531_v49 = vpop.eup %8530 }
0x3570   :  { %v6592_v52 = vsel %vm185_vm2, %v8531_v49, 0.0  ;;  %v6783_v59 = vpop.permute.xlu1 %6782 }
0x3571   :  { %6593 = vadd.xlane.f32.xlu0 %v6592_v52 }
0x3573   :  { %v8533_v58 = vpop.eup %8532 }
0x3574   :  { %v6595_v47 = vsel %vm185_vm2, %v8533_v58, 0.0 }
0x3575   :  { %6596 = vadd.xlane.f32.xlu0 %v6595_v47 }
0x358b   :  { %6678 = vrot.lane.b32.xlu0 %v9642_v19, %s8592_s17 }
0x358f   :  { %6788 = vrot.lane.b32.xlu0 %v6344_v0, %s10023_s23 }
0x35fe   :  { %v6594_v55 = vpop.xlane.xlu0 %6593 }
0x35ff   :  { %8534 = vrcp.f32 %v6594_v55 }
0x3602   :  { %v6597_v39 = vpop.xlane.xlu0 %6596 }
0x3603   :  { %8536 = vrcp.f32 %v6597_v39 }
0x3606   :  { %v6679_v36 = vpop.permute.xlu0 %6678 }
0x3607   :  { %8082 = vmatpush3.msra.mxu1 %v6679_v36 }
0x3608   :  { %8328 = vmatprep.subr.bf16.mxu1 %v8955_v28 }
0x3609   :  { %v8535_v45 = vpop.eup %8534 }
0x360a   :  { %v9825_v7 = vmul.f32 %v8535_v45, %v8531_v49  ;;  %v6789_v5 = vpop.permute.xlu0 %6788  ;;  %v6803_v49 = vsel %vm185_vm2, %v9717_v41, %v6783_v59 }
0x360c   :  { %8079 = vmatmul.mubr.msk.f32.vlgmr.msra.gmra.mrb[52].mxu0 %vm185_vm2, %v9825_v7 }
0x360d   :  { %v8537_v43 = vpop.eup %8536  ;;  %8322 = vmatpush3.bf16.msra.mxu0 %v8910_v46 }
0x360e   :  { %v6601_v19 = vmul.f32 %v8537_v43, %v8533_v58  ;;  %8324 = vmatprep.subr.bf16.mxu0 %v8920_v51 }
0x3610   :  { %8084 = vmatmul.mubr.msk.f32.vlgmr.msra.gmra.mrb[98].mxu1 %vm185_vm2, %v6601_v19 }
0x3611   :  { %8326 = vmatpush3.bf16.msra.mxu0 %v8920_v51  ;;  %8330 = vmatpush3.bf16.msra.mxu1 %v8955_v28  ;;  %v6802_v51 = vsel %vm185_vm2, %v9715_v16, %v6781_v62  ;;  %v6791_v28 = vpop.permute.xlu1 %6790 }
0x3612   :  { %8332 = vmatprep.subr.bf16.mxu1 %v8965_v37  ;;  %8336 = vmatprep.subr.bf16.mxu0 %v8996_v1  ;;  %v6804_v11 = vsel %vm1521_vm4, %v6802_v51, %v6789_v5  ;;  %v6805_v52 = vsel %vm1521_vm4, %v6803_v49, %v6791_v28 }
0x3615   :  { %8334 = vmatpush3.bf16.msra.mxu1 %v8965_v37 }
0x36df   :  { %v6674_v0 = vpop.f32.mrb[52].mxu0 }
0x36e0   :  { %6796 = vrot.lane.b32.xlu0 %v6674_v0, %s10024_s24  ;;  %v8080_v8 = vpop.f32.mrb[53].mxu0 }
0x36e3   :  { %v6750_v46 = vpop.f32.mrb[98].mxu1 }
0x36e4   :  { %6798 = vrot.lane.b32.xlu1 %v6750_v46, %s10024_s24  ;;  %v8085_v57 = vpop.f32.mrb[99].mxu1 }
0x3752   :  { %v6797_v44 = vpop.permute.xlu0 %6796 }
0x3753   :  { %v6806_v37 = vsel %vm1524_vm3, %v6804_v11, %v6797_v44 }
0x3754   :  { %8094 = vmatprep.mubr.msk.f32.mxu0 %vm100_vm0, %v6806_v37 }
0x3756   :  { %v6799_v58 = vpop.permute.xlu1 %6798 }
0x3757   :  { %v6807_v47 = vsel %vm1524_vm3, %v6805_v52, %v6799_v58  ;;  %v10029_v52 = vld [vmem:[#allocation7_spill] sm:$0xff] }
0x3758   :  { %8095 = vmatmul.mubr.msk.f32.vlgmr.msra.gmra.mrb[54].mxu0 %vm100_vm0, %v6807_v47 }
0x3759   :  { %8338 = vmatpush3.bf16.msra.mxu0 %v8996_v1 }
0x375a   :  { %8340 = vmatprep.subr.bf16.mxu0 %v9006_v10 }
0x375d   :  { %8342 = vmatpush3.bf16.msra.mxu0 %v9006_v10 }
0x375e   :  { %8344 = vmatprep.subr.bf16.mxu0 %v9016_v15 }
0x3761   :  { %8346 = vmatpush3.bf16.msra.mxu0 %v9016_v15 }
0x3762   :  { %8348 = vmatprep.subr.bf16.mxu0 %v9026_v50 }
0x3765   :  { %8350 = vmatpush3.bf16.msra.mxu0 %v9026_v50 }
0x3766   :  { %8352 = vmatprep.subr.bf16.mxu0 %v9039_v24 }
0x3769   :  { %8354 = vmatpush3.bf16.msra.mxu0 %v9039_v24 }
0x376a   :  { %8356 = vmatprep.subr.bf16.mxu0 %v9044_v27 }
0x376d   :  { %8358 = vmatpush3.bf16.msra.mxu0 %v9044_v27 }
0x376e   :  { %8360 = vmatprep.subr.bf16.mxu0 %v9055_v32 }
0x3771   :  { %8362 = vmatpush3.bf16.msra.mxu0 %v9055_v32 }
0x3772   :  { %8364 = vmatprep.subr.bf16.mxu0 %v9065_v12 }
0x3775   :  { %8366 = vmatpush3.bf16.msra.mxu0 %v9065_v12 }
0x382b   :  { %v8096_v1 = vpop.f32.mrb[54].mxu0 }
0x382c   :  { %v6886_v10 = vadd.f32 %v9585_v34, %v8096_v1  ;;  %v6880_v15 = vpop.f32.mrb[55].mxu0 }
0x382d   :  { %v6881_v50 = vadd.f32 %v9585_v34, %v6880_v15 }
0x382e   :  { %v6890_v24 = vadd.f32 %v6886_v10, %v9633_v3 }
0x382f   :  { %v6889_v16 = vadd.f32 %v6881_v50, %v9630_v9  ;;  %v10030_v50 = vld [vmem:[#allocation10_spill] sm:$0xff] }
0x3830   :  { %v6894_v27 = vsel %vm100_vm0, %v6890_v24, 0.0 }
0x3831   :  { %6895 = vadd.xlane.f32.xlu1 %v6894_v27  ;;  %v6891_v41 = vsel %vm100_vm0, %v6889_v16, 0.0 }
0x3832   :  { %6892 = vadd.xlane.f32.xlu0 %v6891_v41 }
0x3842   :  { %3274 = vrot.lane.b32.xlu1 %v9185_v31, %s10022_s22 }
0x3846   :  { %3280 = vrot.lane.b32.xlu1 %v9241_v20, %s10023_s23 }
0x384a   :  { %3282 = vrot.lane.b32.xlu1 %v9248_v56, %s10023_s23 }
0x384e   :  { %5016 = vrot.lane.b32.xlu1 %v9459_v18, %s10022_s22 }
0x3852   :  { %3288 = vrot.lane.b32.xlu1 %v9286_v22, %s10024_s24 }
0x3856   :  { %5022 = vrot.lane.b32.xlu1 %v9505_v30, %s10023_s23 }
0x385a   :  { %6756 = vrot.lane.b32.xlu1 %v9746_v48, %s10022_s22 }
0x385e   :  { %5028 = vrot.lane.b32.xlu1 %v9543_v61, %s10024_s24 }
0x3862   :  { %6762 = vrot.lane.b32.xlu1 %v9792_v53, %s10023_s23 }
0x3866   :  { %6768 = vrot.lane.b32.xlu1 %v6601_v19, %s10024_s24 }
0x386a   :  { %1503 = vrot.lane.b32.xlu1 %v8819_v25, %s10022_s22 }
0x386e   :  { %1509 = vrot.lane.b32.xlu1 %v8865_v63, %s10023_s23 }
0x3872   :  { %1515 = vrot.lane.b32.xlu1 %v8900_v42, %s10024_s24 }
0x38be   :  { %v6896_v32 = vpop.xlane.xlu1 %6895 }
0x38bf   :  { %v6898_v12 = vmul.f32 0.03125, %v6896_v32  ;;  %v6893_v31 = vpop.xlane.xlu0 %6892 }
0x38c0   :  { %v6897_v20 = vmul.f32 0.03125, %v6893_v31 }
0x38c1   :  { %v6900_v56 = vsub.f32 %v6890_v24, %v6898_v12 }
0x38c2   :  { %v6899_v22 = vsub.f32 %v6889_v16, %v6897_v20  ;;  %v3275_v25 = vpop.permute.xlu1 %3274  ;;  %v10031_v20 = vld [vmem:[#allocation6_spill] sm:$0xff] }
0x38c3   :  { %v6902_v61 = vmul.f32 %v6900_v56, %v6900_v56  ;;  %v3292_v19 = vsel %vm185_vm2, %v9138_v2, %v3275_v25 }
0x38c4   :  { %v6901_v18 = vmul.f32 %v6899_v22, %v6899_v22 }
0x38c5   :  { %v6906_v34 = vsel %vm100_vm0, %v6902_v61, 0.0 }
0x38c6   :  { %v6903_v30 = vsel %vm100_vm0, %v6901_v18, 0.0  ;;  %v3281_v63 = vpop.permute.xlu1 %3280 }
0x38c7   :  { %6904 = vadd.xlane.f32.xlu0 %v6903_v30 }
0x38ca   :  { %v3283_v42 = vpop.permute.xlu1 %3282 }
0x38cb   :  { %6907 = vadd.xlane.f32.xlu0 %v6906_v34 }
0x38e1   :  { %3276 = vrot.lane.b32.xlu0 %v9192_v35, %s10022_s22  ;;  %v5017_v35 = vpop.permute.xlu1 %5016 }
0x38e2   :  { %v5033_v45 = vsel %vm185_vm2, %v9411_v17, %v5017_v35 }
0x38e5   :  { %5014 = vrot.lane.b32.xlu0 %v9452_v13, %s10022_s22 }
0x38e9   :  { %3286 = vrot.lane.b32.xlu0 %v9281_v14, %s10024_s24  ;;  %v3289_v14 = vpop.permute.xlu1 %3288 }
0x38ed   :  { %5020 = vrot.lane.b32.xlu0 %v9498_v26, %s10023_s23  ;;  %v5023_v13 = vpop.permute.xlu1 %5022 }
0x38f1   :  { %6754 = vrot.lane.b32.xlu0 %v9739_v33, %s10022_s22  ;;  %v6757_v26 = vpop.permute.xlu1 %6756 }
0x38f2   :  { %v6773_v62 = vsel %vm185_vm2, %v9698_v54, %v6757_v26 }
0x38f5   :  { %5026 = vrot.lane.b32.xlu0 %v9538_v29, %s10024_s24  ;;  %v5029_v33 = vpop.permute.xlu1 %5028 }
0x38f9   :  { %6760 = vrot.lane.b32.xlu0 %v9785_v6, %s10023_s23 }
0x38fd   :  { %6766 = vrot.lane.b32.xlu0 %v9825_v7, %s10024_s24  ;;  %v5035_v7 = vsel %vm1521_vm4, %v5033_v45, %v5023_v13  ;;  %v10032_v13 = vld [vmem:[#allocation5_spill] sm:$0xff] }
0x38fe   :  { %v5037_v0 = vsel %vm1524_vm3, %v5035_v7, %v5029_v33 }
0x3901   :  { %1501 = vrot.lane.b32.xlu0 %v8812_v23, %s10022_s22 }
0x3905   :  { %1507 = vrot.lane.b32.xlu0 %v8858_v60, %s10023_s23 }
0x3909   :  { %1513 = vrot.lane.b32.xlu0 %v8896_v40, %s10024_s24  ;;  %v6763_v40 = vpop.permute.xlu1 %6762 }
0x390a   :  { %v6775_v59 = vsel %vm1521_vm4, %v6773_v62, %v6763_v40 }
0x390d   :  { %v6769_v8 = vpop.permute.xlu1 %6768 }
0x390e   :  { %v6777_v51 = vsel %vm1524_vm3, %v6775_v59, %v6769_v8 }
0x3911   :  { %v1504_v27 = vpop.permute.xlu1 %1503 }
0x3915   :  { %v1510_v41 = vpop.permute.xlu1 %1509 }
0x3919   :  { %v1516_v32 = vpop.permute.xlu1 %1515 }
0x3954   :  { %v6905_v29 = vpop.xlane.xlu0 %6904 }
0x3955   :  { %v6909_v9 = vmul.f32 0.03125, %v6905_v29 }
0x3957   :  { %v6911_v3 = vadd.f32 1e-05, %v6909_v9 }
0x3958   :  { %v6908_v48 = vpop.xlane.xlu0 %6907 }
0x3959   :  { %8538 = vrsqrt.f32 %v6911_v3  ;;  %v6910_v23 = vmul.f32 0.03125, %v6908_v48 }
0x395b   :  { %v6912_v6 = vadd.f32 1e-05, %v6910_v23 }
0x395c   :  { %v3277_v53 = vpop.permute.xlu0 %3276 }
0x395d   :  { %8540 = vrsqrt.f32 %v6912_v6  ;;  %v3293_v60 = vsel %vm185_vm2, %v9144_v21, %v3277_v53  ;;  %v3294_v21 = vsel %vm1521_vm4, %v3292_v19, %v3281_v63 }
0x395e   :  { %v3295_v55 = vsel %vm1521_vm4, %v3293_v60, %v3283_v42  ;;  %v10033_v60 = vld [vmem:[#allocation8_spill] sm:$0xff] }
0x395f   :  { %v3297_v39 = vsel %vm1524_vm3, %v3295_v55, %v3289_v14 }
0x3960   :  { %7101 = vrot.lane.b32.xlu1 %v3297_v39, %s8596_s1  ;;  %v5015_v36 = vpop.permute.xlu0 %5014 }
0x3961   :  { %v5032_v58 = vsel %vm185_vm2, %v10029_v52, %v5015_v36 }
0x3963   :  { %v8539_v43 = vpop.eup %8538 }
0x3964   :  { %7109 = vrot.lane.b32.xlu1 %v5037_v0, %s8583_s25  ;;  %v3287_v46 = vpop.permute.xlu0 %3286  ;;  %v6915_v57 = vmul.f32 %v8539_v43, %v6899_v22 }
0x3965   :  { %v3296_v17 = vsel %vm1524_vm3, %v3294_v21, %v3287_v46 }
0x3966   :  { %7099 = vrot.lane.b32.xlu0 %v3296_v17, %s8596_s1  ;;  %v6917_v5 = vmul.f32 %v9598_v38, %v6915_v57 }
0x3967   :  { %v8541_v2 = vpop.eup %8540 }
0x3968   :  { %v6916_v28 = vmul.f32 %v8541_v2, %v6900_v56  ;;  %7117 = vrot.lane.b32.xlu1 %v6777_v51, %s8582_s0  ;;  %v5021_v11 = vpop.permute.xlu0 %5020  ;;  %v6919_v44 = vadd.f32 %v9604_v4, %v6917_v5  ;;  %v1520_v56 = vsel %vm185_vm2, %v10031_v20, %v1504_v27 }
0x3969   :  { %v5034_v47 = vsel %vm1521_vm4, %v5032_v58, %v5021_v11  ;;  %v1523_v18 = vsel %vm1521_vm4, %v1520_v56, %v1510_v41 }
0x396a   :  { %8105 = vmatprep.mubr.msk.f32.mxu1 %vm100_vm0, %v6919_v44  ;;  %v6918_v54 = vmul.f32 %v9598_v38, %v6916_v28  ;;  %v1526_v30 = vsel %vm1524_vm3, %v1523_v18, %v1516_v32 }
0x396c   :  { %v6755_v37 = vpop.permute.xlu0 %6754  ;;  %v6920_v49 = vadd.f32 %v9604_v4, %v6918_v54  ;;  %v10034_v54 = vld [vmem:[#allocation9_spill] sm:$0xff] }
0x396d   :  { %v6772_v24 = vsel %vm185_vm2, %v10030_v50, %v6755_v37 }
0x396e   :  { %8106 = vmatmul.mubr.msk.f32.vlgmr.msra.gmra.mrb[100].mxu1 %vm100_vm0, %v6920_v49 }
0x3970   :  { %v5027_v1 = vpop.permute.xlu0 %5026 }
0x3971   :  { %v5036_v10 = vsel %vm1524_vm3, %v5034_v47, %v5027_v1 }
0x3972   :  { %7107 = vrot.lane.b32.xlu0 %v5036_v10, %s8583_s25 }
0x3974   :  { %v6761_v15 = vpop.permute.xlu0 %6760 }
0x3975   :  { %v6774_v38 = vsel %vm1521_vm4, %v6772_v24, %v6761_v15 }
0x3978   :  { %v6767_v16 = vpop.permute.xlu0 %6766 }
0x3979   :  { %v6776_v4 = vsel %vm1524_vm3, %v6774_v38, %v6767_v16 }
0x397a   :  { %7115 = vrot.lane.b32.xlu0 %v6776_v4, %s8582_s0 }
0x397c   :  { %v1502_v31 = vpop.permute.xlu0 %1501 }
0x397d   :  { %v1519_v26 = vsel %vm185_vm2, %v10032_v13, %v1502_v31 }
0x3980   :  { %v1508_v34 = vpop.permute.xlu0 %1507 }
0x3981   :  { %v1522_v9 = vsel %vm1521_vm4, %v1519_v26, %v1508_v34 }
0x3984   :  { %v1514_v35 = vpop.permute.xlu0 %1513 }
0x3985   :  { %v1525_v3 = vsel %vm1524_vm3, %v1522_v9, %v1514_v35 }
0x39d2   :  { %v7102_v12 = vpop.permute.xlu1 %7101 }
0x39d3   :  { %v7122_v61 = vsel %vm100_vm0, %v1526_v30, %v7102_v12 }
0x39d6   :  { %v7110_v22 = vpop.permute.xlu1 %7109 }
0x39d7   :  { %v7125_v25 = vsel %vm7123_vm5, %v7122_v61, %v7110_v22 }
0x39d8   :  { %v7100_v14 = vpop.permute.xlu0 %7099 }
0x39d9   :  { %v7121_v33 = vsel %vm100_vm0, %v1525_v3, %v7100_v14 }
0x39da   :  { %v7118_v63 = vpop.permute.xlu1 %7117 }
0x39db   :  { %v7128_v42 = vsel %vm7126_vm6, %v7125_v25, %v7118_v63 }
0x39dc   :  { %7130 = vst [vmem:[%s10005_s13 + $0x8] sm:$0xff] %v7128_v42 }
0x39e4   :  { %v7108_v29 = vpop.permute.xlu0 %7107 }
0x39e5   :  { %v7124_v48 = vsel %vm7123_vm5, %v7121_v33, %v7108_v29 }
0x39ec   :  { %v7116_v23 = vpop.permute.xlu0 %7115 }
0x39ed   :  { %v7127_v6 = vsel %vm7126_vm6, %v7124_v48, %v7116_v23 }
0x39ee   :  { %7129 = vst [vmem:[%s10005_s13] sm:$0xff] %v7127_v6  ;;  %s8597_s13 = smov [#allocation2]  }
0x39ef   :  { %s7136_s28 = sshll.u32 %s8597_s13, 4  ;;  %s7137_s28 = int_to_ptr.vmem [resolvable:$true] %s7136_s28 }
0x39f0   :  { %s8556_s29 = scalar_lea.vmem %s7137_s28, 256  ;;  %p8561_p1 = scmp.lt.s32.totalorder %s7137_s28, %s7137_s28 }
0x39f1   :  { %p8557_p0 = scmp.ne.s32.totalorder %s7137_s28, %s8556_s29  ;;  %p8562_p2 = scmp.lt.s32.totalorder %s8556_s29, %s8556_s29 }
0x39f3   :  { %p8563_p3 = por %p8562_p2, %p8561_p1 }
0x39f5   :  { %p8564_p4 = pnand %p8563_p3, %p8557_p0 }
0x3a41   :  { %v8107_v53 = vpop.f32.mrb[100].mxu1 }
0x3a42   :  { %v6999_v40 = vadd.f32 %v10033_v60, %v8107_v53  ;;  %v6993_v55 = vpop.f32.mrb[101].mxu1 }
0x3a43   :  { %v6994_v39 = vadd.f32 %v10033_v60, %v6993_v55 }
0x3a44   :  { %v7003_v36 = vmul.f32 %v6999_v40, %v6999_v40 }
0x3a45   :  { %v7002_v45 = vmul.f32 %v6994_v39, %v6994_v39 }
0x3a46   :  { %v7005_v7 = vmul.f32 %v7003_v36, %v6999_v40 }
0x3a47   :  { %v7004_v43 = vmul.f32 %v7002_v45, %v6994_v39 }
0x3a48   :  { %v7007_v19 = vmul.f32 0.044715, %v7005_v7 }
0x3a49   :  { %v7006_v0 = vmul.f32 0.044715, %v7004_v43 }
0x3a4a   :  { %v7009_v21 = vadd.f32 %v7007_v19, %v6999_v40 }
0x3a4b   :  { %v7008_v8 = vadd.f32 %v7006_v0, %v6994_v39 }
0x3a4c   :  { %v7011_v46 = vmul.f32 0.7978846, %v7009_v21 }
0x3a4d   :  { %v7010_v57 = vmul.f32 0.7978846, %v7008_v8 }
0x3a4e   :  { %8542 = vtanh.f32 %v7011_v46 }
0x3a4f   :  { %8544 = vtanh.f32 %v7010_v57 }
0x3a58   :  { %v8543_v62 = vpop.eup %8542 }
0x3a59   :  { %v8545_v17 = vpop.eup %8544  ;;  %v7015_v59 = vadd.f32 1.0, %v8543_v62 }
0x3a5a   :  { %v7014_v5 = vadd.f32 1.0, %v8545_v17 }
0x3a5b   :  { %v7017_v2 = vmul.f32 0.5, %v7015_v59 }
0x3a5c   :  { %v7016_v51 = vmul.f32 0.5, %v7014_v5 }
0x3a5d   :  { %v7019_v11 = vmul.f32 %v7017_v2, %v6999_v40 }
0x3a5e   :  { %v7018_v28 = vmul.f32 %v7016_v51, %v6994_v39 }
0x3a60   :  { %8140 = vmatprep.mubr.f32.mxu0 %v7018_v28 }
0x3a61   :  { %8141 = vmatmul.mubr.f32.vlgmr.msra.gmra.mrb[56].mxu0 %v7019_v11 }
0x3b34   :  { %v8142_v44 = vpop.f32.mrb[56].mxu0 }
0x3b35   :  { %v7092_v37 = vadd.f32 %v10034_v54, %v8142_v44  ;;  %v7086_v49 = vpop.f32.mrb[57].mxu0 }
0x3b36   :  { %v7087_v52 = vadd.f32 %v10034_v54, %v7086_v49 }
0x3b37   :  { %7096 = vst.msk [vmem:[#allocation2 + $0x8] sm:$0xff] %vm100_vm0, %v7092_v37 }
0x3b38   :  { %7095 = vst.msk [vmem:[#allocation2] sm:$0xff] %vm100_vm0, %v7087_v52 }
0x3b39   :  { %8567 = shalt.err (!%p8564_p4)
}
0x3b3a   :  { %s8568_s15 = scalar_lea.hbm %s10004_s12, 256 }
0x3b3b   :  { %p8569_p5 = scmp.ne.s32.totalorder %s10004_s12, %s8568_s15  ;;  %p8572_p6 = scmp.lt.u32.totalorder %s8568_s15, %s10004_s12 }
0x3b3d   :  { %p8574_p7 = pnand %p8572_p6, %p8569_p5 }
0x3b3f   :  { %8577 = shalt.err (!%p8574_p7)
}
0x3b40   :  { %s8598_s3 = smov 128  }
0x3b41   :  { %7142 = dma.vmem_to_hbm [thread:$0]  %s7137_s28, 256, %s10004_s12, [#allocation3], %s8598_s3, %s8598_s3, %s10022_s22  }
0x3b42   :  { %8578 = dma.done.wait [#allocation3], 256  }
0x3b43   :  { %8579 = vsyncadd [#allocation3], 4294967040 }
0x3b44   :  { %7150 = vsyncpa [#allocation3], 1 }

</bundles_post_ra>
